<compile_context>
chip_gen: v7x
topology: tpu7x:2x2x1
jax: 0.10.0
libtpu: 0.0.40
codegen_flags: <defaults>
</compile_context>

<pallas_src>
import functools
import math

import jax
import jax.numpy as jnp
from jax import lax
from jax.experimental import pallas as pl
from jax.experimental.pallas import tpu as pltpu


# ----------------------------------------------------------------------------
# Model config (small synthetic shapes consistent with the module)
# ----------------------------------------------------------------------------

HIDDEN = 32
NUM_HEADS = 4
HEAD_DIM = HIDDEN // NUM_HEADS
INTERMEDIATE = 64
NUM_LAYERS = 2
VOCAB = 100
MAX_POS = 64
TYPE_VOCAB = 2
NUM_TAGS = 5
NUM_ENT_IDS = 4          # forward gathers 4 entity positions -> hidden*4
LN_EPS = 1e-12
PACK_LANES = 128

# Row layout of the per-layer packed bias/LN buffer [L, 8, PACK_LANES].
(_ROW_BQKV, _ROW_BO, _ROW_LN1G, _ROW_LN1B,
 _ROW_BI, _ROW_BF, _ROW_LN2G, _ROW_LN2B) = range(8)


# ----------------------------------------------------------------------------
# In-kernel helpers (pure functions of values, f32 math)
# ----------------------------------------------------------------------------

def _layernorm(x, g, b, eps):
    mu = jnp.mean(x, axis=-1, keepdims=True)
    d = x - mu
    var = jnp.mean(d * d, axis=-1, keepdims=True)
    return d * jax.lax.rsqrt(var + eps) * g + b


def _gelu(x):
    # tanh-approximation GELU.
    # TODO(synk): HF BERT's default hidden_act='gelu' is the exact erf GELU;
    # the tanh approximation differs by ~1e-3 relative.
    return 0.5 * x * (1.0 + jnp.tanh(0.7978845608028654 * (x + 0.044715 * x * x * x)))


# ----------------------------------------------------------------------------
# Fused Pallas kernel: emb-LN + all layers + entity gather + classifier
# ----------------------------------------------------------------------------

def _fused_bert_kernel(ids_ref,                       # SMEM [B, NUM_ENT_IDS] i32 (scalar prefetch)
                       x_ref,                         # [B*S, H] f32 embedding sums
                       mask_ref,                      # [B, S] f32 additive mask
                       embg_ref, embb_ref,            # [1, H] f32 embedding LN params
                       wqkv_ref,                      # [L, H, 3H] bf16
                       wo_ref,                        # [L, H, H]  bf16
                       wi_ref,                        # [L, H, I]  bf16
                       wf_ref,                        # [L, I, H]  bf16
                       pack_ref,                      # [L, 8, 128] f32 biases / LN params
                       wc_ref,                        # [4H, NUM_TAGS] bf16
                       bc_ref,                        # [1, NUM_TAGS] f32
                       o_ref,                         # [B, NUM_TAGS] f32
                       xs_ref,                        # VMEM scratch [B*S, H] f32
                       *, batch, seq, num_heads, head_dim, scale, eps):
    H = num_heads * head_dim
    inter = wi_ref.shape[2]
    num_layers = wqkv_ref.shape[0]

    # --- embedding LayerNorm (per token, no residual) ---
    x = _layernorm(x_ref[...], embg_ref[...], embb_ref[...], eps)      # [BS, H] f32

    # --- attention mask, broadcast ONCE (reused across all heads & layers) ---
    mask = mask_ref[...]                                                # [B, S]
    mask_full = [jnp.broadcast_to(mask[b:b + 1, :], (seq, seq)) for b in range(batch)]

    # --- transformer layers (unrolled; weights resident in VMEM) ---
    for l in range(num_layers):
        pvec = pack_ref[l]                                              # [8, 128] f32

        # fused QKV projection, batched over all B*S tokens
        xb = x.astype(jnp.bfloat16)
        qkv = jnp.dot(xb, wqkv_ref[l], preferred_element_type=jnp.float32)   # [BS, 3H]
        q = (qkv[:, 0:H] + pvec[_ROW_BQKV:_ROW_BQKV + 1, 0:H]) * scale  # fold 1/sqrt(Dh)
        k = qkv[:, H:2 * H] + pvec[_ROW_BQKV:_ROW_BQKV + 1, H:2 * H]
        v = qkv[:, 2 * H:3 * H] + pvec[_ROW_BQKV:_ROW_BQKV + 1, 2 * H:3 * H]

        # per-(batch, head) scaled dot-product attention (tiny [S,S] matmuls)
        ctx_rows = []
        for b in range(batch):
            rs = b * seq
            qb = q[rs:rs + seq, :]
            kb = k[rs:rs + seq, :]
            vb = v[rs:rs + seq, :]
            parts = []
            for h in range(num_heads):
                lo = h * head_dim
                qh = qb[:, lo:lo + head_dim]
                kh = kb[:, lo:lo + head_dim]
                vh = vb[:, lo:lo + head_dim]
                s = lax.dot_general(qh, kh, (((1,), (1,)), ((), ())),
                                    preferred_element_type=jnp.float32)     # [S, S]
                s = s + mask_full[b]
                s = s - jnp.max(s, axis=-1, keepdims=True)
                p = jnp.exp(s)
                # approx reciprocal (EUP slot); denominator >= 1 after max-subtraction.
                p = p * pl.reciprocal(jnp.sum(p, axis=-1, keepdims=True), approx=True)
                parts.append(jnp.dot(p, vh, preferred_element_type=jnp.float32))
            ctx_rows.append(jnp.concatenate(parts, axis=-1))            # [S, H]
        ctx = jnp.concatenate(ctx_rows, axis=0)                         # [BS, H]

        # output projection + residual + LayerNorm
        attn = jnp.dot(ctx.astype(jnp.bfloat16), wo_ref[l],
                       preferred_element_type=jnp.float32) + pvec[_ROW_BO:_ROW_BO + 1, 0:H]
        x1 = _layernorm(attn + x,
                        pvec[_ROW_LN1G:_ROW_LN1G + 1, 0:H],
                        pvec[_ROW_LN1B:_ROW_LN1B + 1, 0:H], eps)

        # feed forward (GELU) + residual + LayerNorm
        hmid = jnp.dot(x1.astype(jnp.bfloat16), wi_ref[l],
                       preferred_element_type=jnp.float32) + pvec[_ROW_BI:_ROW_BI + 1, 0:inter]
        hmid = _gelu(hmid)
        ff = jnp.dot(hmid.astype(jnp.bfloat16), wf_ref[l],
                     preferred_element_type=jnp.float32) + pvec[_ROW_BF:_ROW_BF + 1, 0:H]
        x = _layernorm(ff + x1,
                       pvec[_ROW_LN2G:_ROW_LN2G + 1, 0:H],
                       pvec[_ROW_LN2B:_ROW_LN2B + 1, 0:H], eps)

    # --- per-example entity gather (dynamic ref slices from VMEM scratch) ---
    xs_ref[...] = x                                                     # [BS, H]
    ent_rows = []
    for b in range(batch):
        cols = []
        for e in range(NUM_ENT_IDS):
            idx = ids_ref[b, e]                                         # SMEM scalar
            cols.append(xs_ref[pl.ds(b * seq + idx, 1), :])             # [1, H]
        ent_rows.append(jnp.concatenate(cols, axis=-1))                 # [1, 4H]
    seq_ent = jnp.concatenate(ent_rows, axis=0)                         # [B, 4H]
    # TODO(synk): dropout on seq_ent is identity (inference mode).

    # --- classification head, fused ---
    logits = jnp.dot(seq_ent.astype(jnp.bfloat16), wc_ref[...],
                     preferred_element_type=jnp.float32) + bc_ref[...]
    o_ref[...] = logits.astype(o_ref.dtype)


def fused_forward(params, emb_flat, add_mask, ids, *, batch, seq):
    """emb_flat: [B*S, H] f32; add_mask: [B, S] f32; ids: [B, NUM_ENT_IDS] i32."""
    BS, H = emb_flat.shape
    kern = functools.partial(_fused_bert_kernel, batch=batch, seq=seq,
                             num_heads=NUM_HEADS, head_dim=HEAD_DIM,
                             scale=1.0 / math.sqrt(HEAD_DIM), eps=LN_EPS)

    def spec(shape):
        # whole array resident in VMEM, DMA'd once for the (size-1) grid
        return pl.BlockSpec(shape, lambda i, ids_ref, n=len(shape): (0,) * n)

    in_arrays = [
        emb_flat, add_mask,
        params["emb_ln_g"], params["emb_ln_b"],
        params["wqkv"], params["wo"], params["wi"], params["wf"], params["pack"],
        params["cls_w"], params["cls_b"],
    ]

    grid_spec = pltpu.PrefetchScalarGridSpec(
        num_scalar_prefetch=1,                      # `ids` -> SMEM
        grid=(1,),
        in_specs=[spec(a.shape) for a in in_arrays],
        out_specs=spec((batch, NUM_TAGS)),
        scratch_shapes=[pltpu.VMEM((BS, H), jnp.float32)],
    )
    return pl.pallas_call(
        kern,
        out_shape=jax.ShapeDtypeStruct((batch, NUM_TAGS), jnp.float32),
        grid_spec=grid_spec,
        compiler_params=pltpu.CompilerParams(dimension_semantics=("arbitrary",)),
    )(ids, *in_arrays)


# ----------------------------------------------------------------------------
# Parameters (deterministic synthetic init, pre-fused / pre-cast / pre-packed)
# ----------------------------------------------------------------------------

def _pad_row(vec, lanes=PACK_LANES):
    row = jnp.zeros((lanes,), jnp.float32)
    return row.at[:vec.shape[0]].set(vec)


def init_params(key):
    keys = iter(jax.random.split(key, 64))

    def w(shape):
        return 0.02 * jax.random.normal(next(keys), shape, dtype=jnp.float32)

    wqkv_l, wo_l, wi_l, wf_l, pack_l = [], [], [], [], []
    for _ in range(NUM_LAYERS):
        wq = w((HIDDEN, HIDDEN))
        wk = w((HIDDEN, HIDDEN))
        wv = w((HIDDEN, HIDDEN))
        wqkv_l.append(jnp.concatenate([wq, wk, wv], axis=1))     # [H, 3H]
        wo_l.append(w((HIDDEN, HIDDEN)))
        wi_l.append(w((HIDDEN, INTERMEDIATE)))
        wf_l.append(w((INTERMEDIATE, HIDDEN)))

        bqkv = jnp.zeros((3 * HIDDEN,), jnp.float32)
        bo = jnp.zeros((HIDDEN,), jnp.float32)
        g1 = jnp.ones((HIDDEN,), jnp.float32)
        b1 = jnp.zeros((HIDDEN,), jnp.float32)
        bi = jnp.zeros((INTERMEDIATE,), jnp.float32)
        bf = jnp.zeros((HIDDEN,), jnp.float32)
        g2 = jnp.ones((HIDDEN,), jnp.float32)
        b2 = jnp.zeros((HIDDEN,), jnp.float32)
        pack_l.append(jnp.stack([_pad_row(v) for v in
                                 (bqkv, bo, g1, b1, bi, bf, g2, b2)]))   # [8, 128]

    return {
        "word_emb": w((VOCAB, HIDDEN)),
        "pos_emb": w((MAX_POS, HIDDEN)),
        "type_emb": w((TYPE_VOCAB, HIDDEN)),
        "emb_ln_g": jnp.ones((1, HIDDEN), jnp.float32),
        "emb_ln_b": jnp.zeros((1, HIDDEN), jnp.float32),
        "wqkv": jnp.stack(wqkv_l).astype(jnp.bfloat16),          # [L, H, 3H]
        "wo": jnp.stack(wo_l).astype(jnp.bfloat16),              # [L, H, H]
        "wi": jnp.stack(wi_l).astype(jnp.bfloat16),              # [L, H, I]
        "wf": jnp.stack(wf_l).astype(jnp.bfloat16),              # [L, I, H]
        "pack": jnp.stack(pack_l),                               # [L, 8, 128] f32
        "cls_w": w((HIDDEN * NUM_ENT_IDS, NUM_TAGS)).astype(jnp.bfloat16),
        "cls_b": jnp.zeros((1, NUM_TAGS), jnp.float32),
    }


# ----------------------------------------------------------------------------
# Forward pass (mirrors BertForRelationExtraction.forward)
# ----------------------------------------------------------------------------

def bert_for_relation_extraction(params, token_ids, attention_masks,
                                 token_type_ids, ids):
    B, S = token_ids.shape

    # --- embeddings (table gathers stay as plain-JAX glue) ---
    pos_ids = jnp.arange(S, dtype=jnp.int32)
    emb = (params["word_emb"][token_ids]
           + params["pos_emb"][pos_ids][None, :, :]
           + params["type_emb"][token_type_ids])                 # [B, S, H] f32
    emb_flat = emb.reshape(B * S, HIDDEN)

    # additive attention mask: 0 where attended, -10000 where masked
    add_mask = (1.0 - attention_masks.astype(jnp.float32)) * -10000.0   # [B, S]

    # --- single fused Pallas kernel: emb-LN + layers + gather + classifier ---
    logits = fused_forward(params, emb_flat, add_mask, ids.astype(jnp.int32),
                           batch=B, seq=S)                       # [B, NUM_TAGS]
    return logits


# ----------------------------------------------------------------------------

if __name__ == "__main__":
    key = jax.random.PRNGKey(0)
    pkey, k1, k2, k3 = jax.random.split(key, 4)

    B, S = 2, 8
    params = init_params(pkey)

    token_ids = jax.random.randint(k1, (B, S), 0, VOCAB, dtype=jnp.int32)
    token_type_ids = jax.random.randint(k2, (B, S), 0, TYPE_VOCAB, dtype=jnp.int32)
    attention_masks = jnp.array(
        [[1, 1, 1, 1, 1, 1, 1, 1],
         [1, 1, 1, 1, 1, 1, 0, 0]], dtype=jnp.float32)
    ids = jax.random.randint(k3, (B, NUM_ENT_IDS), 0, S, dtype=jnp.int32)

    fwd = jax.jit(bert_for_relation_extraction)
    logits = fwd(params, token_ids, attention_masks, token_type_ids, ids)
    jax.block_until_ready(logits)

    assert logits.shape == (B, NUM_TAGS), logits.shape
    assert logits.dtype == jnp.float32
    assert bool(jnp.all(jnp.isfinite(logits)))
    print("KERNEL_OK")
</pallas_src>

<mosaic_0001>
module attributes {stable_mosaic.version = 11 : i64} {
  func.func @_fused_bert_kernel(%arg0: i32, %arg1: memref<2x4xi32, #tpu.memory_space<smem>>, %arg2: memref<16x32xf32, #tpu.memory_space<vmem>>, %arg3: memref<2x8xf32, #tpu.memory_space<vmem>>, %arg4: memref<1x32xf32, #tpu.memory_space<vmem>>, %arg5: memref<1x32xf32, #tpu.memory_space<vmem>>, %arg6: memref<2x32x96xbf16, #tpu.memory_space<vmem>>, %arg7: memref<2x32x32xbf16, #tpu.memory_space<vmem>>, %arg8: memref<2x32x64xbf16, #tpu.memory_space<vmem>>, %arg9: memref<2x64x32xbf16, #tpu.memory_space<vmem>>, %arg10: memref<2x8x128xf32, #tpu.memory_space<vmem>>, %arg11: memref<128x5xbf16, #tpu.memory_space<vmem>>, %arg12: memref<1x5xf32, #tpu.memory_space<vmem>>, %arg13: memref<2x5xf32, #tpu.memory_space<vmem>>, %arg14: memref<16x32xf32, #tpu.memory_space<vmem>>) attributes {dimension_semantics = [#tpu.dimension_semantics<arbitrary>], iteration_bounds = array<i64: 1>, scalar_prefetch = 1 : i64, scratch_operands = 1 : i64, tpu.core_type = #tpu.core_type<tc>, window_params = [{pipeline_mode = #tpu.pipeline_mode<synchronous>, transform_indices = @transform_0, window_bounds = array<i64: 16, 32>}, {pipeline_mode = #tpu.pipeline_mode<synchronous>, transform_indices = @transform_1, window_bounds = array<i64: 2, 8>}, {pipeline_mode = #tpu.pipeline_mode<synchronous>, transform_indices = @transform_2, window_bounds = array<i64: 1, 32>}, {pipeline_mode = #tpu.pipeline_mode<synchronous>, transform_indices = @transform_3, window_bounds = array<i64: 1, 32>}, {pipeline_mode = #tpu.pipeline_mode<synchronous>, transform_indices = @transform_4, window_bounds = array<i64: 2, 32, 96>}, {pipeline_mode = #tpu.pipeline_mode<synchronous>, transform_indices = @transform_5, window_bounds = array<i64: 2, 32, 32>}, {pipeline_mode = #tpu.pipeline_mode<synchronous>, transform_indices = @transform_6, window_bounds = array<i64: 2, 32, 64>}, {pipeline_mode = #tpu.pipeline_mode<synchronous>, transform_indices = @transform_7, window_bounds = array<i64: 2, 64, 32>}, {pipeline_mode = #tpu.pipeline_mode<synchronous>, transform_indices = @transform_8, window_bounds = array<i64: 2, 8, 128>}, {pipeline_mode = #tpu.pipeline_mode<synchronous>, transform_indices = @transform_9, window_bounds = array<i64: 128, 5>}, {pipeline_mode = #tpu.pipeline_mode<synchronous>, transform_indices = @transform_10, window_bounds = array<i64: 1, 5>}, {pipeline_mode = #tpu.pipeline_mode<synchronous>, transform_indices = @transform_11, window_bounds = array<i64: 2, 5>}]} {
    %c0 = arith.constant 0 : index
    %c0_0 = arith.constant 0 : index
    %0 = vector.load %arg2[%c0, %c0_0] : memref<16x32xf32, #tpu.memory_space<vmem>>, vector<16x32xf32>
    %c0_1 = arith.constant 0 : index
    %c0_2 = arith.constant 0 : index
    %1 = vector.load %arg4[%c0_1, %c0_2] : memref<1x32xf32, #tpu.memory_space<vmem>>, vector<1x32xf32>
    %c0_3 = arith.constant 0 : index
    %c0_4 = arith.constant 0 : index
    %2 = vector.load %arg5[%c0_3, %c0_4] : memref<1x32xf32, #tpu.memory_space<vmem>>, vector<1x32xf32>
    %cst = arith.constant dense<0.000000e+00> : vector<16xf32>
    %3 = vector.multi_reduction <add>, %0, %cst [1] : vector<16x32xf32> to vector<16xf32>
    %4 = vector.shape_cast %3 : vector<16xf32> to vector<16x1xf32>
    %cst_5 = arith.constant 3.200000e+01 : f32
    %5 = vector.broadcast %cst_5 : f32 to vector<16x1xf32>
    %6 = arith.divf %4, %5 : vector<16x1xf32>
    %7 = vector.broadcast %6 : vector<16x1xf32> to vector<16x32xf32>
    %8 = arith.subf %0, %7 : vector<16x32xf32>
    %9 = arith.mulf %8, %8 : vector<16x32xf32>
    %cst_6 = arith.constant dense<0.000000e+00> : vector<16xf32>
    %10 = vector.multi_reduction <add>, %9, %cst_6 [1] : vector<16x32xf32> to vector<16xf32>
    %11 = vector.shape_cast %10 : vector<16xf32> to vector<16x1xf32>
    %cst_7 = arith.constant 3.200000e+01 : f32
    %12 = vector.broadcast %cst_7 : f32 to vector<16x1xf32>
    %13 = arith.divf %11, %12 : vector<16x1xf32>
    %cst_8 = arith.constant 9.99999996E-13 : f32
    %14 = vector.broadcast %cst_8 : f32 to vector<16x1xf32>
    %15 = arith.addf %13, %14 : vector<16x1xf32>
    %16 = math.rsqrt %15 : vector<16x1xf32>
    %17 = vector.broadcast %16 : vector<16x1xf32> to vector<16x32xf32>
    %18 = arith.mulf %8, %17 : vector<16x32xf32>
    %19 = vector.broadcast %1 : vector<1x32xf32> to vector<16x32xf32>
    %20 = arith.mulf %18, %19 : vector<16x32xf32>
    %21 = vector.broadcast %2 : vector<1x32xf32> to vector<16x32xf32>
    %22 = arith.addf %20, %21 : vector<16x32xf32>
    %c0_9 = arith.constant 0 : index
    %c0_10 = arith.constant 0 : index
    %23 = vector.load %arg3[%c0_9, %c0_10] : memref<2x8xf32, #tpu.memory_space<vmem>>, vector<2x8xf32>
    %24 = vector.extract_strided_slice %23 {offsets = [0, 0], sizes = [1, 8], strides = [1, 1]} : vector<2x8xf32> to vector<1x8xf32>
    %25 = vector.shape_cast %24 : vector<1x8xf32> to vector<1x8xf32>
    %26 = vector.broadcast %25 : vector<1x8xf32> to vector<8x8xf32>
    %27 = vector.extract_strided_slice %23 {offsets = [1, 0], sizes = [1, 8], strides = [1, 1]} : vector<2x8xf32> to vector<1x8xf32>
    %28 = vector.shape_cast %27 : vector<1x8xf32> to vector<1x8xf32>
    %29 = vector.broadcast %28 : vector<1x8xf32> to vector<8x8xf32>
    %c0_11 = arith.constant 0 : index
    %c0_12 = arith.constant 0 : index
    %c0_13 = arith.constant 0 : index
    %30 = vector.load %arg10[%c0_11, %c0_12, %c0_13] : memref<2x8x128xf32, #tpu.memory_space<vmem>>, vector<1x8x128xf32>
    %31 = vector.shape_cast %30 : vector<1x8x128xf32> to vector<8x128xf32>
    %32 = arith.truncf %22 : vector<16x32xf32> to vector<16x32xbf16>
    %c0_14 = arith.constant 0 : index
    %c0_15 = arith.constant 0 : index
    %c0_16 = arith.constant 0 : index
    %33 = vector.load %arg6[%c0_14, %c0_15, %c0_16] : memref<2x32x96xbf16, #tpu.memory_space<vmem>>, vector<1x32x96xbf16>
    %34 = vector.shape_cast %33 : vector<1x32x96xbf16> to vector<32x96xbf16>
    %cst_17 = arith.constant dense<0.000000e+00> : vector<16x96xf32>
    %35 = tpu.matmul %32, %34, %cst_17 {dimension_numbers = #tpu.dot_dimension_numbers<[1], [0], [0], [1], [0, 0, 1, 1], [], []>} : vector<16x32xbf16>, vector<32x96xbf16>, vector<16x96xf32> -> vector<16x96xf32>
    %36 = vector.extract_strided_slice %35 {offsets = [0, 0], sizes = [16, 32], strides = [1, 1]} : vector<16x96xf32> to vector<16x32xf32>
    %37 = vector.extract_strided_slice %31 {offsets = [0, 0], sizes = [1, 32], strides = [1, 1]} : vector<8x128xf32> to vector<1x32xf32>
    %38 = vector.broadcast %37 : vector<1x32xf32> to vector<16x32xf32>
    %39 = arith.addf %36, %38 : vector<16x32xf32>
    %cst_18 = arith.constant 0.353553385 : f32
    %40 = vector.broadcast %cst_18 : f32 to vector<16x32xf32>
    %41 = arith.mulf %39, %40 : vector<16x32xf32>
    %42 = vector.extract_strided_slice %35 {offsets = [0, 32], sizes = [16, 32], strides = [1, 1]} : vector<16x96xf32> to vector<16x32xf32>
    %43 = vector.extract_strided_slice %31 {offsets = [0, 32], sizes = [1, 32], strides = [1, 1]} : vector<8x128xf32> to vector<1x32xf32>
    %44 = vector.broadcast %43 : vector<1x32xf32> to vector<16x32xf32>
    %45 = arith.addf %42, %44 : vector<16x32xf32>
    %46 = vector.extract_strided_slice %35 {offsets = [0, 64], sizes = [16, 32], strides = [1, 1]} : vector<16x96xf32> to vector<16x32xf32>
    %47 = vector.extract_strided_slice %31 {offsets = [0, 64], sizes = [1, 32], strides = [1, 1]} : vector<8x128xf32> to vector<1x32xf32>
    %48 = vector.broadcast %47 : vector<1x32xf32> to vector<16x32xf32>
    %49 = arith.addf %46, %48 : vector<16x32xf32>
    %50 = vector.extract_strided_slice %41 {offsets = [0, 0], sizes = [8, 32], strides = [1, 1]} : vector<16x32xf32> to vector<8x32xf32>
    %51 = vector.extract_strided_slice %45 {offsets = [0, 0], sizes = [8, 32], strides = [1, 1]} : vector<16x32xf32> to vector<8x32xf32>
    %52 = vector.extract_strided_slice %49 {offsets = [0, 0], sizes = [8, 32], strides = [1, 1]} : vector<16x32xf32> to vector<8x32xf32>
    %53 = vector.extract_strided_slice %50 {offsets = [0, 0], sizes = [8, 8], strides = [1, 1]} : vector<8x32xf32> to vector<8x8xf32>
    %54 = vector.extract_strided_slice %51 {offsets = [0, 0], sizes = [8, 8], strides = [1, 1]} : vector<8x32xf32> to vector<8x8xf32>
    %55 = vector.extract_strided_slice %52 {offsets = [0, 0], sizes = [8, 8], strides = [1, 1]} : vector<8x32xf32> to vector<8x8xf32>
    %cst_19 = arith.constant dense<0.000000e+00> : vector<8x8xf32>
    %56 = tpu.matmul %53, %54, %cst_19 {dimension_numbers = #tpu.dot_dimension_numbers<[1], [1], [0], [0], [0, 0, 1, 0], [], []>} : vector<8x8xf32>, vector<8x8xf32>, vector<8x8xf32> -> vector<8x8xf32>
    %57 = arith.addf %56, %26 : vector<8x8xf32>
    %cst_20 = arith.constant dense<0xFF800000> : vector<8xf32>
    %58 = vector.multi_reduction <maximumf>, %57, %cst_20 [1] : vector<8x8xf32> to vector<8xf32>
    %59 = vector.shape_cast %58 : vector<8xf32> to vector<8x1xf32>
    %60 = vector.broadcast %59 : vector<8x1xf32> to vector<8x8xf32>
    %61 = arith.subf %57, %60 : vector<8x8xf32>
    %62 = math.exp %61 : vector<8x8xf32>
    %cst_21 = arith.constant dense<0.000000e+00> : vector<8xf32>
    %63 = vector.multi_reduction <add>, %62, %cst_21 [1] : vector<8x8xf32> to vector<8xf32>
    %64 = vector.shape_cast %63 : vector<8xf32> to vector<8x1xf32>
    %65 = tpu.reciprocal %64 {approx = true} : vector<8x1xf32> -> vector<8x1xf32>
    %66 = vector.broadcast %65 : vector<8x1xf32> to vector<8x8xf32>
    %67 = arith.mulf %62, %66 : vector<8x8xf32>
    %cst_22 = arith.constant dense<0.000000e+00> : vector<8x8xf32>
    %68 = tpu.matmul %67, %55, %cst_22 {dimension_numbers = #tpu.dot_dimension_numbers<[1], [0], [0], [1], [0, 0, 1, 1], [], []>} : vector<8x8xf32>, vector<8x8xf32>, vector<8x8xf32> -> vector<8x8xf32>
    %69 = vector.extract_strided_slice %50 {offsets = [0, 8], sizes = [8, 8], strides = [1, 1]} : vector<8x32xf32> to vector<8x8xf32>
    %70 = vector.extract_strided_slice %51 {offsets = [0, 8], sizes = [8, 8], strides = [1, 1]} : vector<8x32xf32> to vector<8x8xf32>
    %71 = vector.extract_strided_slice %52 {offsets = [0, 8], sizes = [8, 8], strides = [1, 1]} : vector<8x32xf32> to vector<8x8xf32>
    %cst_23 = arith.constant dense<0.000000e+00> : vector<8x8xf32>
    %72 = tpu.matmul %69, %70, %cst_23 {dimension_numbers = #tpu.dot_dimension_numbers<[1], [1], [0], [0], [0, 0, 1, 0], [], []>} : vector<8x8xf32>, vector<8x8xf32>, vector<8x8xf32> -> vector<8x8xf32>
    %73 = arith.addf %72, %26 : vector<8x8xf32>
    %cst_24 = arith.constant dense<0xFF800000> : vector<8xf32>
    %74 = vector.multi_reduction <maximumf>, %73, %cst_24 [1] : vector<8x8xf32> to vector<8xf32>
    %75 = vector.shape_cast %74 : vector<8xf32> to vector<8x1xf32>
    %76 = vector.broadcast %75 : vector<8x1xf32> to vector<8x8xf32>
    %77 = arith.subf %73, %76 : vector<8x8xf32>
    %78 = math.exp %77 : vector<8x8xf32>
    %cst_25 = arith.constant dense<0.000000e+00> : vector<8xf32>
    %79 = vector.multi_reduction <add>, %78, %cst_25 [1] : vector<8x8xf32> to vector<8xf32>
    %80 = vector.shape_cast %79 : vector<8xf32> to vector<8x1xf32>
    %81 = tpu.reciprocal %80 {approx = true} : vector<8x1xf32> -> vector<8x1xf32>
    %82 = vector.broadcast %81 : vector<8x1xf32> to vector<8x8xf32>
    %83 = arith.mulf %78, %82 : vector<8x8xf32>
    %cst_26 = arith.constant dense<0.000000e+00> : vector<8x8xf32>
    %84 = tpu.matmul %83, %71, %cst_26 {dimension_numbers = #tpu.dot_dimension_numbers<[1], [0], [0], [1], [0, 0, 1, 1], [], []>} : vector<8x8xf32>, vector<8x8xf32>, vector<8x8xf32> -> vector<8x8xf32>
    %85 = vector.extract_strided_slice %50 {offsets = [0, 16], sizes = [8, 8], strides = [1, 1]} : vector<8x32xf32> to vector<8x8xf32>
    %86 = vector.extract_strided_slice %51 {offsets = [0, 16], sizes = [8, 8], strides = [1, 1]} : vector<8x32xf32> to vector<8x8xf32>
    %87 = vector.extract_strided_slice %52 {offsets = [0, 16], sizes = [8, 8], strides = [1, 1]} : vector<8x32xf32> to vector<8x8xf32>
    %cst_27 = arith.constant dense<0.000000e+00> : vector<8x8xf32>
    %88 = tpu.matmul %85, %86, %cst_27 {dimension_numbers = #tpu.dot_dimension_numbers<[1], [1], [0], [0], [0, 0, 1, 0], [], []>} : vector<8x8xf32>, vector<8x8xf32>, vector<8x8xf32> -> vector<8x8xf32>
    %89 = arith.addf %88, %26 : vector<8x8xf32>
    %cst_28 = arith.constant dense<0xFF800000> : vector<8xf32>
    %90 = vector.multi_reduction <maximumf>, %89, %cst_28 [1] : vector<8x8xf32> to vector<8xf32>
    %91 = vector.shape_cast %90 : vector<8xf32> to vector<8x1xf32>
    %92 = vector.broadcast %91 : vector<8x1xf32> to vector<8x8xf32>
    %93 = arith.subf %89, %92 : vector<8x8xf32>
    %94 = math.exp %93 : vector<8x8xf32>
    %cst_29 = arith.constant dense<0.000000e+00> : vector<8xf32>
    %95 = vector.multi_reduction <add>, %94, %cst_29 [1] : vector<8x8xf32> to vector<8xf32>
    %96 = vector.shape_cast %95 : vector<8xf32> to vector<8x1xf32>
    %97 = tpu.reciprocal %96 {approx = true} : vector<8x1xf32> -> vector<8x1xf32>
    %98 = vector.broadcast %97 : vector<8x1xf32> to vector<8x8xf32>
    %99 = arith.mulf %94, %98 : vector<8x8xf32>
    %cst_30 = arith.constant dense<0.000000e+00> : vector<8x8xf32>
    %100 = tpu.matmul %99, %87, %cst_30 {dimension_numbers = #tpu.dot_dimension_numbers<[1], [0], [0], [1], [0, 0, 1, 1], [], []>} : vector<8x8xf32>, vector<8x8xf32>, vector<8x8xf32> -> vector<8x8xf32>
    %101 = vector.extract_strided_slice %50 {offsets = [0, 24], sizes = [8, 8], strides = [1, 1]} : vector<8x32xf32> to vector<8x8xf32>
    %102 = vector.extract_strided_slice %51 {offsets = [0, 24], sizes = [8, 8], strides = [1, 1]} : vector<8x32xf32> to vector<8x8xf32>
    %103 = vector.extract_strided_slice %52 {offsets = [0, 24], sizes = [8, 8], strides = [1, 1]} : vector<8x32xf32> to vector<8x8xf32>
    %cst_31 = arith.constant dense<0.000000e+00> : vector<8x8xf32>
    %104 = tpu.matmul %101, %102, %cst_31 {dimension_numbers = #tpu.dot_dimension_numbers<[1], [1], [0], [0], [0, 0, 1, 0], [], []>} : vector<8x8xf32>, vector<8x8xf32>, vector<8x8xf32> -> vector<8x8xf32>
    %105 = arith.addf %104, %26 : vector<8x8xf32>
    %cst_32 = arith.constant dense<0xFF800000> : vector<8xf32>
    %106 = vector.multi_reduction <maximumf>, %105, %cst_32 [1] : vector<8x8xf32> to vector<8xf32>
    %107 = vector.shape_cast %106 : vector<8xf32> to vector<8x1xf32>
    %108 = vector.broadcast %107 : vector<8x1xf32> to vector<8x8xf32>
    %109 = arith.subf %105, %108 : vector<8x8xf32>
    %110 = math.exp %109 : vector<8x8xf32>
    %cst_33 = arith.constant dense<0.000000e+00> : vector<8xf32>
    %111 = vector.multi_reduction <add>, %110, %cst_33 [1] : vector<8x8xf32> to vector<8xf32>
    %112 = vector.shape_cast %111 : vector<8xf32> to vector<8x1xf32>
    %113 = tpu.reciprocal %112 {approx = true} : vector<8x1xf32> -> vector<8x1xf32>
    %114 = vector.broadcast %113 : vector<8x1xf32> to vector<8x8xf32>
    %115 = arith.mulf %110, %114 : vector<8x8xf32>
    %cst_34 = arith.constant dense<0.000000e+00> : vector<8x8xf32>
    %116 = tpu.matmul %115, %103, %cst_34 {dimension_numbers = #tpu.dot_dimension_numbers<[1], [0], [0], [1], [0, 0, 1, 1], [], []>} : vector<8x8xf32>, vector<8x8xf32>, vector<8x8xf32> -> vector<8x8xf32>
    %117 = tpu.concatenate %68, %84, %100, %116 in 1 : vector<8x8xf32>, vector<8x8xf32>, vector<8x8xf32>, vector<8x8xf32> -> vector<8x32xf32>
    %118 = vector.extract_strided_slice %41 {offsets = [8, 0], sizes = [8, 32], strides = [1, 1]} : vector<16x32xf32> to vector<8x32xf32>
    %119 = vector.extract_strided_slice %45 {offsets = [8, 0], sizes = [8, 32], strides = [1, 1]} : vector<16x32xf32> to vector<8x32xf32>
    %120 = vector.extract_strided_slice %49 {offsets = [8, 0], sizes = [8, 32], strides = [1, 1]} : vector<16x32xf32> to vector<8x32xf32>
    %121 = vector.extract_strided_slice %118 {offsets = [0, 0], sizes = [8, 8], strides = [1, 1]} : vector<8x32xf32> to vector<8x8xf32>
    %122 = vector.extract_strided_slice %119 {offsets = [0, 0], sizes = [8, 8], strides = [1, 1]} : vector<8x32xf32> to vector<8x8xf32>
    %123 = vector.extract_strided_slice %120 {offsets = [0, 0], sizes = [8, 8], strides = [1, 1]} : vector<8x32xf32> to vector<8x8xf32>
    %cst_35 = arith.constant dense<0.000000e+00> : vector<8x8xf32>
    %124 = tpu.matmul %121, %122, %cst_35 {dimension_numbers = #tpu.dot_dimension_numbers<[1], [1], [0], [0], [0, 0, 1, 0], [], []>} : vector<8x8xf32>, vector<8x8xf32>, vector<8x8xf32> -> vector<8x8xf32>
    %125 = arith.addf %124, %29 : vector<8x8xf32>
    %cst_36 = arith.constant dense<0xFF800000> : vector<8xf32>
    %126 = vector.multi_reduction <maximumf>, %125, %cst_36 [1] : vector<8x8xf32> to vector<8xf32>
    %127 = vector.shape_cast %126 : vector<8xf32> to vector<8x1xf32>
    %128 = vector.broadcast %127 : vector<8x1xf32> to vector<8x8xf32>
    %129 = arith.subf %125, %128 : vector<8x8xf32>
    %130 = math.exp %129 : vector<8x8xf32>
    %cst_37 = arith.constant dense<0.000000e+00> : vector<8xf32>
    %131 = vector.multi_reduction <add>, %130, %cst_37 [1] : vector<8x8xf32> to vector<8xf32>
    %132 = vector.shape_cast %131 : vector<8xf32> to vector<8x1xf32>
    %133 = tpu.reciprocal %132 {approx = true} : vector<8x1xf32> -> vector<8x1xf32>
    %134 = vector.broadcast %133 : vector<8x1xf32> to vector<8x8xf32>
    %135 = arith.mulf %130, %134 : vector<8x8xf32>
    %cst_38 = arith.constant dense<0.000000e+00> : vector<8x8xf32>
    %136 = tpu.matmul %135, %123, %cst_38 {dimension_numbers = #tpu.dot_dimension_numbers<[1], [0], [0], [1], [0, 0, 1, 1], [], []>} : vector<8x8xf32>, vector<8x8xf32>, vector<8x8xf32> -> vector<8x8xf32>
    %137 = vector.extract_strided_slice %118 {offsets = [0, 8], sizes = [8, 8], strides = [1, 1]} : vector<8x32xf32> to vector<8x8xf32>
    %138 = vector.extract_strided_slice %119 {offsets = [0, 8], sizes = [8, 8], strides = [1, 1]} : vector<8x32xf32> to vector<8x8xf32>
    %139 = vector.extract_strided_slice %120 {offsets = [0, 8], sizes = [8, 8], strides = [1, 1]} : vector<8x32xf32> to vector<8x8xf32>
    %cst_39 = arith.constant dense<0.000000e+00> : vector<8x8xf32>
    %140 = tpu.matmul %137, %138, %cst_39 {dimension_numbers = #tpu.dot_dimension_numbers<[1], [1], [0], [0], [0, 0, 1, 0], [], []>} : vector<8x8xf32>, vector<8x8xf32>, vector<8x8xf32> -> vector<8x8xf32>
    %141 = arith.addf %140, %29 : vector<8x8xf32>
    %cst_40 = arith.constant dense<0xFF800000> : vector<8xf32>
    %142 = vector.multi_reduction <maximumf>, %141, %cst_40 [1] : vector<8x8xf32> to vector<8xf32>
    %143 = vector.shape_cast %142 : vector<8xf32> to vector<8x1xf32>
    %144 = vector.broadcast %143 : vector<8x1xf32> to vector<8x8xf32>
    %145 = arith.subf %141, %144 : vector<8x8xf32>
    %146 = math.exp %145 : vector<8x8xf32>
    %cst_41 = arith.constant dense<0.000000e+00> : vector<8xf32>
    %147 = vector.multi_reduction <add>, %146, %cst_41 [1] : vector<8x8xf32> to vector<8xf32>
    %148 = vector.shape_cast %147 : vector<8xf32> to vector<8x1xf32>
    %149 = tpu.reciprocal %148 {approx = true} : vector<8x1xf32> -> vector<8x1xf32>
    %150 = vector.broadcast %149 : vector<8x1xf32> to vector<8x8xf32>
    %151 = arith.mulf %146, %150 : vector<8x8xf32>
    %cst_42 = arith.constant dense<0.000000e+00> : vector<8x8xf32>
    %152 = tpu.matmul %151, %139, %cst_42 {dimension_numbers = #tpu.dot_dimension_numbers<[1], [0], [0], [1], [0, 0, 1, 1], [], []>} : vector<8x8xf32>, vector<8x8xf32>, vector<8x8xf32> -> vector<8x8xf32>
    %153 = vector.extract_strided_slice %118 {offsets = [0, 16], sizes = [8, 8], strides = [1, 1]} : vector<8x32xf32> to vector<8x8xf32>
    %154 = vector.extract_strided_slice %119 {offsets = [0, 16], sizes = [8, 8], strides = [1, 1]} : vector<8x32xf32> to vector<8x8xf32>
    %155 = vector.extract_strided_slice %120 {offsets = [0, 16], sizes = [8, 8], strides = [1, 1]} : vector<8x32xf32> to vector<8x8xf32>
    %cst_43 = arith.constant dense<0.000000e+00> : vector<8x8xf32>
    %156 = tpu.matmul %153, %154, %cst_43 {dimension_numbers = #tpu.dot_dimension_numbers<[1], [1], [0], [0], [0, 0, 1, 0], [], []>} : vector<8x8xf32>, vector<8x8xf32>, vector<8x8xf32> -> vector<8x8xf32>
    %157 = arith.addf %156, %29 : vector<8x8xf32>
    %cst_44 = arith.constant dense<0xFF800000> : vector<8xf32>
    %158 = vector.multi_reduction <maximumf>, %157, %cst_44 [1] : vector<8x8xf32> to vector<8xf32>
    %159 = vector.shape_cast %158 : vector<8xf32> to vector<8x1xf32>
    %160 = vector.broadcast %159 : vector<8x1xf32> to vector<8x8xf32>
    %161 = arith.subf %157, %160 : vector<8x8xf32>
    %162 = math.exp %161 : vector<8x8xf32>
    %cst_45 = arith.constant dense<0.000000e+00> : vector<8xf32>
    %163 = vector.multi_reduction <add>, %162, %cst_45 [1] : vector<8x8xf32> to vector<8xf32>
    %164 = vector.shape_cast %163 : vector<8xf32> to vector<8x1xf32>
    %165 = tpu.reciprocal %164 {approx = true} : vector<8x1xf32> -> vector<8x1xf32>
    %166 = vector.broadcast %165 : vector<8x1xf32> to vector<8x8xf32>
    %167 = arith.mulf %162, %166 : vector<8x8xf32>
    %cst_46 = arith.constant dense<0.000000e+00> : vector<8x8xf32>
    %168 = tpu.matmul %167, %155, %cst_46 {dimension_numbers = #tpu.dot_dimension_numbers<[1], [0], [0], [1], [0, 0, 1, 1], [], []>} : vector<8x8xf32>, vector<8x8xf32>, vector<8x8xf32> -> vector<8x8xf32>
    %169 = vector.extract_strided_slice %118 {offsets = [0, 24], sizes = [8, 8], strides = [1, 1]} : vector<8x32xf32> to vector<8x8xf32>
    %170 = vector.extract_strided_slice %119 {offsets = [0, 24], sizes = [8, 8], strides = [1, 1]} : vector<8x32xf32> to vector<8x8xf32>
    %171 = vector.extract_strided_slice %120 {offsets = [0, 24], sizes = [8, 8], strides = [1, 1]} : vector<8x32xf32> to vector<8x8xf32>
    %cst_47 = arith.constant dense<0.000000e+00> : vector<8x8xf32>
    %172 = tpu.matmul %169, %170, %cst_47 {dimension_numbers = #tpu.dot_dimension_numbers<[1], [1], [0], [0], [0, 0, 1, 0], [], []>} : vector<8x8xf32>, vector<8x8xf32>, vector<8x8xf32> -> vector<8x8xf32>
    %173 = arith.addf %172, %29 : vector<8x8xf32>
    %cst_48 = arith.constant dense<0xFF800000> : vector<8xf32>
    %174 = vector.multi_reduction <maximumf>, %173, %cst_48 [1] : vector<8x8xf32> to vector<8xf32>
    %175 = vector.shape_cast %174 : vector<8xf32> to vector<8x1xf32>
    %176 = vector.broadcast %175 : vector<8x1xf32> to vector<8x8xf32>
    %177 = arith.subf %173, %176 : vector<8x8xf32>
    %178 = math.exp %177 : vector<8x8xf32>
    %cst_49 = arith.constant dense<0.000000e+00> : vector<8xf32>
    %179 = vector.multi_reduction <add>, %178, %cst_49 [1] : vector<8x8xf32> to vector<8xf32>
    %180 = vector.shape_cast %179 : vector<8xf32> to vector<8x1xf32>
    %181 = tpu.reciprocal %180 {approx = true} : vector<8x1xf32> -> vector<8x1xf32>
    %182 = vector.broadcast %181 : vector<8x1xf32> to vector<8x8xf32>
    %183 = arith.mulf %178, %182 : vector<8x8xf32>
    %cst_50 = arith.constant dense<0.000000e+00> : vector<8x8xf32>
    %184 = tpu.matmul %183, %171, %cst_50 {dimension_numbers = #tpu.dot_dimension_numbers<[1], [0], [0], [1], [0, 0, 1, 1], [], []>} : vector<8x8xf32>, vector<8x8xf32>, vector<8x8xf32> -> vector<8x8xf32>
    %185 = tpu.concatenate %136, %152, %168, %184 in 1 : vector<8x8xf32>, vector<8x8xf32>, vector<8x8xf32>, vector<8x8xf32> -> vector<8x32xf32>
    %186 = tpu.concatenate %117, %185 in 0 : vector<8x32xf32>, vector<8x32xf32> -> vector<16x32xf32>
    %187 = arith.truncf %186 : vector<16x32xf32> to vector<16x32xbf16>
    %c0_51 = arith.constant 0 : index
    %c0_52 = arith.constant 0 : index
    %c0_53 = arith.constant 0 : index
    %188 = vector.load %arg7[%c0_51, %c0_52, %c0_53] : memref<2x32x32xbf16, #tpu.memory_space<vmem>>, vector<1x32x32xbf16>
    %189 = vector.shape_cast %188 : vector<1x32x32xbf16> to vector<32x32xbf16>
    %cst_54 = arith.constant dense<0.000000e+00> : vector<16x32xf32>
    %190 = tpu.matmul %187, %189, %cst_54 {dimension_numbers = #tpu.dot_dimension_numbers<[1], [0], [0], [1], [0, 0, 1, 1], [], []>} : vector<16x32xbf16>, vector<32x32xbf16>, vector<16x32xf32> -> vector<16x32xf32>
    %191 = vector.extract_strided_slice %31 {offsets = [1, 0], sizes = [1, 32], strides = [1, 1]} : vector<8x128xf32> to vector<1x32xf32>
    %192 = vector.broadcast %191 : vector<1x32xf32> to vector<16x32xf32>
    %193 = arith.addf %190, %192 : vector<16x32xf32>
    %194 = arith.addf %193, %22 : vector<16x32xf32>
    %195 = vector.extract_strided_slice %31 {offsets = [2, 0], sizes = [1, 32], strides = [1, 1]} : vector<8x128xf32> to vector<1x32xf32>
    %196 = vector.extract_strided_slice %31 {offsets = [3, 0], sizes = [1, 32], strides = [1, 1]} : vector<8x128xf32> to vector<1x32xf32>
    %cst_55 = arith.constant dense<0.000000e+00> : vector<16xf32>
    %197 = vector.multi_reduction <add>, %194, %cst_55 [1] : vector<16x32xf32> to vector<16xf32>
    %198 = vector.shape_cast %197 : vector<16xf32> to vector<16x1xf32>
    %cst_56 = arith.constant 3.200000e+01 : f32
    %199 = vector.broadcast %cst_56 : f32 to vector<16x1xf32>
    %200 = arith.divf %198, %199 : vector<16x1xf32>
    %201 = vector.broadcast %200 : vector<16x1xf32> to vector<16x32xf32>
    %202 = arith.subf %194, %201 : vector<16x32xf32>
    %203 = arith.mulf %202, %202 : vector<16x32xf32>
    %cst_57 = arith.constant dense<0.000000e+00> : vector<16xf32>
    %204 = vector.multi_reduction <add>, %203, %cst_57 [1] : vector<16x32xf32> to vector<16xf32>
    %205 = vector.shape_cast %204 : vector<16xf32> to vector<16x1xf32>
    %cst_58 = arith.constant 3.200000e+01 : f32
    %206 = vector.broadcast %cst_58 : f32 to vector<16x1xf32>
    %207 = arith.divf %205, %206 : vector<16x1xf32>
    %cst_59 = arith.constant 9.99999996E-13 : f32
    %208 = vector.broadcast %cst_59 : f32 to vector<16x1xf32>
    %209 = arith.addf %207, %208 : vector<16x1xf32>
    %210 = math.rsqrt %209 : vector<16x1xf32>
    %211 = vector.broadcast %210 : vector<16x1xf32> to vector<16x32xf32>
    %212 = arith.mulf %202, %211 : vector<16x32xf32>
    %213 = vector.broadcast %195 : vector<1x32xf32> to vector<16x32xf32>
    %214 = arith.mulf %212, %213 : vector<16x32xf32>
    %215 = vector.broadcast %196 : vector<1x32xf32> to vector<16x32xf32>
    %216 = arith.addf %214, %215 : vector<16x32xf32>
    %217 = arith.truncf %216 : vector<16x32xf32> to vector<16x32xbf16>
    %c0_60 = arith.constant 0 : index
    %c0_61 = arith.constant 0 : index
    %c0_62 = arith.constant 0 : index
    %218 = vector.load %arg8[%c0_60, %c0_61, %c0_62] : memref<2x32x64xbf16, #tpu.memory_space<vmem>>, vector<1x32x64xbf16>
    %219 = vector.shape_cast %218 : vector<1x32x64xbf16> to vector<32x64xbf16>
    %cst_63 = arith.constant dense<0.000000e+00> : vector<16x64xf32>
    %220 = tpu.matmul %217, %219, %cst_63 {dimension_numbers = #tpu.dot_dimension_numbers<[1], [0], [0], [1], [0, 0, 1, 1], [], []>} : vector<16x32xbf16>, vector<32x64xbf16>, vector<16x64xf32> -> vector<16x64xf32>
    %221 = vector.extract_strided_slice %31 {offsets = [4, 0], sizes = [1, 64], strides = [1, 1]} : vector<8x128xf32> to vector<1x64xf32>
    %222 = vector.broadcast %221 : vector<1x64xf32> to vector<16x64xf32>
    %223 = arith.addf %220, %222 : vector<16x64xf32>
    %cst_64 = arith.constant 5.000000e-01 : f32
    %224 = vector.broadcast %cst_64 : f32 to vector<16x64xf32>
    %225 = arith.mulf %224, %223 : vector<16x64xf32>
    %cst_65 = arith.constant 4.471500e-02 : f32
    %226 = vector.broadcast %cst_65 : f32 to vector<16x64xf32>
    %227 = arith.mulf %226, %223 : vector<16x64xf32>
    %228 = arith.mulf %227, %223 : vector<16x64xf32>
    %229 = arith.mulf %228, %223 : vector<16x64xf32>
    %230 = arith.addf %223, %229 : vector<16x64xf32>
    %cst_66 = arith.constant 0.797884583 : f32
    %231 = vector.broadcast %cst_66 : f32 to vector<16x64xf32>
    %232 = arith.mulf %231, %230 : vector<16x64xf32>
    %233 = math.tanh %232 : vector<16x64xf32>
    %cst_67 = arith.constant 1.000000e+00 : f32
    %234 = vector.broadcast %cst_67 : f32 to vector<16x64xf32>
    %235 = arith.addf %234, %233 : vector<16x64xf32>
    %236 = arith.mulf %225, %235 : vector<16x64xf32>
    %237 = arith.truncf %236 : vector<16x64xf32> to vector<16x64xbf16>
    %c0_68 = arith.constant 0 : index
    %c0_69 = arith.constant 0 : index
    %c0_70 = arith.constant 0 : index
    %238 = vector.load %arg9[%c0_68, %c0_69, %c0_70] : memref<2x64x32xbf16, #tpu.memory_space<vmem>>, vector<1x64x32xbf16>
    %239 = vector.shape_cast %238 : vector<1x64x32xbf16> to vector<64x32xbf16>
    %cst_71 = arith.constant dense<0.000000e+00> : vector<16x32xf32>
    %240 = tpu.matmul %237, %239, %cst_71 {dimension_numbers = #tpu.dot_dimension_numbers<[1], [0], [0], [1], [0, 0, 1, 1], [], []>} : vector<16x64xbf16>, vector<64x32xbf16>, vector<16x32xf32> -> vector<16x32xf32>
    %241 = vector.extract_strided_slice %31 {offsets = [5, 0], sizes = [1, 32], strides = [1, 1]} : vector<8x128xf32> to vector<1x32xf32>
    %242 = vector.broadcast %241 : vector<1x32xf32> to vector<16x32xf32>
    %243 = arith.addf %240, %242 : vector<16x32xf32>
    %244 = arith.addf %243, %216 : vector<16x32xf32>
    %245 = vector.extract_strided_slice %31 {offsets = [6, 0], sizes = [1, 32], strides = [1, 1]} : vector<8x128xf32> to vector<1x32xf32>
    %246 = vector.extract_strided_slice %31 {offsets = [7, 0], sizes = [1, 32], strides = [1, 1]} : vector<8x128xf32> to vector<1x32xf32>
    %cst_72 = arith.constant dense<0.000000e+00> : vector<16xf32>
    %247 = vector.multi_reduction <add>, %244, %cst_72 [1] : vector<16x32xf32> to vector<16xf32>
    %248 = vector.shape_cast %247 : vector<16xf32> to vector<16x1xf32>
    %cst_73 = arith.constant 3.200000e+01 : f32
    %249 = vector.broadcast %cst_73 : f32 to vector<16x1xf32>
    %250 = arith.divf %248, %249 : vector<16x1xf32>
    %251 = vector.broadcast %250 : vector<16x1xf32> to vector<16x32xf32>
    %252 = arith.subf %244, %251 : vector<16x32xf32>
    %253 = arith.mulf %252, %252 : vector<16x32xf32>
    %cst_74 = arith.constant dense<0.000000e+00> : vector<16xf32>
    %254 = vector.multi_reduction <add>, %253, %cst_74 [1] : vector<16x32xf32> to vector<16xf32>
    %255 = vector.shape_cast %254 : vector<16xf32> to vector<16x1xf32>
    %cst_75 = arith.constant 3.200000e+01 : f32
    %256 = vector.broadcast %cst_75 : f32 to vector<16x1xf32>
    %257 = arith.divf %255, %256 : vector<16x1xf32>
    %cst_76 = arith.constant 9.99999996E-13 : f32
    %258 = vector.broadcast %cst_76 : f32 to vector<16x1xf32>
    %259 = arith.addf %257, %258 : vector<16x1xf32>
    %260 = math.rsqrt %259 : vector<16x1xf32>
    %261 = vector.broadcast %260 : vector<16x1xf32> to vector<16x32xf32>
    %262 = arith.mulf %252, %261 : vector<16x32xf32>
    %263 = vector.broadcast %245 : vector<1x32xf32> to vector<16x32xf32>
    %264 = arith.mulf %262, %263 : vector<16x32xf32>
    %265 = vector.broadcast %246 : vector<1x32xf32> to vector<16x32xf32>
    %266 = arith.addf %264, %265 : vector<16x32xf32>
    %c1 = arith.constant 1 : index
    %c0_77 = arith.constant 0 : index
    %c0_78 = arith.constant 0 : index
    %267 = vector.load %arg10[%c1, %c0_77, %c0_78] : memref<2x8x128xf32, #tpu.memory_space<vmem>>, vector<1x8x128xf32>
    %268 = vector.shape_cast %267 : vector<1x8x128xf32> to vector<8x128xf32>
    %269 = arith.truncf %266 : vector<16x32xf32> to vector<16x32xbf16>
    %c1_79 = arith.constant 1 : index
    %c0_80 = arith.constant 0 : index
    %c0_81 = arith.constant 0 : index
    %270 = vector.load %arg6[%c1_79, %c0_80, %c0_81] : memref<2x32x96xbf16, #tpu.memory_space<vmem>>, vector<1x32x96xbf16>
    %271 = vector.shape_cast %270 : vector<1x32x96xbf16> to vector<32x96xbf16>
    %cst_82 = arith.constant dense<0.000000e+00> : vector<16x96xf32>
    %272 = tpu.matmul %269, %271, %cst_82 {dimension_numbers = #tpu.dot_dimension_numbers<[1], [0], [0], [1], [0, 0, 1, 1], [], []>} : vector<16x32xbf16>, vector<32x96xbf16>, vector<16x96xf32> -> vector<16x96xf32>
    %273 = vector.extract_strided_slice %272 {offsets = [0, 0], sizes = [16, 32], strides = [1, 1]} : vector<16x96xf32> to vector<16x32xf32>
    %274 = vector.extract_strided_slice %268 {offsets = [0, 0], sizes = [1, 32], strides = [1, 1]} : vector<8x128xf32> to vector<1x32xf32>
    %275 = vector.broadcast %274 : vector<1x32xf32> to vector<16x32xf32>
    %276 = arith.addf %273, %275 : vector<16x32xf32>
    %cst_83 = arith.constant 0.353553385 : f32
    %277 = vector.broadcast %cst_83 : f32 to vector<16x32xf32>
    %278 = arith.mulf %276, %277 : vector<16x32xf32>
    %279 = vector.extract_strided_slice %272 {offsets = [0, 32], sizes = [16, 32], strides = [1, 1]} : vector<16x96xf32> to vector<16x32xf32>
    %280 = vector.extract_strided_slice %268 {offsets = [0, 32], sizes = [1, 32], strides = [1, 1]} : vector<8x128xf32> to vector<1x32xf32>
    %281 = vector.broadcast %280 : vector<1x32xf32> to vector<16x32xf32>
    %282 = arith.addf %279, %281 : vector<16x32xf32>
    %283 = vector.extract_strided_slice %272 {offsets = [0, 64], sizes = [16, 32], strides = [1, 1]} : vector<16x96xf32> to vector<16x32xf32>
    %284 = vector.extract_strided_slice %268 {offsets = [0, 64], sizes = [1, 32], strides = [1, 1]} : vector<8x128xf32> to vector<1x32xf32>
    %285 = vector.broadcast %284 : vector<1x32xf32> to vector<16x32xf32>
    %286 = arith.addf %283, %285 : vector<16x32xf32>
    %287 = vector.extract_strided_slice %278 {offsets = [0, 0], sizes = [8, 32], strides = [1, 1]} : vector<16x32xf32> to vector<8x32xf32>
    %288 = vector.extract_strided_slice %282 {offsets = [0, 0], sizes = [8, 32], strides = [1, 1]} : vector<16x32xf32> to vector<8x32xf32>
    %289 = vector.extract_strided_slice %286 {offsets = [0, 0], sizes = [8, 32], strides = [1, 1]} : vector<16x32xf32> to vector<8x32xf32>
    %290 = vector.extract_strided_slice %287 {offsets = [0, 0], sizes = [8, 8], strides = [1, 1]} : vector<8x32xf32> to vector<8x8xf32>
    %291 = vector.extract_strided_slice %288 {offsets = [0, 0], sizes = [8, 8], strides = [1, 1]} : vector<8x32xf32> to vector<8x8xf32>
    %292 = vector.extract_strided_slice %289 {offsets = [0, 0], sizes = [8, 8], strides = [1, 1]} : vector<8x32xf32> to vector<8x8xf32>
    %cst_84 = arith.constant dense<0.000000e+00> : vector<8x8xf32>
    %293 = tpu.matmul %290, %291, %cst_84 {dimension_numbers = #tpu.dot_dimension_numbers<[1], [1], [0], [0], [0, 0, 1, 0], [], []>} : vector<8x8xf32>, vector<8x8xf32>, vector<8x8xf32> -> vector<8x8xf32>
    %294 = arith.addf %293, %26 : vector<8x8xf32>
    %cst_85 = arith.constant dense<0xFF800000> : vector<8xf32>
    %295 = vector.multi_reduction <maximumf>, %294, %cst_85 [1] : vector<8x8xf32> to vector<8xf32>
    %296 = vector.shape_cast %295 : vector<8xf32> to vector<8x1xf32>
    %297 = vector.broadcast %296 : vector<8x1xf32> to vector<8x8xf32>
    %298 = arith.subf %294, %297 : vector<8x8xf32>
    %299 = math.exp %298 : vector<8x8xf32>
    %cst_86 = arith.constant dense<0.000000e+00> : vector<8xf32>
    %300 = vector.multi_reduction <add>, %299, %cst_86 [1] : vector<8x8xf32> to vector<8xf32>
    %301 = vector.shape_cast %300 : vector<8xf32> to vector<8x1xf32>
    %302 = tpu.reciprocal %301 {approx = true} : vector<8x1xf32> -> vector<8x1xf32>
    %303 = vector.broadcast %302 : vector<8x1xf32> to vector<8x8xf32>
    %304 = arith.mulf %299, %303 : vector<8x8xf32>
    %cst_87 = arith.constant dense<0.000000e+00> : vector<8x8xf32>
    %305 = tpu.matmul %304, %292, %cst_87 {dimension_numbers = #tpu.dot_dimension_numbers<[1], [0], [0], [1], [0, 0, 1, 1], [], []>} : vector<8x8xf32>, vector<8x8xf32>, vector<8x8xf32> -> vector<8x8xf32>
    %306 = vector.extract_strided_slice %287 {offsets = [0, 8], sizes = [8, 8], strides = [1, 1]} : vector<8x32xf32> to vector<8x8xf32>
    %307 = vector.extract_strided_slice %288 {offsets = [0, 8], sizes = [8, 8], strides = [1, 1]} : vector<8x32xf32> to vector<8x8xf32>
    %308 = vector.extract_strided_slice %289 {offsets = [0, 8], sizes = [8, 8], strides = [1, 1]} : vector<8x32xf32> to vector<8x8xf32>
    %cst_88 = arith.constant dense<0.000000e+00> : vector<8x8xf32>
    %309 = tpu.matmul %306, %307, %cst_88 {dimension_numbers = #tpu.dot_dimension_numbers<[1], [1], [0], [0], [0, 0, 1, 0], [], []>} : vector<8x8xf32>, vector<8x8xf32>, vector<8x8xf32> -> vector<8x8xf32>
    %310 = arith.addf %309, %26 : vector<8x8xf32>
    %cst_89 = arith.constant dense<0xFF800000> : vector<8xf32>
    %311 = vector.multi_reduction <maximumf>, %310, %cst_89 [1] : vector<8x8xf32> to vector<8xf32>
    %312 = vector.shape_cast %311 : vector<8xf32> to vector<8x1xf32>
    %313 = vector.broadcast %312 : vector<8x1xf32> to vector<8x8xf32>
    %314 = arith.subf %310, %313 : vector<8x8xf32>
    %315 = math.exp %314 : vector<8x8xf32>
    %cst_90 = arith.constant dense<0.000000e+00> : vector<8xf32>
    %316 = vector.multi_reduction <add>, %315, %cst_90 [1] : vector<8x8xf32> to vector<8xf32>
    %317 = vector.shape_cast %316 : vector<8xf32> to vector<8x1xf32>
    %318 = tpu.reciprocal %317 {approx = true} : vector<8x1xf32> -> vector<8x1xf32>
    %319 = vector.broadcast %318 : vector<8x1xf32> to vector<8x8xf32>
    %320 = arith.mulf %315, %319 : vector<8x8xf32>
    %cst_91 = arith.constant dense<0.000000e+00> : vector<8x8xf32>
    %321 = tpu.matmul %320, %308, %cst_91 {dimension_numbers = #tpu.dot_dimension_numbers<[1], [0], [0], [1], [0, 0, 1, 1], [], []>} : vector<8x8xf32>, vector<8x8xf32>, vector<8x8xf32> -> vector<8x8xf32>
    %322 = vector.extract_strided_slice %287 {offsets = [0, 16], sizes = [8, 8], strides = [1, 1]} : vector<8x32xf32> to vector<8x8xf32>
    %323 = vector.extract_strided_slice %288 {offsets = [0, 16], sizes = [8, 8], strides = [1, 1]} : vector<8x32xf32> to vector<8x8xf32>
    %324 = vector.extract_strided_slice %289 {offsets = [0, 16], sizes = [8, 8], strides = [1, 1]} : vector<8x32xf32> to vector<8x8xf32>
    %cst_92 = arith.constant dense<0.000000e+00> : vector<8x8xf32>
    %325 = tpu.matmul %322, %323, %cst_92 {dimension_numbers = #tpu.dot_dimension_numbers<[1], [1], [0], [0], [0, 0, 1, 0], [], []>} : vector<8x8xf32>, vector<8x8xf32>, vector<8x8xf32> -> vector<8x8xf32>
    %326 = arith.addf %325, %26 : vector<8x8xf32>
    %cst_93 = arith.constant dense<0xFF800000> : vector<8xf32>
    %327 = vector.multi_reduction <maximumf>, %326, %cst_93 [1] : vector<8x8xf32> to vector<8xf32>
    %328 = vector.shape_cast %327 : vector<8xf32> to vector<8x1xf32>
    %329 = vector.broadcast %328 : vector<8x1xf32> to vector<8x8xf32>
    %330 = arith.subf %326, %329 : vector<8x8xf32>
    %331 = math.exp %330 : vector<8x8xf32>
    %cst_94 = arith.constant dense<0.000000e+00> : vector<8xf32>
    %332 = vector.multi_reduction <add>, %331, %cst_94 [1] : vector<8x8xf32> to vector<8xf32>
    %333 = vector.shape_cast %332 : vector<8xf32> to vector<8x1xf32>
    %334 = tpu.reciprocal %333 {approx = true} : vector<8x1xf32> -> vector<8x1xf32>
    %335 = vector.broadcast %334 : vector<8x1xf32> to vector<8x8xf32>
    %336 = arith.mulf %331, %335 : vector<8x8xf32>
    %cst_95 = arith.constant dense<0.000000e+00> : vector<8x8xf32>
    %337 = tpu.matmul %336, %324, %cst_95 {dimension_numbers = #tpu.dot_dimension_numbers<[1], [0], [0], [1], [0, 0, 1, 1], [], []>} : vector<8x8xf32>, vector<8x8xf32>, vector<8x8xf32> -> vector<8x8xf32>
    %338 = vector.extract_strided_slice %287 {offsets = [0, 24], sizes = [8, 8], strides = [1, 1]} : vector<8x32xf32> to vector<8x8xf32>
    %339 = vector.extract_strided_slice %288 {offsets = [0, 24], sizes = [8, 8], strides = [1, 1]} : vector<8x32xf32> to vector<8x8xf32>
    %340 = vector.extract_strided_slice %289 {offsets = [0, 24], sizes = [8, 8], strides = [1, 1]} : vector<8x32xf32> to vector<8x8xf32>
    %cst_96 = arith.constant dense<0.000000e+00> : vector<8x8xf32>
    %341 = tpu.matmul %338, %339, %cst_96 {dimension_numbers = #tpu.dot_dimension_numbers<[1], [1], [0], [0], [0, 0, 1, 0], [], []>} : vector<8x8xf32>, vector<8x8xf32>, vector<8x8xf32> -> vector<8x8xf32>
    %342 = arith.addf %341, %26 : vector<8x8xf32>
    %cst_97 = arith.constant dense<0xFF800000> : vector<8xf32>
    %343 = vector.multi_reduction <maximumf>, %342, %cst_97 [1] : vector<8x8xf32> to vector<8xf32>
    %344 = vector.shape_cast %343 : vector<8xf32> to vector<8x1xf32>
    %345 = vector.broadcast %344 : vector<8x1xf32> to vector<8x8xf32>
    %346 = arith.subf %342, %345 : vector<8x8xf32>
    %347 = math.exp %346 : vector<8x8xf32>
    %cst_98 = arith.constant dense<0.000000e+00> : vector<8xf32>
    %348 = vector.multi_reduction <add>, %347, %cst_98 [1] : vector<8x8xf32> to vector<8xf32>
    %349 = vector.shape_cast %348 : vector<8xf32> to vector<8x1xf32>
    %350 = tpu.reciprocal %349 {approx = true} : vector<8x1xf32> -> vector<8x1xf32>
    %351 = vector.broadcast %350 : vector<8x1xf32> to vector<8x8xf32>
    %352 = arith.mulf %347, %351 : vector<8x8xf32>
    %cst_99 = arith.constant dense<0.000000e+00> : vector<8x8xf32>
    %353 = tpu.matmul %352, %340, %cst_99 {dimension_numbers = #tpu.dot_dimension_numbers<[1], [0], [0], [1], [0, 0, 1, 1], [], []>} : vector<8x8xf32>, vector<8x8xf32>, vector<8x8xf32> -> vector<8x8xf32>
    %354 = tpu.concatenate %305, %321, %337, %353 in 1 : vector<8x8xf32>, vector<8x8xf32>, vector<8x8xf32>, vector<8x8xf32> -> vector<8x32xf32>
    %355 = vector.extract_strided_slice %278 {offsets = [8, 0], sizes = [8, 32], strides = [1, 1]} : vector<16x32xf32> to vector<8x32xf32>
    %356 = vector.extract_strided_slice %282 {offsets = [8, 0], sizes = [8, 32], strides = [1, 1]} : vector<16x32xf32> to vector<8x32xf32>
    %357 = vector.extract_strided_slice %286 {offsets = [8, 0], sizes = [8, 32], strides = [1, 1]} : vector<16x32xf32> to vector<8x32xf32>
    %358 = vector.extract_strided_slice %355 {offsets = [0, 0], sizes = [8, 8], strides = [1, 1]} : vector<8x32xf32> to vector<8x8xf32>
    %359 = vector.extract_strided_slice %356 {offsets = [0, 0], sizes = [8, 8], strides = [1, 1]} : vector<8x32xf32> to vector<8x8xf32>
    %360 = vector.extract_strided_slice %357 {offsets = [0, 0], sizes = [8, 8], strides = [1, 1]} : vector<8x32xf32> to vector<8x8xf32>
    %cst_100 = arith.constant dense<0.000000e+00> : vector<8x8xf32>
    %361 = tpu.matmul %358, %359, %cst_100 {dimension_numbers = #tpu.dot_dimension_numbers<[1], [1], [0], [0], [0, 0, 1, 0], [], []>} : vector<8x8xf32>, vector<8x8xf32>, vector<8x8xf32> -> vector<8x8xf32>
    %362 = arith.addf %361, %29 : vector<8x8xf32>
    %cst_101 = arith.constant dense<0xFF800000> : vector<8xf32>
    %363 = vector.multi_reduction <maximumf>, %362, %cst_101 [1] : vector<8x8xf32> to vector<8xf32>
    %364 = vector.shape_cast %363 : vector<8xf32> to vector<8x1xf32>
    %365 = vector.broadcast %364 : vector<8x1xf32> to vector<8x8xf32>
    %366 = arith.subf %362, %365 : vector<8x8xf32>
    %367 = math.exp %366 : vector<8x8xf32>
    %cst_102 = arith.constant dense<0.000000e+00> : vector<8xf32>
    %368 = vector.multi_reduction <add>, %367, %cst_102 [1] : vector<8x8xf32> to vector<8xf32>
    %369 = vector.shape_cast %368 : vector<8xf32> to vector<8x1xf32>
    %370 = tpu.reciprocal %369 {approx = true} : vector<8x1xf32> -> vector<8x1xf32>
    %371 = vector.broadcast %370 : vector<8x1xf32> to vector<8x8xf32>
    %372 = arith.mulf %367, %371 : vector<8x8xf32>
    %cst_103 = arith.constant dense<0.000000e+00> : vector<8x8xf32>
    %373 = tpu.matmul %372, %360, %cst_103 {dimension_numbers = #tpu.dot_dimension_numbers<[1], [0], [0], [1], [0, 0, 1, 1], [], []>} : vector<8x8xf32>, vector<8x8xf32>, vector<8x8xf32> -> vector<8x8xf32>
    %374 = vector.extract_strided_slice %355 {offsets = [0, 8], sizes = [8, 8], strides = [1, 1]} : vector<8x32xf32> to vector<8x8xf32>
    %375 = vector.extract_strided_slice %356 {offsets = [0, 8], sizes = [8, 8], strides = [1, 1]} : vector<8x32xf32> to vector<8x8xf32>
    %376 = vector.extract_strided_slice %357 {offsets = [0, 8], sizes = [8, 8], strides = [1, 1]} : vector<8x32xf32> to vector<8x8xf32>
    %cst_104 = arith.constant dense<0.000000e+00> : vector<8x8xf32>
    %377 = tpu.matmul %374, %375, %cst_104 {dimension_numbers = #tpu.dot_dimension_numbers<[1], [1], [0], [0], [0, 0, 1, 0], [], []>} : vector<8x8xf32>, vector<8x8xf32>, vector<8x8xf32> -> vector<8x8xf32>
    %378 = arith.addf %377, %29 : vector<8x8xf32>
    %cst_105 = arith.constant dense<0xFF800000> : vector<8xf32>
    %379 = vector.multi_reduction <maximumf>, %378, %cst_105 [1] : vector<8x8xf32> to vector<8xf32>
    %380 = vector.shape_cast %379 : vector<8xf32> to vector<8x1xf32>
    %381 = vector.broadcast %380 : vector<8x1xf32> to vector<8x8xf32>
    %382 = arith.subf %378, %381 : vector<8x8xf32>
    %383 = math.exp %382 : vector<8x8xf32>
    %cst_106 = arith.constant dense<0.000000e+00> : vector<8xf32>
    %384 = vector.multi_reduction <add>, %383, %cst_106 [1] : vector<8x8xf32> to vector<8xf32>
    %385 = vector.shape_cast %384 : vector<8xf32> to vector<8x1xf32>
    %386 = tpu.reciprocal %385 {approx = true} : vector<8x1xf32> -> vector<8x1xf32>
    %387 = vector.broadcast %386 : vector<8x1xf32> to vector<8x8xf32>
    %388 = arith.mulf %383, %387 : vector<8x8xf32>
    %cst_107 = arith.constant dense<0.000000e+00> : vector<8x8xf32>
    %389 = tpu.matmul %388, %376, %cst_107 {dimension_numbers = #tpu.dot_dimension_numbers<[1], [0], [0], [1], [0, 0, 1, 1], [], []>} : vector<8x8xf32>, vector<8x8xf32>, vector<8x8xf32> -> vector<8x8xf32>
    %390 = vector.extract_strided_slice %355 {offsets = [0, 16], sizes = [8, 8], strides = [1, 1]} : vector<8x32xf32> to vector<8x8xf32>
    %391 = vector.extract_strided_slice %356 {offsets = [0, 16], sizes = [8, 8], strides = [1, 1]} : vector<8x32xf32> to vector<8x8xf32>
    %392 = vector.extract_strided_slice %357 {offsets = [0, 16], sizes = [8, 8], strides = [1, 1]} : vector<8x32xf32> to vector<8x8xf32>
    %cst_108 = arith.constant dense<0.000000e+00> : vector<8x8xf32>
    %393 = tpu.matmul %390, %391, %cst_108 {dimension_numbers = #tpu.dot_dimension_numbers<[1], [1], [0], [0], [0, 0, 1, 0], [], []>} : vector<8x8xf32>, vector<8x8xf32>, vector<8x8xf32> -> vector<8x8xf32>
    %394 = arith.addf %393, %29 : vector<8x8xf32>
    %cst_109 = arith.constant dense<0xFF800000> : vector<8xf32>
    %395 = vector.multi_reduction <maximumf>, %394, %cst_109 [1] : vector<8x8xf32> to vector<8xf32>
    %396 = vector.shape_cast %395 : vector<8xf32> to vector<8x1xf32>
    %397 = vector.broadcast %396 : vector<8x1xf32> to vector<8x8xf32>
    %398 = arith.subf %394, %397 : vector<8x8xf32>
    %399 = math.exp %398 : vector<8x8xf32>
    %cst_110 = arith.constant dense<0.000000e+00> : vector<8xf32>
    %400 = vector.multi_reduction <add>, %399, %cst_110 [1] : vector<8x8xf32> to vector<8xf32>
    %401 = vector.shape_cast %400 : vector<8xf32> to vector<8x1xf32>
    %402 = tpu.reciprocal %401 {approx = true} : vector<8x1xf32> -> vector<8x1xf32>
    %403 = vector.broadcast %402 : vector<8x1xf32> to vector<8x8xf32>
    %404 = arith.mulf %399, %403 : vector<8x8xf32>
    %cst_111 = arith.constant dense<0.000000e+00> : vector<8x8xf32>
    %405 = tpu.matmul %404, %392, %cst_111 {dimension_numbers = #tpu.dot_dimension_numbers<[1], [0], [0], [1], [0, 0, 1, 1], [], []>} : vector<8x8xf32>, vector<8x8xf32>, vector<8x8xf32> -> vector<8x8xf32>
    %406 = vector.extract_strided_slice %355 {offsets = [0, 24], sizes = [8, 8], strides = [1, 1]} : vector<8x32xf32> to vector<8x8xf32>
    %407 = vector.extract_strided_slice %356 {offsets = [0, 24], sizes = [8, 8], strides = [1, 1]} : vector<8x32xf32> to vector<8x8xf32>
    %408 = vector.extract_strided_slice %357 {offsets = [0, 24], sizes = [8, 8], strides = [1, 1]} : vector<8x32xf32> to vector<8x8xf32>
    %cst_112 = arith.constant dense<0.000000e+00> : vector<8x8xf32>
    %409 = tpu.matmul %406, %407, %cst_112 {dimension_numbers = #tpu.dot_dimension_numbers<[1], [1], [0], [0], [0, 0, 1, 0], [], []>} : vector<8x8xf32>, vector<8x8xf32>, vector<8x8xf32> -> vector<8x8xf32>
    %410 = arith.addf %409, %29 : vector<8x8xf32>
    %cst_113 = arith.constant dense<0xFF800000> : vector<8xf32>
    %411 = vector.multi_reduction <maximumf>, %410, %cst_113 [1] : vector<8x8xf32> to vector<8xf32>
    %412 = vector.shape_cast %411 : vector<8xf32> to vector<8x1xf32>
    %413 = vector.broadcast %412 : vector<8x1xf32> to vector<8x8xf32>
    %414 = arith.subf %410, %413 : vector<8x8xf32>
    %415 = math.exp %414 : vector<8x8xf32>
    %cst_114 = arith.constant dense<0.000000e+00> : vector<8xf32>
    %416 = vector.multi_reduction <add>, %415, %cst_114 [1] : vector<8x8xf32> to vector<8xf32>
    %417 = vector.shape_cast %416 : vector<8xf32> to vector<8x1xf32>
    %418 = tpu.reciprocal %417 {approx = true} : vector<8x1xf32> -> vector<8x1xf32>
    %419 = vector.broadcast %418 : vector<8x1xf32> to vector<8x8xf32>
    %420 = arith.mulf %415, %419 : vector<8x8xf32>
    %cst_115 = arith.constant dense<0.000000e+00> : vector<8x8xf32>
    %421 = tpu.matmul %420, %408, %cst_115 {dimension_numbers = #tpu.dot_dimension_numbers<[1], [0], [0], [1], [0, 0, 1, 1], [], []>} : vector<8x8xf32>, vector<8x8xf32>, vector<8x8xf32> -> vector<8x8xf32>
    %422 = tpu.concatenate %373, %389, %405, %421 in 1 : vector<8x8xf32>, vector<8x8xf32>, vector<8x8xf32>, vector<8x8xf32> -> vector<8x32xf32>
    %423 = tpu.concatenate %354, %422 in 0 : vector<8x32xf32>, vector<8x32xf32> -> vector<16x32xf32>
    %424 = arith.truncf %423 : vector<16x32xf32> to vector<16x32xbf16>
    %c1_116 = arith.constant 1 : index
    %c0_117 = arith.constant 0 : index
    %c0_118 = arith.constant 0 : index
    %425 = vector.load %arg7[%c1_116, %c0_117, %c0_118] : memref<2x32x32xbf16, #tpu.memory_space<vmem>>, vector<1x32x32xbf16>
    %426 = vector.shape_cast %425 : vector<1x32x32xbf16> to vector<32x32xbf16>
    %cst_119 = arith.constant dense<0.000000e+00> : vector<16x32xf32>
    %427 = tpu.matmul %424, %426, %cst_119 {dimension_numbers = #tpu.dot_dimension_numbers<[1], [0], [0], [1], [0, 0, 1, 1], [], []>} : vector<16x32xbf16>, vector<32x32xbf16>, vector<16x32xf32> -> vector<16x32xf32>
    %428 = vector.extract_strided_slice %268 {offsets = [1, 0], sizes = [1, 32], strides = [1, 1]} : vector<8x128xf32> to vector<1x32xf32>
    %429 = vector.broadcast %428 : vector<1x32xf32> to vector<16x32xf32>
    %430 = arith.addf %427, %429 : vector<16x32xf32>
    %431 = arith.addf %430, %266 : vector<16x32xf32>
    %432 = vector.extract_strided_slice %268 {offsets = [2, 0], sizes = [1, 32], strides = [1, 1]} : vector<8x128xf32> to vector<1x32xf32>
    %433 = vector.extract_strided_slice %268 {offsets = [3, 0], sizes = [1, 32], strides = [1, 1]} : vector<8x128xf32> to vector<1x32xf32>
    %cst_120 = arith.constant dense<0.000000e+00> : vector<16xf32>
    %434 = vector.multi_reduction <add>, %431, %cst_120 [1] : vector<16x32xf32> to vector<16xf32>
    %435 = vector.shape_cast %434 : vector<16xf32> to vector<16x1xf32>
    %cst_121 = arith.constant 3.200000e+01 : f32
    %436 = vector.broadcast %cst_121 : f32 to vector<16x1xf32>
    %437 = arith.divf %435, %436 : vector<16x1xf32>
    %438 = vector.broadcast %437 : vector<16x1xf32> to vector<16x32xf32>
    %439 = arith.subf %431, %438 : vector<16x32xf32>
    %440 = arith.mulf %439, %439 : vector<16x32xf32>
    %cst_122 = arith.constant dense<0.000000e+00> : vector<16xf32>
    %441 = vector.multi_reduction <add>, %440, %cst_122 [1] : vector<16x32xf32> to vector<16xf32>
    %442 = vector.shape_cast %441 : vector<16xf32> to vector<16x1xf32>
    %cst_123 = arith.constant 3.200000e+01 : f32
    %443 = vector.broadcast %cst_123 : f32 to vector<16x1xf32>
    %444 = arith.divf %442, %443 : vector<16x1xf32>
    %cst_124 = arith.constant 9.99999996E-13 : f32
    %445 = vector.broadcast %cst_124 : f32 to vector<16x1xf32>
    %446 = arith.addf %444, %445 : vector<16x1xf32>
    %447 = math.rsqrt %446 : vector<16x1xf32>
    %448 = vector.broadcast %447 : vector<16x1xf32> to vector<16x32xf32>
    %449 = arith.mulf %439, %448 : vector<16x32xf32>
    %450 = vector.broadcast %432 : vector<1x32xf32> to vector<16x32xf32>
    %451 = arith.mulf %449, %450 : vector<16x32xf32>
    %452 = vector.broadcast %433 : vector<1x32xf32> to vector<16x32xf32>
    %453 = arith.addf %451, %452 : vector<16x32xf32>
    %454 = arith.truncf %453 : vector<16x32xf32> to vector<16x32xbf16>
    %c1_125 = arith.constant 1 : index
    %c0_126 = arith.constant 0 : index
    %c0_127 = arith.constant 0 : index
    %455 = vector.load %arg8[%c1_125, %c0_126, %c0_127] : memref<2x32x64xbf16, #tpu.memory_space<vmem>>, vector<1x32x64xbf16>
    %456 = vector.shape_cast %455 : vector<1x32x64xbf16> to vector<32x64xbf16>
    %cst_128 = arith.constant dense<0.000000e+00> : vector<16x64xf32>
    %457 = tpu.matmul %454, %456, %cst_128 {dimension_numbers = #tpu.dot_dimension_numbers<[1], [0], [0], [1], [0, 0, 1, 1], [], []>} : vector<16x32xbf16>, vector<32x64xbf16>, vector<16x64xf32> -> vector<16x64xf32>
    %458 = vector.extract_strided_slice %268 {offsets = [4, 0], sizes = [1, 64], strides = [1, 1]} : vector<8x128xf32> to vector<1x64xf32>
    %459 = vector.broadcast %458 : vector<1x64xf32> to vector<16x64xf32>
    %460 = arith.addf %457, %459 : vector<16x64xf32>
    %cst_129 = arith.constant 5.000000e-01 : f32
    %461 = vector.broadcast %cst_129 : f32 to vector<16x64xf32>
    %462 = arith.mulf %461, %460 : vector<16x64xf32>
    %cst_130 = arith.constant 4.471500e-02 : f32
    %463 = vector.broadcast %cst_130 : f32 to vector<16x64xf32>
    %464 = arith.mulf %463, %460 : vector<16x64xf32>
    %465 = arith.mulf %464, %460 : vector<16x64xf32>
    %466 = arith.mulf %465, %460 : vector<16x64xf32>
    %467 = arith.addf %460, %466 : vector<16x64xf32>
    %cst_131 = arith.constant 0.797884583 : f32
    %468 = vector.broadcast %cst_131 : f32 to vector<16x64xf32>
    %469 = arith.mulf %468, %467 : vector<16x64xf32>
    %470 = math.tanh %469 : vector<16x64xf32>
    %cst_132 = arith.constant 1.000000e+00 : f32
    %471 = vector.broadcast %cst_132 : f32 to vector<16x64xf32>
    %472 = arith.addf %471, %470 : vector<16x64xf32>
    %473 = arith.mulf %462, %472 : vector<16x64xf32>
    %474 = arith.truncf %473 : vector<16x64xf32> to vector<16x64xbf16>
    %c1_133 = arith.constant 1 : index
    %c0_134 = arith.constant 0 : index
    %c0_135 = arith.constant 0 : index
    %475 = vector.load %arg9[%c1_133, %c0_134, %c0_135] : memref<2x64x32xbf16, #tpu.memory_space<vmem>>, vector<1x64x32xbf16>
    %476 = vector.shape_cast %475 : vector<1x64x32xbf16> to vector<64x32xbf16>
    %cst_136 = arith.constant dense<0.000000e+00> : vector<16x32xf32>
    %477 = tpu.matmul %474, %476, %cst_136 {dimension_numbers = #tpu.dot_dimension_numbers<[1], [0], [0], [1], [0, 0, 1, 1], [], []>} : vector<16x64xbf16>, vector<64x32xbf16>, vector<16x32xf32> -> vector<16x32xf32>
    %478 = vector.extract_strided_slice %268 {offsets = [5, 0], sizes = [1, 32], strides = [1, 1]} : vector<8x128xf32> to vector<1x32xf32>
    %479 = vector.broadcast %478 : vector<1x32xf32> to vector<16x32xf32>
    %480 = arith.addf %477, %479 : vector<16x32xf32>
    %481 = arith.addf %480, %453 : vector<16x32xf32>
    %482 = vector.extract_strided_slice %268 {offsets = [6, 0], sizes = [1, 32], strides = [1, 1]} : vector<8x128xf32> to vector<1x32xf32>
    %483 = vector.extract_strided_slice %268 {offsets = [7, 0], sizes = [1, 32], strides = [1, 1]} : vector<8x128xf32> to vector<1x32xf32>
    %cst_137 = arith.constant dense<0.000000e+00> : vector<16xf32>
    %484 = vector.multi_reduction <add>, %481, %cst_137 [1] : vector<16x32xf32> to vector<16xf32>
    %485 = vector.shape_cast %484 : vector<16xf32> to vector<16x1xf32>
    %cst_138 = arith.constant 3.200000e+01 : f32
    %486 = vector.broadcast %cst_138 : f32 to vector<16x1xf32>
    %487 = arith.divf %485, %486 : vector<16x1xf32>
    %488 = vector.broadcast %487 : vector<16x1xf32> to vector<16x32xf32>
    %489 = arith.subf %481, %488 : vector<16x32xf32>
    %490 = arith.mulf %489, %489 : vector<16x32xf32>
    %cst_139 = arith.constant dense<0.000000e+00> : vector<16xf32>
    %491 = vector.multi_reduction <add>, %490, %cst_139 [1] : vector<16x32xf32> to vector<16xf32>
    %492 = vector.shape_cast %491 : vector<16xf32> to vector<16x1xf32>
    %cst_140 = arith.constant 3.200000e+01 : f32
    %493 = vector.broadcast %cst_140 : f32 to vector<16x1xf32>
    %494 = arith.divf %492, %493 : vector<16x1xf32>
    %cst_141 = arith.constant 9.99999996E-13 : f32
    %495 = vector.broadcast %cst_141 : f32 to vector<16x1xf32>
    %496 = arith.addf %494, %495 : vector<16x1xf32>
    %497 = math.rsqrt %496 : vector<16x1xf32>
    %498 = vector.broadcast %497 : vector<16x1xf32> to vector<16x32xf32>
    %499 = arith.mulf %489, %498 : vector<16x32xf32>
    %500 = vector.broadcast %482 : vector<1x32xf32> to vector<16x32xf32>
    %501 = arith.mulf %499, %500 : vector<16x32xf32>
    %502 = vector.broadcast %483 : vector<1x32xf32> to vector<16x32xf32>
    %503 = arith.addf %501, %502 : vector<16x32xf32>
    %c0_142 = arith.constant 0 : index
    %c0_143 = arith.constant 0 : index
    %504 = vector.load %arg14[%c0_142, %c0_143] : memref<16x32xf32, #tpu.memory_space<vmem>>, vector<16x32xf32>
    tpu.vector_store %arg14[%c0_142, %c0_143], %503 {strides = array<i32>} : memref<16x32xf32, #tpu.memory_space<vmem>>, vector<16x32xf32>,
    %c0_144 = arith.constant 0 : index
    %c0_145 = arith.constant 0 : index
    %505 = memref.load %arg1[%c0_144, %c0_145] : memref<2x4xi32, #tpu.memory_space<smem>>
    %c0_i32 = arith.constant 0 : i32
    %506 = arith.addi %c0_i32, %505 : i32
    %507 = arith.index_cast %506 : i32 to index
    %c0_146 = arith.constant 0 : index
    %508 = vector.load %arg14[%507, %c0_146] : memref<16x32xf32, #tpu.memory_space<vmem>>, vector<1x32xf32>
    %c0_147 = arith.constant 0 : index
    %c1_148 = arith.constant 1 : index
    %509 = memref.load %arg1[%c0_147, %c1_148] : memref<2x4xi32, #tpu.memory_space<smem>>
    %c0_i32_149 = arith.constant 0 : i32
    %510 = arith.addi %c0_i32_149, %509 : i32
    %511 = arith.index_cast %510 : i32 to index
    %c0_150 = arith.constant 0 : index
    %512 = vector.load %arg14[%511, %c0_150] : memref<16x32xf32, #tpu.memory_space<vmem>>, vector<1x32xf32>
    %c0_151 = arith.constant 0 : index
    %c2 = arith.constant 2 : index
    %513 = memref.load %arg1[%c0_151, %c2] : memref<2x4xi32, #tpu.memory_space<smem>>
    %c0_i32_152 = arith.constant 0 : i32
    %514 = arith.addi %c0_i32_152, %513 : i32
    %515 = arith.index_cast %514 : i32 to index
    %c0_153 = arith.constant 0 : index
    %516 = vector.load %arg14[%515, %c0_153] : memref<16x32xf32, #tpu.memory_space<vmem>>, vector<1x32xf32>
    %c0_154 = arith.constant 0 : index
    %c3 = arith.constant 3 : index
    %517 = memref.load %arg1[%c0_154, %c3] : memref<2x4xi32, #tpu.memory_space<smem>>
    %c0_i32_155 = arith.constant 0 : i32
    %518 = arith.addi %c0_i32_155, %517 : i32
    %519 = arith.index_cast %518 : i32 to index
    %c0_156 = arith.constant 0 : index
    %520 = vector.load %arg14[%519, %c0_156] : memref<16x32xf32, #tpu.memory_space<vmem>>, vector<1x32xf32>
    %521 = tpu.concatenate %508, %512, %516, %520 in 1 : vector<1x32xf32>, vector<1x32xf32>, vector<1x32xf32>, vector<1x32xf32> -> vector<1x128xf32>
    %c1_157 = arith.constant 1 : index
    %c0_158 = arith.constant 0 : index
    %522 = memref.load %arg1[%c1_157, %c0_158] : memref<2x4xi32, #tpu.memory_space<smem>>
    %c8_i32 = arith.constant 8 : i32
    %523 = arith.addi %c8_i32, %522 : i32
    %524 = arith.index_cast %523 : i32 to index
    %c0_159 = arith.constant 0 : index
    %525 = vector.load %arg14[%524, %c0_159] : memref<16x32xf32, #tpu.memory_space<vmem>>, vector<1x32xf32>
    %c1_160 = arith.constant 1 : index
    %c1_161 = arith.constant 1 : index
    %526 = memref.load %arg1[%c1_160, %c1_161] : memref<2x4xi32, #tpu.memory_space<smem>>
    %c8_i32_162 = arith.constant 8 : i32
    %527 = arith.addi %c8_i32_162, %526 : i32
    %528 = arith.index_cast %527 : i32 to index
    %c0_163 = arith.constant 0 : index
    %529 = vector.load %arg14[%528, %c0_163] : memref<16x32xf32, #tpu.memory_space<vmem>>, vector<1x32xf32>
    %c1_164 = arith.constant 1 : index
    %c2_165 = arith.constant 2 : index
    %530 = memref.load %arg1[%c1_164, %c2_165] : memref<2x4xi32, #tpu.memory_space<smem>>
    %c8_i32_166 = arith.constant 8 : i32
    %531 = arith.addi %c8_i32_166, %530 : i32
    %532 = arith.index_cast %531 : i32 to index
    %c0_167 = arith.constant 0 : index
    %533 = vector.load %arg14[%532, %c0_167] : memref<16x32xf32, #tpu.memory_space<vmem>>, vector<1x32xf32>
    %c1_168 = arith.constant 1 : index
    %c3_169 = arith.constant 3 : index
    %534 = memref.load %arg1[%c1_168, %c3_169] : memref<2x4xi32, #tpu.memory_space<smem>>
    %c8_i32_170 = arith.constant 8 : i32
    %535 = arith.addi %c8_i32_170, %534 : i32
    %536 = arith.index_cast %535 : i32 to index
    %c0_171 = arith.constant 0 : index
    %537 = vector.load %arg14[%536, %c0_171] : memref<16x32xf32, #tpu.memory_space<vmem>>, vector<1x32xf32>
    %538 = tpu.concatenate %525, %529, %533, %537 in 1 : vector<1x32xf32>, vector<1x32xf32>, vector<1x32xf32>, vector<1x32xf32> -> vector<1x128xf32>
    %539 = tpu.concatenate %521, %538 in 0 : vector<1x128xf32>, vector<1x128xf32> -> vector<2x128xf32>
    %540 = arith.truncf %539 : vector<2x128xf32> to vector<2x128xbf16>
    %c0_172 = arith.constant 0 : index
    %c0_173 = arith.constant 0 : index
    %541 = vector.load %arg11[%c0_172, %c0_173] : memref<128x5xbf16, #tpu.memory_space<vmem>>, vector<128x5xbf16>
    %cst_174 = arith.constant dense<0.000000e+00> : vector<2x5xf32>
    %542 = tpu.matmul %540, %541, %cst_174 {dimension_numbers = #tpu.dot_dimension_numbers<[1], [0], [0], [1], [0, 0, 1, 1], [], []>} : vector<2x128xbf16>, vector<128x5xbf16>, vector<2x5xf32> -> vector<2x5xf32>
    %c0_175 = arith.constant 0 : index
    %c0_176 = arith.constant 0 : index
    %543 = vector.load %arg12[%c0_175, %c0_176] : memref<1x5xf32, #tpu.memory_space<vmem>>, vector<1x5xf32>
    %544 = vector.broadcast %543 : vector<1x5xf32> to vector<2x5xf32>
    %545 = arith.addf %542, %544 : vector<2x5xf32>
    %c0_177 = arith.constant 0 : index
    %c0_178 = arith.constant 0 : index
    %546 = vector.load %arg13[%c0_177, %c0_178] : memref<2x5xf32, #tpu.memory_space<vmem>>, vector<2x5xf32>
    tpu.vector_store %arg13[%c0_177, %c0_178], %545 {strides = array<i32>} : memref<2x5xf32, #tpu.memory_space<vmem>>, vector<2x5xf32>,
    return
  }
  func.func @transform_0(%arg0: i32, %arg1: memref<2x4xi32, #tpu.memory_space<smem>>) -> (i32, i32) {
    %c0_i32 = arith.constant 0 : i32
    %c0_i32_0 = arith.constant 0 : i32
    %c0_i32_1 = arith.constant 0 : i32
    return %c0_i32, %c0_i32_0 : i32, i32
  }
  func.func @transform_1(%arg0: i32, %arg1: memref<2x4xi32, #tpu.memory_space<smem>>) -> (i32, i32) {
    %c0_i32 = arith.constant 0 : i32
    %c0_i32_0 = arith.constant 0 : i32
    %c0_i32_1 = arith.constant 0 : i32
    return %c0_i32, %c0_i32_0 : i32, i32
  }
  func.func @transform_2(%arg0: i32, %arg1: memref<2x4xi32, #tpu.memory_space<smem>>) -> (i32, i32) {
    %c0_i32 = arith.constant 0 : i32
    %c0_i32_0 = arith.constant 0 : i32
    %c0_i32_1 = arith.constant 0 : i32
    return %c0_i32, %c0_i32_0 : i32, i32
  }
  func.func @transform_3(%arg0: i32, %arg1: memref<2x4xi32, #tpu.memory_space<smem>>) -> (i32, i32) {
    %c0_i32 = arith.constant 0 : i32
    %c0_i32_0 = arith.constant 0 : i32
    %c0_i32_1 = arith.constant 0 : i32
    return %c0_i32, %c0_i32_0 : i32, i32
  }
  func.func @transform_4(%arg0: i32, %arg1: memref<2x4xi32, #tpu.memory_space<smem>>) -> (i32, i32, i32) {
    %c0_i32 = arith.constant 0 : i32
    %c0_i32_0 = arith.constant 0 : i32
    %c0_i32_1 = arith.constant 0 : i32
    %c0_i32_2 = arith.constant 0 : i32
    return %c0_i32, %c0_i32_0, %c0_i32_1 : i32, i32, i32
  }
  func.func @transform_5(%arg0: i32, %arg1: memref<2x4xi32, #tpu.memory_space<smem>>) -> (i32, i32, i32) {
    %c0_i32 = arith.constant 0 : i32
    %c0_i32_0 = arith.constant 0 : i32
    %c0_i32_1 = arith.constant 0 : i32
    %c0_i32_2 = arith.constant 0 : i32
    return %c0_i32, %c0_i32_0, %c0_i32_1 : i32, i32, i32
  }
  func.func @transform_6(%arg0: i32, %arg1: memref<2x4xi32, #tpu.memory_space<smem>>) -> (i32, i32, i32) {
    %c0_i32 = arith.constant 0 : i32
    %c0_i32_0 = arith.constant 0 : i32
    %c0_i32_1 = arith.constant 0 : i32
    %c0_i32_2 = arith.constant 0 : i32
    return %c0_i32, %c0_i32_0, %c0_i32_1 : i32, i32, i32
  }
  func.func @transform_7(%arg0: i32, %arg1: memref<2x4xi32, #tpu.memory_space<smem>>) -> (i32, i32, i32) {
    %c0_i32 = arith.constant 0 : i32
    %c0_i32_0 = arith.constant 0 : i32
    %c0_i32_1 = arith.constant 0 : i32
    %c0_i32_2 = arith.constant 0 : i32
    return %c0_i32, %c0_i32_0, %c0_i32_1 : i32, i32, i32
  }
  func.func @transform_8(%arg0: i32, %arg1: memref<2x4xi32, #tpu.memory_space<smem>>) -> (i32, i32, i32) {
    %c0_i32 = arith.constant 0 : i32
    %c0_i32_0 = arith.constant 0 : i32
    %c0_i32_1 = arith.constant 0 : i32
    %c0_i32_2 = arith.constant 0 : i32
    return %c0_i32, %c0_i32_0, %c0_i32_1 : i32, i32, i32
  }
  func.func @transform_9(%arg0: i32, %arg1: memref<2x4xi32, #tpu.memory_space<smem>>) -> (i32, i32) {
    %c0_i32 = arith.constant 0 : i32
    %c0_i32_0 = arith.constant 0 : i32
    %c0_i32_1 = arith.constant 0 : i32
    return %c0_i32, %c0_i32_0 : i32, i32
  }
  func.func @transform_10(%arg0: i32, %arg1: memref<2x4xi32, #tpu.memory_space<smem>>) -> (i32, i32) {
    %c0_i32 = arith.constant 0 : i32
    %c0_i32_0 = arith.constant 0 : i32
    %c0_i32_1 = arith.constant 0 : i32
    return %c0_i32, %c0_i32_0 : i32, i32
  }
  func.func @transform_11(%arg0: i32, %arg1: memref<2x4xi32, #tpu.memory_space<smem>>) -> (i32, i32) {
    %c0_i32 = arith.constant 0 : i32
    %c0_i32_0 = arith.constant 0 : i32
    %c0_i32_1 = arith.constant 0 : i32
    return %c0_i32, %c0_i32_0 : i32, i32
  }
}

</mosaic_0001>

<bundles_post_ra>
// kernel: bert_for_relation_extraction.1
= control target key start
LH: loop header
LB: loop body
LE: loop exit
PB: predicated region body
PF: predicated region fallthrough
CT: control target
= control target key end

     0   :  { %s5182_s0 = inlined_call_operand.vmem [shape: s32[2,4], index: 0, kind: input, shape index: {}]   ;;  %s5183_s1 = inlined_call_operand.vmem [shape: f32[16,32], index: 1, kind: input, shape index: {}]   ;;  %s5184_s2 = inlined_call_operand.vmem [shape: f32[2,8], index: 2, kind: input, shape index: {}]   ;;  %s5185_s3 = inlined_call_operand.vmem [shape: f32[1,32], index: 3, kind: input, shape index: {}]   ;;  %s5186_s4 = inlined_call_operand.vmem [shape: f32[1,32], index: 4, kind: input, shape index: {}]   ;;  %s5187_s5 = inlined_call_operand.vmem [shape: bf16[2,32,96], index: 5, kind: input, shape index: {}]   ;;  %s5188_s6 = inlined_call_operand.vmem [shape: bf16[2,32,32], index: 6, kind: input, shape index: {}]   ;;  %s5189_s7 = inlined_call_operand.vmem [shape: bf16[2,32,64], index: 7, kind: input, shape index: {}]   ;;  %s5190_s8 = inlined_call_operand.vmem [shape: bf16[2,64,32], index: 8, kind: input, shape index: {}]   ;;  %s5191_s9 = inlined_call_operand.vmem [shape: f32[2,8,128], index: 9, kind: input, shape index: {}]   ;;  %s5192_s10 = inlined_call_operand.vmem [shape: bf16[128,5], index: 10, kind: input, shape index: {}]   ;;  %s5193_s11 = inlined_call_operand.vmem [shape: f32[1,5], index: 11, kind: input, shape index: {}]   ;;  %s5194_s12 = inlined_call_operand.hbm [shape: f32[2,5], index: 12, kind: output, shape index: {}]  }
   0x1   :  { %s17_s23 = sshll.u32 %s5182_s0, 4  ;;  %s18_s23 = int_to_ptr.vmem [resolvable:$true] %s17_s23 }
   0x2   :  { %s4433_s24 = scalar_lea.vmem %s18_s23, 32  ;;  %p4438_p1 = scmp.lt.s32.totalorder %s18_s23, %s18_s23 }
   0x3   :  { %p4434_p0 = scmp.ne.s32.totalorder %s18_s23, %s4433_s24  ;;  %p4439_p2 = scmp.lt.s32.totalorder %s4433_s24, %s4433_s24 }
   0x5   :  { %p4440_p3 = por %p4439_p2, %p4438_p1 }
   0x7   :  { %p4441_p4 = pnand %p4440_p3, %p4434_p0 }
   0x9   :  { %4444 = shalt.err (!%p4441_p4)  }
   0xa   :  { %s4471_s25 = smov [#allocation4]  }
   0xb   :  { %20 = dma.vmem_to_smem %s18_s23, 32, %s4471_s25, [#allocation3] }
   0xc   :  { %4467 = dma.done.wait [#allocation3], 32 }
   0xd   :  { %4468 = vsyncadd [#allocation3], 4294967264 }
   0xe   :  { %22 = sfence }
   0xf   :  { %v47_v0 = vld [vmem:[%s5183_s1] sm:$0xff]  ;;  %vm51_vm0 = vcmask 261120   ;;  %v48_v1 = vld [vmem:[%s5183_s1 + $0x8] sm:$0xff] }
  0x10   :  { %v52_v2 = vsel %vm51_vm0, %v47_v0, 0.0  ;;  %v55_v3 = vsel %vm51_vm0, %v48_v1, 0.0 }
  0x11   :  { %53 = vadd.xlane.f32.xlu0 %v52_v2 }
  0x15   :  { %56 = vadd.xlane.f32.xlu0 %v55_v3 }
  0x16   :  { %23 = vsyncpa [#allocation6], 0  ;;  %v4313_v14 = vld [vmem:[%s5187_s5] sm:$0xff]   ;;  %v4472_v15 = vmov 0.0   ;;  %vm4473_vm1 = vmmov 0   ;;  %v4314_v16 = vld [vmem:[%s5187_s5 + $0x8] sm:$0xff]   ;;  %v96_v34 = vlaneseq }
  0x17   :  { %3997 = vmatprep.subr.bf16.mxu1 %v4472_v15  ;;  %4001 = vmatprep.mubr.msk.bf16.mxu1 %vm4473_vm1, %v4472_v15  ;;  %v3777_v25 = vld [vmem:[%s5185_s3] ss:$0 sm:$0xff]  ;;  %s4474_s18 = smov 88   ;;  %s4475_s19 = smov 96   ;;  %vm177_vm2 = vcmask 64512   ;;  %vm848_vm3 = vcmask 130048  }
  0x18   :  { %3998 = vmatpush3.bf16.msra.mxu1 %v4313_v14  ;;  %4010 = vmatprep.subr.mxu0 %v4472_v15  ;;  %v3778_v29 = vld [vmem:[%s5186_s4] ss:$0 sm:$0xff]  ;;  %v4597_v35 = vshrl.u32 %v96_v34, 7  ;;  %s4476_s20 = smov 112   ;;  %s4477_s21 = smov 120   ;;  %vm850_vm4 = vcmask 195584  }
  0x19   :  { %3999 = vmatprep.subr.bf16.mxu1 %v4472_v15  ;;  %4012 = vmatprep.mubr.msk.f32.mxu0 %vm4473_vm1, %v4472_v15  ;;  %v4605_v37 = vld [vmem:[%s5191_s9] sm:$0xff]  ;;  %s4478_s22 = smov 104   ;;  %s4479_s23 = smov 80   ;;  %vm1752_vm5 = vcmask 523264   ;;  %vm3599_vm6 = vcmask 785408   ;;  %vm3635_vm7 = vcmask 1040384  }
  0x1a   :  { %v4600_v36 = vsub.s32 0, %v4597_v35  ;;  %s4480_s24 = smov 72   ;;  %v95_v61 = vld [vmem:[%s5184_s2] sm:$0x3]  ;;  %s4481_s2 = smov 64   ;;  %vm3749_vm8 = vcmask 33792  }
  0x1b   :  { %s4482_s27 = smov 48   ;;  %s4483_s28 = smov 40  }
  0x1c   :  { %4000 = vmatpush3.bf16.msra.mxu1 %v4314_v16  ;;  %v169_v38 = vrot.slane %v4605_v37, %v4600_v36  ;;  %v4681_v62 = vrot.slane %v95_v61, %v4600_v36  ;;  %s4484_s0 = smov 56   ;;  %s4485_s14 = smov 8  }
  0x1d   :  { %4005 = vmatprep.subr.mxu1 %v4472_v15  ;;  %s4486_s15 = smov 16   ;;  %s4487_s16 = smov 24  }
  0x1e   :  { %s4488_s3 = smov 32   ;;  %s3573_s4 = sld [smem:[#allocation4]] }
  0x1f   :  { %s4489_s1 = smov [#allocation5]  }
  0x20   :  { %s3757_s29 = sshll.u32 %s4489_s1, 4  ;;  %s3758_s29 = int_to_ptr.vmem [resolvable:$true] %s3757_s29 }
  0x21   :  { %p4450_p6 = scmp.lt.s32.totalorder %s3758_s29, %s3758_s29 }
  0x24   :  { %s3574_s26 = scalar_lea.vmem [#allocation2], %s3573_s4 }
  0x9e   :  { %v54_v4 = vpop.xlane.xlu0 %53 }
  0x9f   :  { %v59_v5 = vmul.f32 0.03125, %v54_v4 }
  0xa1   :  { %v61_v6 = vsub.f32 %v47_v0, %v59_v5 }
  0xa2   :  { %v57_v7 = vpop.xlane.xlu0 %56 }
  0xa3   :  { %v60_v8 = vmul.f32 0.03125, %v57_v7  ;;  %v63_v9 = vmul.f32 %v61_v6, %v61_v6 }
  0xa5   :  { %v62_v10 = vsub.f32 %v48_v1, %v60_v8  ;;  %v65_v11 = vsel %vm51_vm0, %v63_v9, 0.0  ;;  %v4688_v8 = vsub.s32 1, %v4597_v35 }
  0xa6   :  { %66 = vadd.xlane.f32.xlu1 %v65_v11 }
  0xa7   :  { %v64_v12 = vmul.f32 %v62_v10, %v62_v10 }
  0xa9   :  { %v68_v13 = vsel %vm51_vm0, %v64_v12, 0.0 }
  0xaa   :  { %69 = vadd.xlane.f32.xlu1 %v68_v13  ;;  %v4696_v13 = vrot.slane %v95_v61, %v4688_v8 }
 0x133   :  { %v67_v17 = vpop.xlane.xlu1 %66 }
 0x134   :  { %v71_v18 = vmul.f32 0.03125, %v67_v17 }
 0x136   :  { %v73_v19 = vadd.f32 1e-12, %v71_v18 }
 0x137   :  { %v70_v20 = vpop.xlane.xlu1 %69 }
 0x138   :  { %4341 = vrsqrt.f32 %v73_v19  ;;  %v72_v21 = vmul.f32 0.03125, %v70_v20 }
 0x13a   :  { %v74_v22 = vadd.f32 1e-12, %v72_v21 }
 0x13c   :  { %4343 = vrsqrt.f32 %v74_v22 }
 0x142   :  { %v4342_v23 = vpop.eup %4341 }
 0x143   :  { %v77_v24 = vmul.f32 %v4342_v23, %v61_v6 }
 0x145   :  { %v85_v28 = vmul.f32 %v3777_v25, %v77_v24 }
 0x146   :  { %v4344_v26 = vpop.eup %4343 }
 0x147   :  { %v78_v27 = vmul.f32 %v4344_v26, %v62_v10  ;;  %v4588_v31 = vadd.f32 %v3778_v29, %v85_v28 }
 0x149   :  { %v86_v30 = vmul.f32 %v3777_v25, %v78_v27 }
 0x14b   :  { %v4590_v32 = vadd.f32 %v3778_v29, %v86_v30 }
 0x14d   :  { %v105_v33 = vpack.c.bf16 %v4590_v32, %v4588_v31 }
 0x14f   :  { %4002 = vmatmul.mubr.msk.bf16.vlgmr.msra.gmra.mrb[0].mxu1 %vm51_vm0, %v105_v33 }
 0x150   :  { %4007 = vmatprep.mubr.msk.f32.mxu1 %vm4473_vm1, %v4472_v15 }
 0x222   :  { %v159_v39 = vpop.f32.mrb[0].mxu1 }
 0x223   :  { %v4609_v40 = vadd.f32 %v169_v38, %v159_v39  ;;  %v4003_v41 = vpop.f32.mrb[1].mxu1 }
 0x224   :  { %v162_v42 = vpop.f32.mrb[2].mxu1 }
 0x225   :  { %342 = vrot.lane.b32.xlu1 %v4609_v40, %s4474_s18  ;;  %175 = vrot.lane.b32.xlu0 %v4609_v40, %s4475_s19  ;;  %v4004_v43 = vpop.f32.mrb[3].mxu1  ;;  %v172_v44 = vmul.f32 0.35355338, %v4609_v40  ;;  %v4621_v45 = vadd.f32 %v169_v38, %v162_v42 }
 0x227   :  { %v173_v46 = vmul.f32 0.35355338, %v4621_v45 }
 0x229   :  { %505 = vrot.lane.b32.xlu0 %v172_v44, %s4476_s20  ;;  %340 = vrot.lane.b32.xlu1 %v172_v44, %s4477_s21 }
 0x22d   :  { %670 = vrot.lane.b32.xlu0 %v172_v44, %s4478_s22  ;;  %507 = vrot.lane.b32.xlu1 %v4609_v40, %s4479_s23 }
 0x231   :  { %672 = vrot.lane.b32.xlu1 %v4609_v40, %s4480_s24  ;;  %1019 = vrot.lane.b32.xlu0 %v4621_v45, %s4474_s18 }
 0x235   :  { %1184 = vrot.lane.b32.xlu0 %v4621_v45, %s4479_s23  ;;  %853 = vrot.lane.b32.xlu1 %v4621_v45, %s4475_s19 }
 0x239   :  { %1349 = vrot.lane.b32.xlu0 %v4621_v45, %s4480_s24  ;;  %1017 = vrot.lane.b32.xlu1 %v173_v46, %s4477_s21 }
 0x23d   :  { %1182 = vrot.lane.b32.xlu1 %v173_v46, %s4476_s20 }
 0x241   :  { %1347 = vrot.lane.b32.xlu1 %v173_v46, %s4478_s22 }
 0x297   :  { %v343_v47 = vpop.permute.xlu1 %342  ;;  %v176_v48 = vpop.permute.xlu0 %175 }
 0x298   :  { %4006 = vmatpush3.xpose.msk.msra.mxu1 %vm177_vm2, %v176_v48 }
 0x299   :  { %4015 = vmatprep.subr.mxu1 %v4472_v15 }
 0x29b   :  { %v506_v49 = vpop.permute.xlu0 %505  ;;  %v341_v50 = vpop.permute.xlu1 %340  ;;  %4008 = vmatmul.mubr.msk.f32.vlgmr.msra.gmra.mrb[4].mxu1 %vm177_vm2, %v172_v44 }
 0x29c   :  { %4016 = vmatpush3.xpose.msk.msra.mxu1 %vm177_vm2, %v343_v47  ;;  %4017 = vmatprep.mubr.msk.f32.mxu1 %vm4473_vm1, %v4472_v15 }
 0x29d   :  { %4025 = vmatprep.subr.mxu1 %v4472_v15 }
 0x29f   :  { %v508_v51 = vpop.permute.xlu1 %507  ;;  %4018 = vmatmul.mubr.msk.f32.vlgmr.msra.gmra.mrb[6].mxu1 %vm177_vm2, %v341_v50  ;;  %v671_v52 = vpop.permute.xlu0 %670 }
 0x2a0   :  { %4026 = vmatpush3.xpose.msk.msra.mxu1 %vm177_vm2, %v508_v51  ;;  %4027 = vmatprep.mubr.msk.f32.mxu1 %vm4473_vm1, %v4472_v15 }
 0x2a1   :  { %4035 = vmatprep.subr.mxu1 %v4472_v15 }
 0x2a3   :  { %v673_v53 = vpop.permute.xlu1 %672  ;;  %4028 = vmatmul.mubr.msk.f32.vlgmr.msra.gmra.mrb[8].mxu1 %vm177_vm2, %v506_v49  ;;  %v1020_v54 = vpop.permute.xlu0 %1019 }
 0x2a4   :  { %4036 = vmatpush3.xpose.msk.msra.mxu1 %vm177_vm2, %v673_v53  ;;  %4037 = vmatprep.mubr.msk.f32.mxu1 %vm4473_vm1, %v4472_v15 }
 0x2a5   :  { %4045 = vmatprep.subr.mxu1 %v4472_v15 }
 0x2a7   :  { %4038 = vmatmul.mubr.msk.f32.vlgmr.msra.gmra.mrb[10].mxu1 %vm177_vm2, %v671_v52  ;;  %v854_v55 = vpop.permute.xlu1 %853  ;;  %v1185_v57 = vpop.permute.xlu0 %1184 }
 0x2a8   :  { %4046 = vmatpush3.xpose.msk.msra.mxu1 %vm177_vm2, %v854_v55  ;;  %4047 = vmatprep.mubr.msk.f32.mxu1 %vm4473_vm1, %v4472_v15 }
 0x2a9   :  { %4055 = vmatprep.subr.mxu1 %v4472_v15 }
 0x2ab   :  { %v1018_v56 = vpop.permute.xlu1 %1017  ;;  %4048 = vmatmul.mubr.msk.f32.vlgmr.msra.gmra.mrb[12].mxu1 %vm177_vm2, %v173_v46  ;;  %v1350_v59 = vpop.permute.xlu0 %1349 }
 0x2ac   :  { %4056 = vmatpush3.xpose.msk.msra.mxu1 %vm177_vm2, %v1020_v54  ;;  %4057 = vmatprep.mubr.msk.f32.mxu1 %vm4473_vm1, %v4472_v15 }
 0x2ad   :  { %4065 = vmatprep.subr.mxu1 %v4472_v15 }
 0x2af   :  { %4058 = vmatmul.mubr.msk.f32.vlgmr.msra.gmra.mrb[14].mxu1 %vm177_vm2, %v1018_v56  ;;  %v1183_v58 = vpop.permute.xlu1 %1182 }
 0x2b0   :  { %4066 = vmatpush3.xpose.msk.msra.mxu1 %vm177_vm2, %v1185_v57  ;;  %4067 = vmatprep.mubr.msk.f32.mxu1 %vm4473_vm1, %v4472_v15 }
 0x2b1   :  { %4075 = vmatprep.subr.mxu1 %v4472_v15 }
 0x2b3   :  { %4068 = vmatmul.mubr.msk.f32.vlgmr.msra.gmra.mrb[16].mxu1 %vm177_vm2, %v1183_v58  ;;  %v1348_v60 = vpop.permute.xlu1 %1347 }
 0x2b4   :  { %4076 = vmatpush3.xpose.msk.msra.mxu1 %vm177_vm2, %v1350_v59  ;;  %4077 = vmatprep.mubr.msk.f32.mxu1 %vm4473_vm1, %v4472_v15 }
 0x2b5   :  { %4085 = vmatprep.subr.bf16.mxu1 %v4472_v15 }
 0x2b7   :  { %4078 = vmatmul.mubr.msk.f32.vlgmr.msra.gmra.mrb[18].mxu1 %vm177_vm2, %v1348_v60 }
 0x2b8   :  { %4089 = vmatprep.mubr.msk.bf16.mxu1 %vm4473_vm1, %v4472_v15 }
 0x36e   :  { %v249_v63 = vpop.f32.mrb[4].mxu1 }
 0x36f   :  { %v250_v0 = vadd.f32 %v249_v63, %v4681_v62  ;;  %v4009_v1 = vpop.f32.mrb[5].mxu1 }
 0x371   :  { %v253_v2 = vsel %vm177_vm2, %v250_v0, -inf }
 0x372   :  { %254 = vmax.xlane.f32.xlu0 %v253_v2  ;;  %v414_v3 = vpop.f32.mrb[6].mxu1 }
 0x373   :  { %v415_v4 = vadd.f32 %v414_v3, %v4681_v62  ;;  %v4019_v5 = vpop.f32.mrb[7].mxu1 }
 0x375   :  { %v418_v6 = vsel %vm177_vm2, %v415_v4, -inf }
 0x376   :  { %419 = vmax.xlane.f32.xlu1 %v418_v6  ;;  %v579_v7 = vpop.f32.mrb[8].mxu1 }
 0x377   :  { %v4691_v9 = vadd.f32 %v579_v7, %v4681_v62  ;;  %v4029_v10 = vpop.f32.mrb[9].mxu1 }
 0x379   :  { %v583_v11 = vsel %vm177_vm2, %v4691_v9, -inf }
 0x37a   :  { %584 = vmax.xlane.f32.xlu0 %v583_v11  ;;  %v744_v12 = vpop.f32.mrb[10].mxu1 }
 0x37b   :  { %v745_v14 = vadd.f32 %v744_v12, %v4681_v62  ;;  %v4039_v16 = vpop.f32.mrb[11].mxu1 }
 0x37d   :  { %v748_v17 = vsel %vm177_vm2, %v745_v14, -inf }
 0x37e   :  { %749 = vmax.xlane.f32.xlu0 %v748_v17  ;;  %v926_v18 = vpop.f32.mrb[12].mxu1 }
 0x37f   :  { %v927_v19 = vadd.f32 %v926_v18, %v4696_v13  ;;  %v4049_v20 = vpop.f32.mrb[13].mxu1 }
 0x381   :  { %v930_v21 = vsel %vm177_vm2, %v927_v19, -inf }
 0x382   :  { %931 = vmax.xlane.f32.xlu0 %v930_v21  ;;  %v1091_v22 = vpop.f32.mrb[14].mxu1 }
 0x383   :  { %v1092_v23 = vadd.f32 %v1091_v22, %v4696_v13  ;;  %v4059_v24 = vpop.f32.mrb[15].mxu1 }
 0x385   :  { %v1095_v25 = vsel %vm177_vm2, %v1092_v23, -inf }
 0x386   :  { %1096 = vmax.xlane.f32.xlu1 %v1095_v25  ;;  %v1256_v26 = vpop.f32.mrb[16].mxu1 }
 0x387   :  { %v1257_v27 = vadd.f32 %v1256_v26, %v4696_v13  ;;  %v4069_v28 = vpop.f32.mrb[17].mxu1 }
 0x389   :  { %v1260_v29 = vsel %vm177_vm2, %v1257_v27, -inf }
 0x38a   :  { %1261 = vmax.xlane.f32.xlu0 %v1260_v29  ;;  %v1421_v30 = vpop.f32.mrb[18].mxu1 }
 0x38b   :  { %v4079_v33 = vpop.f32.mrb[19].mxu1  ;;  %v1422_v34 = vadd.f32 %v1421_v30, %v4696_v13 }
 0x38d   :  { %v1425_v38 = vsel %vm177_vm2, %v1422_v34, -inf }
 0x397   :  { %264 = vrot.lane.b32.xlu1 %v4609_v40, %s4481_s2 }
 0x3bb   :  { %1426 = vmax.xlane.f32.xlu1 %v1425_v38 }
 0x3cc   :  { %594 = vrot.lane.b32.xlu1 %v4609_v40, %s4482_s27 }
 0x3d0   :  { %759 = vrot.lane.b32.xlu1 %v4609_v40, %s4483_s28 }
 0x3d4   :  { %941 = vrot.lane.b32.xlu1 %v4621_v45, %s4481_s2 }
 0x3ff   :  { %v255_v39 = vpop.xlane.xlu0 %254 }
 0x400   :  { %v256_v41 = vsub.f32 %v250_v0, %v255_v39 }
 0x402   :  { %v257_v42 = vmul.f32 1.442695, %v256_v41 }
 0x403   :  { %v420_v43 = vpop.xlane.xlu1 %419 }
 0x404   :  { %4345 = vpow2.f32 %v257_v42  ;;  %v421_v44 = vsub.f32 %v415_v4, %v420_v43 }
 0x406   :  { %v422_v46 = vmul.f32 1.442695, %v421_v44 }
 0x407   :  { %v585_v47 = vpop.xlane.xlu0 %584 }
 0x408   :  { %4347 = vpow2.f32 %v422_v46  ;;  %v586_v59 = vsub.f32 %v4691_v9, %v585_v47 }
 0x40a   :  { %v587_v61 = vmul.f32 1.442695, %v586_v59 }
 0x40b   :  { %v750_v48 = vpop.xlane.xlu0 %749 }
 0x40c   :  { %v751_v49 = vsub.f32 %v745_v14, %v750_v48 }
 0x40e   :  { %v4346_v50 = vpop.eup %4345  ;;  %v752_v51 = vmul.f32 1.442695, %v751_v49 }
 0x40f   :  { %v259_v52 = vsel %vm177_vm2, %v4346_v50, 0.0  ;;  %v932_v60 = vpop.xlane.xlu0 %931 }
 0x410   :  { %4349 = vpow2.f32 %v752_v51  ;;  %260 = vadd.xlane.f32.xlu0 %v259_v52  ;;  %v933_v63 = vsub.f32 %v927_v19, %v932_v60 }
 0x411   :  { %4351 = vpow2.f32 %v587_v61 }
 0x412   :  { %v4348_v53 = vpop.eup %4347  ;;  %v934_v1 = vmul.f32 1.442695, %v933_v63 }
 0x413   :  { %v1097_v54 = vpop.xlane.xlu1 %1096  ;;  %v424_v55 = vsel %vm177_vm2, %v4348_v53, 0.0 }
 0x414   :  { %425 = vadd.xlane.f32.xlu1 %v424_v55  ;;  %4353 = vpow2.f32 %v934_v1  ;;  %v1098_v3 = vsub.f32 %v1092_v23, %v1097_v54 }
 0x416   :  { %v1099_v5 = vmul.f32 1.442695, %v1098_v3  ;;  %v4315_v3 = vld [vmem:[%s5188_s6] sm:$0xff]  }
 0x417   :  { %v265_v56 = vpop.permute.xlu1 %264  ;;  %v1262_v0 = vpop.xlane.xlu0 %1261  ;;  %4086 = vmatpush3.bf16.msra.mxu1 %v4315_v3 }
 0x418   :  { %4011 = vmatpush3.msra.mxu0 %v265_v56  ;;  %v1263_v2 = vsub.f32 %v1257_v27, %v1262_v0  ;;  %4087 = vmatprep.subr.bf16.mxu1 %v4472_v15 }
 0x419   :  { %4020 = vmatprep.subr.mxu0 %v4472_v15 }
 0x41a   :  { %v4719_v57 = vpop.eup %4349  ;;  %v1264_v4 = vmul.f32 1.442695, %v1263_v2 }
 0x41b   :  { %v754_v58 = vsel %vm177_vm2, %v4719_v57, 0.0  ;;  %v4352_v6 = vpop.eup %4351 }
 0x41c   :  { %755 = vadd.xlane.f32.xlu1 %v754_v58  ;;  %4355 = vpow2.f32 %v1264_v4 }
 0x41d   :  { %4357 = vpow2.f32 %v1099_v5 }
 0x41e   :  { %v4354_v7 = vpop.eup %4353 }
 0x41f   :  { %v936_v9 = vsel %vm177_vm2, %v4354_v7, 0.0 }
 0x426   :  { %429 = vrot.lane.b32.xlu0 %v4609_v40, %s4484_s0  ;;  %v589_v40 = vsel %vm177_vm2, %v4352_v6, 0.0  ;;  %v4730_v11 = vpop.eup %4355 }
 0x427   :  { %v1266_v16 = vsel %vm177_vm2, %v4730_v11, 0.0  ;;  %v4358_v17 = vpop.eup %4357 }
 0x428   :  { %v1101_v18 = vsel %vm177_vm2, %v4358_v17, 0.0 }
 0x42d   :  { %1106 = vrot.lane.b32.xlu1 %v4621_v45, %s4484_s0 }
 0x445   :  { %590 = vadd.xlane.f32.xlu0 %v589_v40 }
 0x448   :  { %v1427_v10 = vpop.xlane.xlu1 %1426 }
 0x449   :  { %v1428_v12 = vsub.f32 %v1422_v34, %v1427_v10  ;;  %937 = vadd.xlane.f32.xlu0 %v936_v9 }
 0x44b   :  { %v1429_v14 = vmul.f32 1.442695, %v1428_v12 }
 0x44c   :  { %v595_v21 = vpop.permute.xlu1 %594 }
 0x44d   :  { %4359 = vpow2.f32 %v1429_v14  ;;  %1267 = vadd.xlane.f32.xlu0 %v1266_v16 }
 0x450   :  { %v760_v22 = vpop.permute.xlu1 %759 }
 0x451   :  { %1102 = vadd.xlane.f32.xlu1 %v1101_v18 }
 0x454   :  { %v942_v23 = vpop.permute.xlu1 %941 }
 0x457   :  { %v4735_v19 = vpop.eup %4359 }
 0x458   :  { %v1431_v20 = vsel %vm177_vm2, %v4735_v19, 0.0 }
 0x459   :  { %1432 = vadd.xlane.f32.xlu0 %v1431_v20 }
 0x462   :  { %1436 = vrot.lane.b32.xlu1 %v4621_v45, %s4483_s28 }
 0x46f   :  { %1271 = vrot.lane.b32.xlu0 %v4621_v45, %s4482_s27 }
 0x49d   :  { %v261_v24 = vpop.xlane.xlu0 %260 }
 0x49e   :  { %4361 = vrcp.f32 %v261_v24 }
 0x4a1   :  { %v426_v25 = vpop.xlane.xlu1 %425  ;;  %v430_v28 = vpop.permute.xlu0 %429 }
 0x4a2   :  { %4363 = vrcp.f32 %v426_v25 }
 0x4a8   :  { %v4362_v26 = vpop.eup %4361 }
 0x4a9   :  { %v263_v27 = vmul.f32 %v4362_v26, %v4346_v50  ;;  %v756_v45 = vpop.xlane.xlu1 %755 }
 0x4ab   :  { %4013 = vmatmul.mubr.msk.f32.vlgmr.msra.gmra.mrb[0].mxu0 %vm177_vm2, %v263_v27 }
 0x4ac   :  { %v4364_v29 = vpop.eup %4363  ;;  %4021 = vmatpush3.msra.mxu0 %v430_v28  ;;  %4022 = vmatprep.mubr.msk.f32.mxu0 %vm4473_vm1, %v4472_v15 }
 0x4ad   :  { %v428_v30 = vmul.f32 %v4364_v29, %v4348_v53  ;;  %4030 = vmatprep.subr.mxu0 %v4472_v15  ;;  %v1107_v38 = vpop.permute.xlu1 %1106 }
 0x4af   :  { %4023 = vmatmul.mubr.msk.f32.vlgmr.msra.gmra.mrb[2].mxu0 %vm177_vm2, %v428_v30 }
 0x4b0   :  { %4031 = vmatpush3.msra.mxu0 %v595_v21  ;;  %4032 = vmatprep.mubr.msk.f32.mxu0 %vm4473_vm1, %v4472_v15 }
 0x4b1   :  { %4040 = vmatprep.subr.mxu0 %v4472_v15 }
 0x4d2   :  { %v591_v33 = vpop.xlane.xlu0 %590 }
 0x4d3   :  { %4365 = vrcp.f32 %v591_v33 }
 0x4d4   :  { %4367 = vrcp.f32 %v756_v45 }
 0x4d6   :  { %v938_v34 = vpop.xlane.xlu0 %937 }
 0x4d7   :  { %4369 = vrcp.f32 %v938_v34 }
 0x4da   :  { %v1268_v42 = vpop.xlane.xlu0 %1267 }
 0x4dd   :  { %v4366_v39 = vpop.eup %4365 }
 0x4de   :  { %v593_v41 = vmul.f32 %v4366_v39, %v4352_v6  ;;  %v1103_v43 = vpop.xlane.xlu1 %1102  ;;  %v4368_v44 = vpop.eup %4367  ;;  %v4316_v6 = vld [vmem:[%s5188_s6 + $0x8] sm:$0xff]  }
 0x4df   :  { %4371 = vrcp.f32 %v1103_v43  ;;  %v758_v46 = vmul.f32 %v4368_v44, %v4719_v57  ;;  %4088 = vmatpush3.bf16.msra.mxu1 %v4316_v6 }
 0x4e0   :  { %4033 = vmatmul.mubr.msk.f32.vlgmr.msra.gmra.mrb[4].mxu0 %vm177_vm2, %v593_v41  ;;  %4373 = vrcp.f32 %v1268_v42  ;;  %4101 = vmatprep.subr.bf16.mxu1 %v4472_v15 }
 0x4e1   :  { %4041 = vmatpush3.msra.mxu0 %v760_v22  ;;  %4042 = vmatprep.mubr.msk.f32.mxu0 %vm4473_vm1, %v4472_v15  ;;  %v4370_v47 = vpop.eup %4369 }
 0x4e2   :  { %4050 = vmatprep.subr.mxu0 %v4472_v15  ;;  %v940_v48 = vmul.f32 %v4370_v47, %v4354_v7  ;;  %v1437_v55 = vpop.permute.xlu1 %1436 }
 0x4e4   :  { %4043 = vmatmul.mubr.msk.f32.vlgmr.msra.gmra.mrb[6].mxu0 %vm177_vm2, %v758_v46 }
 0x4e5   :  { %4051 = vmatpush3.msra.mxu0 %v942_v23  ;;  %4052 = vmatprep.mubr.msk.f32.mxu0 %vm4473_vm1, %v4472_v15 }
 0x4e6   :  { %v1433_v49 = vpop.xlane.xlu0 %1432  ;;  %4060 = vmatprep.subr.mxu0 %v4472_v15 }
 0x4e7   :  { %4375 = vrcp.f32 %v1433_v49 }
 0x4e8   :  { %4053 = vmatmul.mubr.msk.f32.vlgmr.msra.gmra.mrb[8].mxu0 %vm177_vm2, %v940_v48 }
 0x4e9   :  { %v4372_v50 = vpop.eup %4371  ;;  %4061 = vmatpush3.msra.mxu0 %v1107_v38  ;;  %4062 = vmatprep.mubr.msk.f32.mxu0 %vm4473_vm1, %v4472_v15  ;;  %v1535_v38 = vrot.slane %v4605_v37, %v4688_v8 }
 0x4ea   :  { %v1105_v51 = vmul.f32 %v4372_v50, %v4358_v17  ;;  %v1272_v52 = vpop.permute.xlu0 %1271  ;;  %4070 = vmatprep.subr.mxu0 %v4472_v15  ;;  %v4374_v53 = vpop.eup %4373 }
 0x4eb   :  { %v1270_v54 = vmul.f32 %v4374_v53, %v4730_v11 }
 0x4ec   :  { %4063 = vmatmul.mubr.msk.f32.vlgmr.msra.gmra.mrb[10].mxu0 %vm177_vm2, %v1105_v51 }
 0x4ed   :  { %4071 = vmatpush3.msra.mxu0 %v1272_v52  ;;  %4072 = vmatprep.mubr.msk.f32.mxu0 %vm4473_vm1, %v4472_v15 }
 0x4ee   :  { %4080 = vmatprep.subr.mxu0 %v4472_v15 }
 0x4f0   :  { %4073 = vmatmul.mubr.msk.f32.vlgmr.msra.gmra.mrb[12].mxu0 %vm177_vm2, %v1270_v54 }
 0x4f1   :  { %v4376_v56 = vpop.eup %4375  ;;  %4081 = vmatpush3.msra.mxu0 %v1437_v55  ;;  %4082 = vmatprep.mubr.msk.f32.mxu0 %vm4473_vm1, %v4472_v15 }
 0x4f2   :  { %v1435_v57 = vmul.f32 %v4376_v56, %v4735_v19  ;;  %4093 = vmatprep.subr.bf16.mxu0 %v4472_v15 }
 0x4f4   :  { %4083 = vmatmul.mubr.msk.f32.vlgmr.msra.gmra.mrb[14].mxu0 %vm177_vm2, %v1435_v57 }
 0x4f5   :  { %4097 = vmatprep.mubr.msk.bf16.mxu0 %vm4473_vm1, %v4472_v15 }
 0x57e   :  { %v336_v58 = vpop.f32.mrb[0].mxu0 }
 0x57f   :  { %v4014_v59 = vpop.f32.mrb[1].mxu0 }
 0x582   :  { %v501_v60 = vpop.f32.mrb[2].mxu0 }
 0x583   :  { %v4024_v61 = vpop.f32.mrb[3].mxu0 }
 0x5b3   :  { %v666_v63 = vpop.f32.mrb[4].mxu0 }
 0x5b4   :  { %v4034_v0 = vpop.f32.mrb[5].mxu0 }
 0x5b7   :  { %v831_v1 = vpop.f32.mrb[6].mxu0 }
 0x5b8   :  { %v4044_v2 = vpop.f32.mrb[7].mxu0 }
 0x5bb   :  { %v1013_v4 = vpop.f32.mrb[8].mxu0 }
 0x5bc   :  { %v4054_v5 = vpop.f32.mrb[9].mxu0 }
 0x5bf   :  { %v1178_v40 = vpop.f32.mrb[10].mxu0 }
 0x5c0   :  { %v4268_v7 = vpack.i.bf16 %v1178_v40, %v501_v60  ;;  %v4064_v10 = vpop.f32.mrb[11].mxu0  ;;  %v4318_v60 = vld [vmem:[%s5189_s7 + $0x8] sm:$0xff]  }
 0x5c2   :  { %4269 = vrot.lane.b32.xlu0 %v4268_v7, %s4485_s14  ;;  %v1628_v7 = vsub.s32 3, %v4597_v35 }
 0x5c3   :  { %v1343_v9 = vpop.f32.mrb[12].mxu0 }
 0x5c4   :  { %v4273_v11 = vpack.i.bf16 %v1343_v9, %v666_v63  ;;  %v4074_v12 = vpop.f32.mrb[13].mxu0 }
 0x5c5   :  { %v1629_v12 = vrot.slane %v4605_v37, %v1628_v7 }
 0x5c6   :  { %4274 = vrot.lane.b32.xlu1 %v4273_v11, %s4486_s15 }
 0x5c7   :  { %v1508_v14 = vpop.f32.mrb[14].mxu0 }
 0x5c8   :  { %v4278_v16 = vpack.i.bf16 %v1508_v14, %v831_v1  ;;  %v4084_v17 = vpop.f32.mrb[15].mxu0 }
 0x5ca   :  { %4279 = vrot.lane.b32.xlu0 %v4278_v16, %s4487_s16 }
 0x634   :  { %v4270_v18 = vpop.permute.xlu0 %4269 }
 0x635   :  { %v4272_v20 = vunpack.i.h.bf16 %v4270_v18  ;;  %v4271_v21 = vunpack.i.l.bf16 %v4270_v18 }
 0x637   :  { %v1524_v25 = vsel %vm177_vm2, %v1013_v4, %v4272_v20  ;;  %v847_v26 = vsel %vm177_vm2, %v336_v58, %v4271_v21  ;;  %v1622_v4 = vsub.s32 2, %v4597_v35  ;;  %v4320_v20 = vld [vmem:[%s5190_s8 + $0x8] sm:$0xff]   ;;  %v4321_v21 = vld [vmem:[%s5190_s8 + $0x10] sm:$0xff]  }
 0x638   :  { %v4275_v19 = vpop.permute.xlu1 %4274 }
 0x639   :  { %v4277_v22 = vunpack.i.h.bf16 %v4275_v19  ;;  %v4276_v23 = vunpack.i.l.bf16 %v4275_v19  ;;  %v1623_v6 = vrot.slane %v4605_v37, %v1622_v4  ;;  %v4319_v19 = vld [vmem:[%s5190_s8] sm:$0xff]  }
 0x63b   :  { %v1525_v29 = vsel %vm848_vm3, %v1524_v25, %v4277_v22  ;;  %v849_v30 = vsel %vm848_vm3, %v847_v26, %v4276_v23  ;;  %v4322_v22 = vld [vmem:[%s5190_s8 + $0x18] sm:$0xff]   ;;  %v1639_v23 = vsub.s32 4, %v4597_v35 }
 0x63c   :  { %v4280_v24 = vpop.permute.xlu0 %4279 }
 0x63d   :  { %v4282_v27 = vunpack.i.h.bf16 %v4280_v24  ;;  %v4281_v28 = vunpack.i.l.bf16 %v4280_v24  ;;  %v1640_v24 = vrot.slane %v4605_v37, %v1639_v23 }
 0x63f   :  { %v851_v45 = vsel %vm850_vm4, %v849_v30, %v4281_v28  ;;  %v1526_v33 = vsel %vm850_vm4, %v1525_v29, %v4282_v27 }
 0x640   :  { %v1527_v34 = vpack.c.bf16 %v1526_v33, %v851_v45 }
 0x642   :  { %4090 = vmatmul.mubr.msk.bf16.vlgmr.msra.gmra.mrb[20].mxu1 %vm51_vm0, %v1527_v34 }
 0x643   :  { %4109 = vmatprep.mubr.msk.bf16.mxu1 %vm4473_vm1, %v4472_v15  ;;  %4102 = vmatpush3.bf16.msra.mxu1 %v4319_v19 }
 0x644   :  { %4103 = vmatprep.subr.bf16.mxu1 %v4472_v15 }
 0x647   :  { %4104 = vmatpush3.bf16.msra.mxu1 %v4320_v20 }
 0x648   :  { %4105 = vmatprep.subr.bf16.mxu1 %v4472_v15 }
 0x64b   :  { %4106 = vmatpush3.bf16.msra.mxu1 %v4321_v21 }
 0x64c   :  { %4107 = vmatprep.subr.bf16.mxu1 %v4472_v15 }
 0x64f   :  { %4108 = vmatpush3.bf16.msra.mxu1 %v4322_v22 }
 0x650   :  { %4131 = vmatprep.subr.mxu1 %v4472_v15 }
 0x715   :  { %v1585_v39 = vpop.f32.mrb[20].mxu1 }
 0x716   :  { %v1586_v41 = vadd.f32 %v1585_v39, %v1535_v38  ;;  %v4091_v42 = vpop.f32.mrb[21].mxu1 }
 0x717   :  { %v1588_v43 = vpop.f32.mrb[22].mxu1 }
 0x718   :  { %v1589_v44 = vadd.f32 %v1588_v43, %v1535_v38  ;;  %v4092_v46 = vpop.f32.mrb[23].mxu1  ;;  %v1592_v47 = vadd.f32 %v1586_v41, %v4588_v31 }
 0x71a   :  { %v1594_v48 = vsel %vm51_vm0, %v1592_v47, 0.0  ;;  %v1593_v49 = vadd.f32 %v1589_v44, %v4590_v32  ;;  %v4317_v32 = vld [vmem:[%s5189_s7] sm:$0xff]  }
 0x71b   :  { %1595 = vadd.xlane.f32.xlu1 %v1594_v48  ;;  %4094 = vmatpush3.bf16.msra.mxu0 %v4317_v32 }
 0x71c   :  { %v1597_v50 = vsel %vm51_vm0, %v1593_v49, 0.0  ;;  %4095 = vmatprep.subr.bf16.mxu0 %v4472_v15 }
 0x71d   :  { %1598 = vadd.xlane.f32.xlu0 %v1597_v50 }
 0x71f   :  { %4096 = vmatpush3.bf16.msra.mxu0 %v4318_v60 }
 0x720   :  { %4113 = vmatprep.subr.bf16.mxu0 %v4472_v15 }
 0x7a8   :  { %v1596_v51 = vpop.xlane.xlu1 %1595 }
 0x7a9   :  { %v1600_v52 = vmul.f32 0.03125, %v1596_v51 }
 0x7aa   :  { %v1599_v53 = vpop.xlane.xlu0 %1598 }
 0x7ab   :  { %v1602_v54 = vsub.f32 %v1592_v47, %v1600_v52  ;;  %v1601_v55 = vmul.f32 0.03125, %v1599_v53 }
 0x7ad   :  { %v1603_v56 = vsub.f32 %v1593_v49, %v1601_v55  ;;  %v1604_v57 = vmul.f32 %v1602_v54, %v1602_v54 }
 0x7af   :  { %v1606_v58 = vsel %vm51_vm0, %v1604_v57, 0.0  ;;  %v1605_v59 = vmul.f32 %v1603_v56, %v1603_v56 }
 0x7b0   :  { %1607 = vadd.xlane.f32.xlu0 %v1606_v58 }
 0x7b1   :  { %v1609_v31 = vsel %vm51_vm0, %v1605_v59, 0.0 }
 0x7b4   :  { %1610 = vadd.xlane.f32.xlu0 %v1609_v31 }
 0x83d   :  { %v1608_v61 = vpop.xlane.xlu0 %1607 }
 0x83e   :  { %v1612_v63 = vmul.f32 0.03125, %v1608_v61 }
 0x840   :  { %v1614_v0 = vadd.f32 1e-12, %v1612_v63 }
 0x841   :  { %v1611_v1 = vpop.xlane.xlu0 %1610 }
 0x842   :  { %4377 = vrsqrt.f32 %v1614_v0  ;;  %v1613_v2 = vmul.f32 0.03125, %v1611_v1 }
 0x844   :  { %v1615_v3 = vadd.f32 1e-12, %v1613_v2 }
 0x846   :  { %4379 = vrsqrt.f32 %v1615_v3 }
 0x84c   :  { %v4378_v5 = vpop.eup %4377 }
 0x84d   :  { %v1618_v40 = vmul.f32 %v4378_v5, %v1602_v54 }
 0x84f   :  { %v1624_v9 = vmul.f32 %v1623_v6, %v1618_v40 }
 0x850   :  { %v4380_v10 = vpop.eup %4379 }
 0x851   :  { %v1619_v11 = vmul.f32 %v4380_v10, %v1603_v56  ;;  %v1630_v16 = vadd.f32 %v1629_v12, %v1624_v9  ;;  %v1726_v56 = vsub.s32 5, %v4597_v35 }
 0x853   :  { %v1625_v14 = vmul.f32 %v1623_v6, %v1619_v11  ;;  %v1727_v57 = vrot.slane %v4605_v37, %v1726_v56 }
 0x855   :  { %v1631_v17 = vadd.f32 %v1629_v12, %v1625_v14 }
 0x857   :  { %v1632_v18 = vpack.c.bf16 %v1631_v17, %v1630_v16 }
 0x859   :  { %4098 = vmatmul.mubr.msk.bf16.vlgmr.msra.gmra.mrb[16].mxu0 %vm51_vm0, %v1632_v18  ;;  %v4324_v18 = vld [vmem:[%s5187_s5 + $0x18] sm:$0xff]  }
 0x85a   :  { %4117 = vmatprep.mubr.msk.bf16.mxu0 %vm4473_vm1, %v4472_v15 }
 0x92c   :  { %v1690_v25 = vpop.f32.mrb[16].mxu0 }
 0x92d   :  { %v1691_v26 = vadd.f32 %v1690_v25, %v1640_v24  ;;  %v4099_v27 = vpop.f32.mrb[17].mxu0 }
 0x92e   :  { %v1693_v28 = vpop.f32.mrb[18].mxu0 }
 0x92f   :  { %v1699_v29 = vmul.f32 0.044715, %v1691_v26  ;;  %v1694_v30 = vadd.f32 %v1693_v28, %v1640_v24  ;;  %v4100_v45 = vpop.f32.mrb[19].mxu0  ;;  %v1697_v50 = vmul.f32 0.5, %v1691_v26  ;;  %v1833_v28 = vsub.s32 7, %v4597_v35 }
 0x931   :  { %v1701_v33 = vmul.f32 %v1699_v29, %v1691_v26  ;;  %v1700_v34 = vmul.f32 0.044715, %v1694_v30  ;;  %v1698_v51 = vmul.f32 0.5, %v1694_v30 }
 0x933   :  { %v1703_v38 = vmul.f32 %v1701_v33, %v1691_v26  ;;  %v1702_v39 = vmul.f32 %v1700_v34, %v1694_v30 }
 0x935   :  { %v1705_v41 = vadd.f32 %v1703_v38, %v1691_v26  ;;  %v1704_v42 = vmul.f32 %v1702_v39, %v1694_v30  ;;  %v1827_v26 = vsub.s32 6, %v4597_v35  ;;  %v1834_v38 = vrot.slane %v4605_v37, %v1833_v28  ;;  %v4338_v35 = vld [vmem:[%s5192_s10 + $0x28] sm:$0xff]  }
 0x937   :  { %v1707_v43 = vmul.f32 0.7978846, %v1705_v41  ;;  %v1706_v44 = vadd.f32 %v1704_v42, %v1694_v30  ;;  %v1828_v27 = vrot.slane %v4605_v37, %v1827_v26 }
 0x939   :  { %4381 = vtanh.f32 %v1707_v43  ;;  %v1708_v46 = vmul.f32 0.7978846, %v1706_v44  ;;  %v4883_v44 = vld [vmem:[%s5191_s9 + $0x8] sm:$0xff]  ;;  %s3877_s9 = sld [smem:[#allocation4 + $0x2]] }
 0x93a   :  { %v1904_v37 = vrot.slane %v4883_v44, %v4600_v36 }
 0x93b   :  { %4383 = vtanh.f32 %v1708_v46 }
 0x943   :  { %v4382_v47 = vpop.eup %4381 }
 0x944   :  { %v1711_v48 = vadd.f32 1.0, %v4382_v47 }
 0x945   :  { %v4384_v49 = vpop.eup %4383 }
 0x946   :  { %v1712_v52 = vadd.f32 1.0, %v4384_v49  ;;  %v1713_v53 = vmul.f32 %v1711_v48, %v1697_v50 }
 0x948   :  { %v1714_v54 = vmul.f32 %v1712_v52, %v1698_v51 }
 0x94a   :  { %v1715_v55 = vpack.c.bf16 %v1714_v54, %v1713_v53 }
 0x94c   :  { %4110 = vmatmul.mubr.msk.bf16.vlgmr.msra.gmra.mrb[24].mxu1 %vm1752_vm5, %v1715_v55 }
 0x94d   :  { %4133 = vmatprep.mubr.msk.f32.mxu1 %vm4473_vm1, %v4472_v15 }
 0xa1f   :  { %v1790_v58 = vpop.f32.mrb[24].mxu1 }
 0xa20   :  { %v1791_v59 = vadd.f32 %v1790_v58, %v1727_v57  ;;  %v4111_v31 = vpop.f32.mrb[25].mxu1 }
 0xa21   :  { %v1793_v32 = vpop.f32.mrb[26].mxu1 }
 0xa22   :  { %v1794_v60 = vadd.f32 %v1793_v32, %v1727_v57  ;;  %v4112_v61 = vpop.f32.mrb[27].mxu1  ;;  %v1797_v63 = vadd.f32 %v1791_v59, %v1630_v16 }
 0xa24   :  { %v1799_v0 = vsel %vm51_vm0, %v1797_v63, 0.0  ;;  %v1798_v1 = vadd.f32 %v1794_v60, %v1631_v17  ;;  %v4323_v17 = vld [vmem:[%s5187_s5 + $0x10] sm:$0xff]   ;;  %s4445_s5 = scalar_lea.vmem %s3758_s29, 32 }
 0xa25   :  { %1800 = vadd.xlane.f32.xlu1 %v1799_v0  ;;  %4114 = vmatpush3.bf16.msra.mxu0 %v4323_v17  ;;  %p4446_p5 = scmp.ne.s32.totalorder %s3758_s29, %s4445_s5  ;;  %p4451_p7 = scmp.lt.s32.totalorder %s4445_s5, %s4445_s5 }
 0xa26   :  { %v1802_v2 = vsel %vm51_vm0, %v1798_v1, 0.0  ;;  %4115 = vmatprep.subr.bf16.mxu0 %v4472_v15 }
 0xa27   :  { %1803 = vadd.xlane.f32.xlu0 %v1802_v2  ;;  %p4452_p8 = por %p4451_p7, %p4450_p6 }
 0xa29   :  { %4116 = vmatpush3.bf16.msra.mxu0 %v4324_v18  ;;  %p4453_p9 = pnand %p4452_p8, %p4446_p5 }
 0xa2a   :  { %4121 = vmatprep.subr.mxu0 %v4472_v15 }
 0xab2   :  { %v1801_v3 = vpop.xlane.xlu1 %1800 }
 0xab3   :  { %v1805_v5 = vmul.f32 0.03125, %v1801_v3 }
 0xab4   :  { %v1804_v6 = vpop.xlane.xlu0 %1803 }
 0xab5   :  { %v1807_v40 = vsub.f32 %v1797_v63, %v1805_v5  ;;  %v1806_v10 = vmul.f32 0.03125, %v1804_v6 }
 0xab7   :  { %v1808_v9 = vsub.f32 %v1798_v1, %v1806_v10  ;;  %v1809_v11 = vmul.f32 %v1807_v40, %v1807_v40 }
 0xab9   :  { %v1811_v12 = vsel %vm51_vm0, %v1809_v11, 0.0  ;;  %v1810_v14 = vmul.f32 %v1808_v9, %v1808_v9 }
 0xaba   :  { %1812 = vadd.xlane.f32.xlu1 %v1811_v12 }
 0xabb   :  { %v1814_v16 = vsel %vm51_vm0, %v1810_v14, 0.0 }
 0xabc   :  { %1815 = vadd.xlane.f32.xlu0 %v1814_v16 }
 0xb47   :  { %v1813_v19 = vpop.xlane.xlu1 %1812 }
 0xb48   :  { %v1817_v20 = vmul.f32 0.03125, %v1813_v19 }
 0xb49   :  { %v1816_v21 = vpop.xlane.xlu0 %1815 }
 0xb4a   :  { %v1819_v22 = vadd.f32 1e-12, %v1817_v20  ;;  %v1818_v24 = vmul.f32 0.03125, %v1816_v21 }
 0xb4c   :  { %4385 = vrsqrt.f32 %v1819_v22  ;;  %v1820_v25 = vadd.f32 1e-12, %v1818_v24 }
 0xb4e   :  { %4387 = vrsqrt.f32 %v1820_v25 }
 0xb56   :  { %v4386_v29 = vpop.eup %4385 }
 0xb57   :  { %v1823_v30 = vmul.f32 %v4386_v29, %v1807_v40 }
 0xb58   :  { %v4388_v45 = vpop.eup %4387 }
 0xb59   :  { %v1829_v33 = vmul.f32 %v1828_v27, %v1823_v30  ;;  %v1824_v34 = vmul.f32 %v4388_v45, %v1808_v9 }
 0xb5b   :  { %v1830_v39 = vmul.f32 %v1828_v27, %v1824_v34  ;;  %v4871_v41 = vadd.f32 %v1834_v38, %v1829_v33 }
 0xb5d   :  { %v4873_v42 = vadd.f32 %v1834_v38, %v1830_v39 }
 0xb5f   :  { %v1839_v43 = vpack.c.bf16 %v4873_v42, %v4871_v41 }
 0xb61   :  { %4118 = vmatmul.mubr.msk.bf16.vlgmr.msra.gmra.mrb[20].mxu0 %vm51_vm0, %v1839_v43 }
 0xb62   :  { %4123 = vmatprep.mubr.msk.f32.mxu0 %vm4473_vm1, %v4472_v15 }
 0xc34   :  { %v1894_v46 = vpop.f32.mrb[20].mxu0 }
 0xc35   :  { %v4887_v47 = vadd.f32 %v1904_v37, %v1894_v46  ;;  %v4119_v48 = vpop.f32.mrb[21].mxu0 }
 0xc36   :  { %v1897_v49 = vpop.f32.mrb[22].mxu0 }
 0xc37   :  { %2076 = vrot.lane.b32.xlu0 %v4887_v47, %s4474_s18  ;;  %1910 = vrot.lane.b32.xlu1 %v4887_v47, %s4475_s19  ;;  %v4120_v50 = vpop.f32.mrb[23].mxu0  ;;  %v4897_v51 = vadd.f32 %v1904_v37, %v1897_v49  ;;  %v1907_v36 = vmul.f32 0.35355338, %v4887_v47 }
 0xc39   :  { %v1908_v52 = vmul.f32 0.35355338, %v4897_v51 }
 0xc3b   :  { %2406 = vrot.lane.b32.xlu0 %v4887_v47, %s4480_s24  ;;  %2241 = vrot.lane.b32.xlu1 %v4887_v47, %s4479_s23 }
 0xc3f   :  { %2074 = vrot.lane.b32.xlu1 %v1907_v36, %s4477_s21  ;;  %2585 = vrot.lane.b32.xlu0 %v4897_v51, %s4475_s19 }
 0xc43   :  { %2239 = vrot.lane.b32.xlu1 %v1907_v36, %s4476_s20  ;;  %2749 = vrot.lane.b32.xlu0 %v1908_v52, %s4477_s21  ;;  %s3881_s21 = sld [smem:[#allocation4 + $0x81]] }
 0xc47   :  { %2404 = vrot.lane.b32.xlu1 %v1907_v36, %s4478_s22  ;;  %2914 = vrot.lane.b32.xlu0 %v1908_v52, %s4476_s20  ;;  %s3876_s20 = sld [smem:[#allocation4 + $0x1]] }
 0xc49   :  { %s3771_s13 = scalar_lea.vmem [#allocation2], %s3881_s21 }
 0xc4b   :  { %2751 = vrot.lane.b32.xlu1 %v4897_v51, %s4474_s18  ;;  %3079 = vrot.lane.b32.xlu0 %v1908_v52, %s4478_s22  ;;  %s3883_s18 = sld [smem:[#allocation4 + $0x82]]  ;;  %s3885_s22 = sld [smem:[#allocation4 + $0x83]] }
 0xc4f   :  { %2916 = vrot.lane.b32.xlu1 %v4897_v51, %s4479_s23 }
 0xc51   :  { %s3775_s17 = scalar_lea.vmem [#allocation2], %s3885_s22 }
 0xc53   :  { %3081 = vrot.lane.b32.xlu1 %v4897_v51, %s4480_s24 }
 0xca9   :  { %v2077_v53 = vpop.permute.xlu0 %2076  ;;  %v1911_v54 = vpop.permute.xlu1 %1910 }
 0xcaa   :  { %4122 = vmatpush3.xpose.msk.msra.mxu0 %vm177_vm2, %v1911_v54  ;;  %4132 = vmatpush3.xpose.msk.msra.mxu1 %vm177_vm2, %v2077_v53 }
 0xcab   :  { %4141 = vmatprep.subr.mxu1 %v4472_v15  ;;  %4126 = vmatprep.subr.mxu0 %v4472_v15 }
 0xcad   :  { %v2242_v55 = vpop.permute.xlu1 %2241  ;;  %4124 = vmatmul.mubr.msk.f32.vlgmr.msra.gmra.mrb[24].mxu0 %vm177_vm2, %v1907_v36  ;;  %v2407_v57 = vpop.permute.xlu0 %2406 }
 0xcae   :  { %4128 = vmatprep.mubr.msk.f32.mxu0 %vm4473_vm1, %v4472_v15 }
 0xcb1   :  { %v2075_v58 = vpop.permute.xlu1 %2074  ;;  %v2586_v31 = vpop.permute.xlu0 %2585 }
 0xcb2   :  { %4134 = vmatmul.mubr.msk.f32.vlgmr.msra.gmra.mrb[28].mxu1 %vm177_vm2, %v2075_v58 }
 0xcb3   :  { %4142 = vmatpush3.xpose.msk.msra.mxu1 %vm177_vm2, %v2242_v55  ;;  %4143 = vmatprep.mubr.msk.f32.mxu1 %vm4473_vm1, %v4472_v15 }
 0xcb4   :  { %4151 = vmatprep.subr.mxu1 %v4472_v15 }
 0xcb5   :  { %v2240_v59 = vpop.permute.xlu1 %2239  ;;  %v2750_v60 = vpop.permute.xlu0 %2749 }
 0xcb6   :  { %4144 = vmatmul.mubr.msk.f32.vlgmr.msra.gmra.mrb[30].mxu1 %vm177_vm2, %v2240_v59 }
 0xcb7   :  { %4152 = vmatpush3.xpose.msk.msra.mxu1 %vm177_vm2, %v2407_v57  ;;  %4153 = vmatprep.mubr.msk.f32.mxu1 %vm4473_vm1, %v4472_v15 }
 0xcb8   :  { %4161 = vmatprep.subr.mxu1 %v4472_v15 }
 0xcb9   :  { %v2405_v32 = vpop.permute.xlu1 %2404  ;;  %v2915_v0 = vpop.permute.xlu0 %2914 }
 0xcba   :  { %4154 = vmatmul.mubr.msk.f32.vlgmr.msra.gmra.mrb[32].mxu1 %vm177_vm2, %v2405_v32 }
 0xcbb   :  { %4162 = vmatpush3.xpose.msk.msra.mxu1 %vm177_vm2, %v2586_v31  ;;  %4163 = vmatprep.mubr.msk.f32.mxu1 %vm4473_vm1, %v4472_v15 }
 0xcbc   :  { %4171 = vmatprep.subr.mxu1 %v4472_v15 }
 0xcbd   :  { %v2752_v61 = vpop.permute.xlu1 %2751  ;;  %v3080_v2 = vpop.permute.xlu0 %3079 }
 0xcbe   :  { %4164 = vmatmul.mubr.msk.f32.vlgmr.msra.gmra.mrb[34].mxu1 %vm177_vm2, %v1908_v52 }
 0xcbf   :  { %4172 = vmatpush3.xpose.msk.msra.mxu1 %vm177_vm2, %v2752_v61  ;;  %4173 = vmatprep.mubr.msk.f32.mxu1 %vm4473_vm1, %v4472_v15 }
 0xcc0   :  { %4181 = vmatprep.subr.mxu1 %v4472_v15 }
 0xcc1   :  { %v2917_v63 = vpop.permute.xlu1 %2916 }
 0xcc2   :  { %4174 = vmatmul.mubr.msk.f32.vlgmr.msra.gmra.mrb[36].mxu1 %vm177_vm2, %v2750_v60 }
 0xcc3   :  { %4182 = vmatpush3.xpose.msk.msra.mxu1 %vm177_vm2, %v2917_v63  ;;  %4183 = vmatprep.mubr.msk.f32.mxu1 %vm4473_vm1, %v4472_v15 }
 0xcc4   :  { %4191 = vmatprep.subr.mxu1 %v4472_v15 }
 0xcc5   :  { %v3082_v1 = vpop.permute.xlu1 %3081 }
 0xcc6   :  { %4184 = vmatmul.mubr.msk.f32.vlgmr.msra.gmra.mrb[38].mxu1 %vm177_vm2, %v2915_v0 }
 0xcc7   :  { %4192 = vmatpush3.xpose.msk.msra.mxu1 %vm177_vm2, %v3082_v1  ;;  %4193 = vmatprep.mubr.msk.f32.mxu1 %vm4473_vm1, %v4472_v15 }
 0xcc8   :  { %4201 = vmatprep.subr.bf16.mxu1 %v4472_v15 }
 0xcca   :  { %4194 = vmatmul.mubr.msk.f32.vlgmr.msra.gmra.mrb[40].mxu1 %vm177_vm2, %v3080_v2 }
 0xccb   :  { %4205 = vmatprep.mubr.msk.bf16.mxu1 %vm4473_vm1, %v4472_v15 }
 0xd80   :  { %v1983_v3 = vpop.f32.mrb[24].mxu0 }
 0xd81   :  { %v1984_v5 = vadd.f32 %v1983_v3, %v4681_v62  ;;  %v4125_v6 = vpop.f32.mrb[25].mxu0 }
 0xd83   :  { %v1987_v40 = vsel %vm177_vm2, %v1984_v5, -inf }
 0xd84   :  { %1988 = vmax.xlane.f32.xlu1 %v1987_v40 }
 0xd85   :  { %v2148_v10 = vpop.f32.mrb[28].mxu1 }
 0xd86   :  { %v2149_v9 = vadd.f32 %v2148_v10, %v4681_v62  ;;  %v4135_v11 = vpop.f32.mrb[29].mxu1 }
 0xd88   :  { %v2152_v12 = vsel %vm177_vm2, %v2149_v9, -inf }
 0xd89   :  { %2153 = vmax.xlane.f32.xlu0 %v2152_v12  ;;  %v2313_v14 = vpop.f32.mrb[30].mxu1 }
 0xd8a   :  { %v2314_v16 = vadd.f32 %v2313_v14, %v4681_v62  ;;  %v4145_v17 = vpop.f32.mrb[31].mxu1 }
 0xd8c   :  { %v2317_v18 = vsel %vm177_vm2, %v2314_v16, -inf }
 0xd8d   :  { %2318 = vmax.xlane.f32.xlu0 %v2317_v18  ;;  %v2478_v19 = vpop.f32.mrb[32].mxu1 }
 0xd8e   :  { %v2479_v20 = vadd.f32 %v2478_v19, %v4681_v62  ;;  %v4155_v21 = vpop.f32.mrb[33].mxu1 }
 0xd90   :  { %v2482_v22 = vsel %vm177_vm2, %v2479_v20, -inf }
 0xd91   :  { %2483 = vmax.xlane.f32.xlu0 %v2482_v22  ;;  %v2658_v24 = vpop.f32.mrb[34].mxu1 }
 0xd92   :  { %v2659_v25 = vadd.f32 %v2658_v24, %v4696_v13  ;;  %v4165_v27 = vpop.f32.mrb[35].mxu1 }
 0xd94   :  { %v2662_v29 = vsel %vm177_vm2, %v2659_v25, -inf }
 0xd95   :  { %2663 = vmax.xlane.f32.xlu1 %v2662_v29  ;;  %v2823_v30 = vpop.f32.mrb[36].mxu1 }
 0xd96   :  { %v2824_v45 = vadd.f32 %v2823_v30, %v4696_v13  ;;  %v4175_v33 = vpop.f32.mrb[37].mxu1 }
 0xd98   :  { %v2827_v34 = vsel %vm177_vm2, %v2824_v45, -inf }
 0xd99   :  { %2828 = vmax.xlane.f32.xlu0 %v2827_v34  ;;  %v2988_v38 = vpop.f32.mrb[38].mxu1 }
 0xd9a   :  { %v2989_v62 = vadd.f32 %v2988_v38, %v4696_v13  ;;  %v4185_v39 = vpop.f32.mrb[39].mxu1 }
 0xd9c   :  { %v2992_v43 = vsel %vm177_vm2, %v2989_v62, -inf }
 0xd9d   :  { %2993 = vmax.xlane.f32.xlu1 %v2992_v43  ;;  %v3153_v37 = vpop.f32.mrb[40].mxu1 }
 0xd9e   :  { %v3154_v46 = vadd.f32 %v3153_v37, %v4696_v13  ;;  %v4195_v48 = vpop.f32.mrb[41].mxu1 }
 0xda0   :  { %v3157_v49 = vsel %vm177_vm2, %v3154_v46, -inf }
 0xda1   :  { %3158 = vmax.xlane.f32.xlu0 %v3157_v49 }
 0xdae   :  { %2163 = vrot.lane.b32.xlu1 %v4887_v47, %s4484_s0 }
 0xdb2   :  { %2328 = vrot.lane.b32.xlu1 %v4887_v47, %s4482_s27 }
 0xdb7   :  { %1998 = vrot.lane.b32.xlu0 %v4887_v47, %s4481_s2 }
 0xe11   :  { %v1989_v50 = vpop.xlane.xlu1 %1988 }
 0xe12   :  { %v1990_v36 = vsub.f32 %v1984_v5, %v1989_v50 }
 0xe14   :  { %v1991_v52 = vmul.f32 1.442695, %v1990_v36 }
 0xe16   :  { %4389 = vpow2.f32 %v1991_v52  ;;  %v2154_v53 = vpop.xlane.xlu0 %2153 }
 0xe17   :  { %v2155_v54 = vsub.f32 %v2149_v9, %v2154_v53 }
 0xe19   :  { %v2156_v13 = vmul.f32 1.442695, %v2155_v54 }
 0xe1a   :  { %v2319_v57 = vpop.xlane.xlu0 %2318 }
 0xe1b   :  { %4391 = vpow2.f32 %v2156_v13  ;;  %v2320_v0 = vsub.f32 %v2314_v16, %v2319_v57 }
 0xe1d   :  { %v2321_v2 = vmul.f32 1.442695, %v2320_v0 }
 0xe1e   :  { %v2484_v31 = vpop.xlane.xlu0 %2483 }
 0xe1f   :  { %v2485_v5 = vsub.f32 %v2479_v20, %v2484_v31  ;;  %4393 = vpow2.f32 %v2321_v2 }
 0xe20   :  { %v4977_v55 = vpop.eup %4389 }
 0xe21   :  { %v1993_v58 = vsel %vm177_vm2, %v4977_v55, 0.0  ;;  %v2486_v9 = vmul.f32 1.442695, %v2485_v5 }
 0xe22   :  { %1994 = vadd.xlane.f32.xlu1 %v1993_v58  ;;  %v2664_v1 = vpop.xlane.xlu1 %2663 }
 0xe23   :  { %v2665_v3 = vsub.f32 %v2659_v25, %v2664_v1 }
 0xe25   :  { %v4981_v59 = vpop.eup %4391  ;;  %v2666_v40 = vmul.f32 1.442695, %v2665_v3 }
 0xe26   :  { %v2158_v32 = vsel %vm177_vm2, %v4981_v59, 0.0  ;;  %v2829_v60 = vpop.xlane.xlu0 %2828 }
 0xe27   :  { %2159 = vadd.xlane.f32.xlu0 %v2158_v32  ;;  %v2830_v11 = vsub.f32 %v2824_v45, %v2829_v60  ;;  %4395 = vpow2.f32 %v2666_v40 }
 0xe28   :  { %4397 = vpow2.f32 %v2486_v9 }
 0xe29   :  { %v2831_v17 = vmul.f32 1.442695, %v2830_v11 }
 0xe2a   :  { %v2994_v6 = vpop.xlane.xlu1 %2993 }
 0xe2b   :  { %v2995_v10 = vsub.f32 %v2989_v62, %v2994_v6 }
 0xe2d   :  { %v2996_v12 = vmul.f32 1.442695, %v2995_v10 }
 0xe2e   :  { %v3159_v61 = vpop.xlane.xlu0 %3158  ;;  %v2164_v33 = vpop.permute.xlu1 %2163 }
 0xe2f   :  { %v3160_v14 = vsub.f32 %v3154_v46, %v3159_v61  ;;  %4399 = vpow2.f32 %v2996_v12 }
 0xe30   :  { %4401 = vpow2.f32 %v2831_v17 }
 0xe31   :  { %v3161_v18 = vmul.f32 1.442695, %v3160_v14 }
 0xe32   :  { %v1999_v63 = vpop.permute.xlu0 %1998  ;;  %v2329_v34 = vpop.permute.xlu1 %2328 }
 0xe33   :  { %2673 = vrot.lane.b32.xlu1 %v4897_v51, %s4481_s2  ;;  %4127 = vmatpush3.msra.mxu0 %v1999_v63  ;;  %4403 = vpow2.f32 %v3161_v18  ;;  %v4325_v18 = vld [vmem:[%s5188_s6 + $0x10] sm:$0xff]  }
 0xe34   :  { %4136 = vmatprep.subr.mxu0 %v4472_v15  ;;  %4202 = vmatpush3.bf16.msra.mxu1 %v4325_v18 }
 0xe35   :  { %4203 = vmatprep.subr.bf16.mxu1 %v4472_v15 }
 0xe3d   :  { %2493 = vrot.lane.b32.xlu0 %v4887_v47, %s4483_s28  ;;  %v4394_v47 = vpop.eup %4393 }
 0xe3e   :  { %v2323_v16 = vsel %vm177_vm2, %v4394_v47, 0.0  ;;  %v4991_v19 = vpop.eup %4395 }
 0xe3f   :  { %v4398_v20 = vpop.eup %4397  ;;  %v2668_v21 = vsel %vm177_vm2, %v4991_v19, 0.0 }
 0xe40   :  { %v4995_v22 = vpop.eup %4399  ;;  %v2488_v24 = vsel %vm177_vm2, %v4398_v20, 0.0 }
 0xe41   :  { %v4998_v25 = vpop.eup %4401  ;;  %v2998_v27 = vsel %vm177_vm2, %v4995_v22, 0.0 }
 0xe42   :  { %v5002_v29 = vpop.eup %4403  ;;  %v2833_v30 = vsel %vm177_vm2, %v4998_v25, 0.0 }
 0xe43   :  { %v3163_v45 = vsel %vm177_vm2, %v5002_v29, 0.0 }
 0xe57   :  { %2324 = vadd.xlane.f32.xlu1 %v2323_v16 }
 0xe5b   :  { %2669 = vadd.xlane.f32.xlu1 %v2668_v21 }
 0xe5c   :  { %2489 = vadd.xlane.f32.xlu0 %v2488_v24 }
 0xe5f   :  { %2999 = vadd.xlane.f32.xlu1 %v2998_v27 }
 0xe60   :  { %2834 = vadd.xlane.f32.xlu0 %v2833_v30 }
 0xe63   :  { %3164 = vadd.xlane.f32.xlu1 %v3163_v45 }
 0xe74   :  { %3003 = vrot.lane.b32.xlu1 %v4897_v51, %s4482_s27 }
 0xe76   :  { %2838 = vrot.lane.b32.xlu0 %v4897_v51, %s4484_s0 }
 0xe7a   :  { %3168 = vrot.lane.b32.xlu0 %v4897_v51, %s4483_s28 }
 0xeaf   :  { %v1995_v38 = vpop.xlane.xlu1 %1994 }
 0xeb0   :  { %4405 = vrcp.f32 %v1995_v38 }
 0xeb3   :  { %v2674_v46 = vpop.permute.xlu1 %2673 }
 0xeb4   :  { %v2160_v62 = vpop.xlane.xlu0 %2159 }
 0xeb5   :  { %4407 = vrcp.f32 %v2160_v62 }
 0xeb8   :  { %v2494_v49 = vpop.permute.xlu0 %2493 }
 0xeba   :  { %v4406_v39 = vpop.eup %4405 }
 0xebb   :  { %v1997_v43 = vmul.f32 %v4406_v39, %v4977_v55 }
 0xebd   :  { %4129 = vmatmul.mubr.msk.f32.vlgmr.msra.gmra.mrb[26].mxu0 %vm177_vm2, %v1997_v43 }
 0xebe   :  { %4137 = vmatpush3.msra.mxu0 %v2164_v33  ;;  %4138 = vmatprep.mubr.msk.f32.mxu0 %vm4473_vm1, %v4472_v15 }
 0xebf   :  { %v4408_v37 = vpop.eup %4407  ;;  %4146 = vmatprep.subr.mxu0 %v4472_v15 }
 0xec0   :  { %v2162_v51 = vmul.f32 %v4408_v37, %v4981_v59 }
 0xec2   :  { %4139 = vmatmul.mubr.msk.f32.vlgmr.msra.gmra.mrb[28].mxu0 %vm177_vm2, %v2162_v51 }
 0xec3   :  { %4147 = vmatpush3.msra.mxu0 %v2329_v34  ;;  %4148 = vmatprep.mubr.msk.f32.mxu0 %vm4473_vm1, %v4472_v15 }
 0xec4   :  { %4156 = vmatprep.subr.mxu0 %v4472_v15 }
 0xee4   :  { %v2325_v48 = vpop.xlane.xlu1 %2324 }
 0xee5   :  { %4409 = vrcp.f32 %v2325_v48 }
 0xee8   :  { %v2670_v50 = vpop.xlane.xlu1 %2669 }
 0xee9   :  { %v2490_v36 = vpop.xlane.xlu0 %2489 }
 0xeea   :  { %4411 = vrcp.f32 %v2490_v36 }
 0xeeb   :  { %4413 = vrcp.f32 %v2670_v50 }
 0xeec   :  { %v3000_v54 = vpop.xlane.xlu1 %2999 }
 0xeed   :  { %v2835_v52 = vpop.xlane.xlu0 %2834 }
 0xeee   :  { %4415 = vrcp.f32 %v2835_v52 }
 0xeef   :  { %v4410_v53 = vpop.eup %4409  ;;  %4417 = vrcp.f32 %v3000_v54 }
 0xef0   :  { %v2327_v13 = vmul.f32 %v4410_v53, %v4394_v47  ;;  %v3165_v58 = vpop.xlane.xlu1 %3164 }
 0xef1   :  { %4419 = vrcp.f32 %v3165_v58  ;;  %v2839_v60 = vpop.permute.xlu0 %2838 }
 0xef2   :  { %4149 = vmatmul.mubr.msk.f32.vlgmr.msra.gmra.mrb[30].mxu0 %vm177_vm2, %v2327_v13  ;;  %v3268_v13 = vrot.slane %v4883_v44, %v4688_v8 }
 0xef3   :  { %4157 = vmatpush3.msra.mxu0 %v2494_v49  ;;  %4158 = vmatprep.mubr.msk.f32.mxu0 %vm4473_vm1, %v4472_v15 }
 0xef4   :  { %v4412_v55 = vpop.eup %4411  ;;  %4166 = vmatprep.subr.mxu0 %v4472_v15  ;;  %v3004_v0 = vpop.permute.xlu1 %3003 }
 0xef5   :  { %v2492_v57 = vmul.f32 %v4412_v55, %v4398_v20  ;;  %v4414_v59 = vpop.eup %4413  ;;  %v3169_v3 = vpop.permute.xlu0 %3168 }
 0xef6   :  { %v2672_v31 = vmul.f32 %v4414_v59, %v4991_v19  ;;  %v4326_v19 = vld [vmem:[%s5188_s6 + $0x18] sm:$0xff]   ;;  %s3878_s6 = sld [smem:[#allocation4 + $0x3]] }
 0xef7   :  { %4159 = vmatmul.mubr.msk.f32.vlgmr.msra.gmra.mrb[32].mxu0 %vm177_vm2, %v2492_v57  ;;  %4204 = vmatpush3.bf16.msra.mxu1 %v4326_v19 }
 0xef8   :  { %4167 = vmatpush3.msra.mxu0 %v2674_v46  ;;  %4168 = vmatprep.mubr.msk.f32.mxu0 %vm4473_vm1, %v4472_v15  ;;  %v4416_v32 = vpop.eup %4415 }
 0xef9   :  { %4176 = vmatprep.subr.mxu0 %v4472_v15  ;;  %v2837_v61 = vmul.f32 %v4416_v32, %v4998_v25  ;;  %v4418_v63 = vpop.eup %4417  ;;  %4217 = vmatprep.subr.bf16.mxu1 %v4472_v15 }
 0xefa   :  { %v3002_v1 = vmul.f32 %v4418_v63, %v4995_v22 }
 0xefb   :  { %4169 = vmatmul.mubr.msk.f32.vlgmr.msra.gmra.mrb[34].mxu0 %vm177_vm2, %v2672_v31  ;;  %v4420_v2 = vpop.eup %4419 }
 0xefc   :  { %4177 = vmatpush3.msra.mxu0 %v2839_v60  ;;  %4178 = vmatprep.mubr.msk.f32.mxu0 %vm4473_vm1, %v4472_v15  ;;  %v3167_v5 = vmul.f32 %v4420_v2, %v5002_v29 }
 0xefd   :  { %4186 = vmatprep.subr.mxu0 %v4472_v15 }
 0xeff   :  { %4179 = vmatmul.mubr.msk.f32.vlgmr.msra.gmra.mrb[36].mxu0 %vm177_vm2, %v2837_v61 }
 0xf00   :  { %4187 = vmatpush3.msra.mxu0 %v3004_v0  ;;  %4188 = vmatprep.mubr.msk.f32.mxu0 %vm4473_vm1, %v4472_v15 }
 0xf01   :  { %4196 = vmatprep.subr.mxu0 %v4472_v15 }
 0xf03   :  { %4189 = vmatmul.mubr.msk.f32.vlgmr.msra.gmra.mrb[38].mxu0 %vm177_vm2, %v3002_v1 }
 0xf04   :  { %4197 = vmatpush3.msra.mxu0 %v3169_v3  ;;  %4198 = vmatprep.mubr.msk.f32.mxu0 %vm4473_vm1, %v4472_v15 }
 0xf05   :  { %4209 = vmatprep.subr.bf16.mxu0 %v4472_v15 }
 0xf07   :  { %4199 = vmatmul.mubr.msk.f32.vlgmr.msra.gmra.mrb[40].mxu0 %vm177_vm2, %v3167_v5 }
 0xf08   :  { %4213 = vmatprep.mubr.msk.bf16.mxu0 %vm4473_vm1, %v4472_v15 }
 0xf90   :  { %v2070_v6 = vpop.f32.mrb[26].mxu0 }
 0xf91   :  { %v4130_v40 = vpop.f32.mrb[27].mxu0 }
 0xf95   :  { %v2235_v10 = vpop.f32.mrb[28].mxu0 }
 0xf96   :  { %v4140_v9 = vpop.f32.mrb[29].mxu0 }
 0xfc5   :  { %v2400_v11 = vpop.f32.mrb[30].mxu0 }
 0xfc6   :  { %v4150_v12 = vpop.f32.mrb[31].mxu0 }
 0xfca   :  { %v2565_v14 = vpop.f32.mrb[32].mxu0 }
 0xfcb   :  { %v4160_v17 = vpop.f32.mrb[33].mxu0 }
 0xfce   :  { %v2745_v47 = vpop.f32.mrb[34].mxu0 }
 0xfcf   :  { %v4170_v16 = vpop.f32.mrb[35].mxu0 }
 0xfd2   :  { %v2910_v20 = vpop.f32.mrb[36].mxu0 }
 0xfd3   :  { %v4283_v21 = vpack.i.bf16 %v2910_v20, %v2235_v10  ;;  %v4180_v22 = vpop.f32.mrb[37].mxu0  ;;  %v3356_v20 = vrot.slane %v4883_v44, %v1622_v4  ;;  %v4329_v4 = vld [vmem:[%s5190_s8 + $0x20] sm:$0xff]  }
 0xfd5   :  { %4284 = vrot.lane.b32.xlu1 %v4283_v21, %s4485_s14  ;;  %s3580_s14 = scalar_lea.vmem [#allocation2], %s3877_s9 }
 0xfd6   :  { %v3075_v24 = vpop.f32.mrb[38].mxu0 }
 0xfd7   :  { %v4288_v25 = vpack.i.bf16 %v3075_v24, %v2400_v11  ;;  %v4190_v27 = vpop.f32.mrb[39].mxu0  ;;  %v4328_v11 = vld [vmem:[%s5189_s7 + $0x18] sm:$0xff]  }
 0xfd8   :  { %v3362_v27 = vrot.slane %v4883_v44, %v1628_v7  ;;  %v4331_v7 = vld [vmem:[%s5190_s8 + $0x30] sm:$0xff]  }
 0xfd9   :  { %4289 = vrot.lane.b32.xlu0 %v4288_v25, %s4486_s15  ;;  %s3773_s15 = scalar_lea.vmem [#allocation2], %s3883_s18 }
 0xfda   :  { %v3240_v29 = vpop.f32.mrb[40].mxu0 }
 0xfdb   :  { %v4293_v30 = vpack.i.bf16 %v3240_v29, %v2565_v14  ;;  %v4200_v45 = vpop.f32.mrb[41].mxu0 }
 0xfdd   :  { %4294 = vrot.lane.b32.xlu1 %v4293_v30, %s4487_s16  ;;  %s3577_s16 = scalar_lea.vmem [#allocation2], %s3876_s20 }
0x1047   :  { %v4285_v33 = vpop.permute.xlu1 %4284 }
0x1048   :  { %v4287_v38 = vunpack.i.h.bf16 %v4285_v33  ;;  %v4286_v62 = vunpack.i.l.bf16 %v4285_v33 }
0x104a   :  { %v3256_v51 = vsel %vm177_vm2, %v2745_v47, %v4287_v38  ;;  %v2581_v46 = vsel %vm177_vm2, %v2070_v6, %v4286_v62  ;;  %v4332_v38 = vld [vmem:[%s5190_s8 + $0x38] sm:$0xff]   ;;  %v3374_v62 = vrot.slane %v4883_v44, %v1639_v23 }
0x104b   :  { %v4290_v34 = vpop.permute.xlu0 %4289 }
0x104c   :  { %v4292_v39 = vunpack.i.h.bf16 %v4290_v34  ;;  %v4291_v43 = vunpack.i.l.bf16 %v4290_v34  ;;  %v4330_v34 = vld [vmem:[%s5190_s8 + $0x28] sm:$0xff]   ;;  %s3583_s8 = scalar_lea.vmem [#allocation2], %s3878_s6 }
0x104e   :  { %v3257_v50 = vsel %vm848_vm3, %v3256_v51, %v4292_v39  ;;  %v2582_v36 = vsel %vm848_vm3, %v2581_v46, %v4291_v43 }
0x104f   :  { %v4295_v37 = vpop.permute.xlu1 %4294 }
0x1050   :  { %v4297_v48 = vunpack.i.h.bf16 %v4295_v37  ;;  %v4296_v49 = vunpack.i.l.bf16 %v4295_v37 }
0x1052   :  { %v2583_v52 = vsel %vm850_vm4, %v2582_v36, %v4296_v49  ;;  %v3258_v53 = vsel %vm850_vm4, %v3257_v50, %v4297_v48 }
0x1053   :  { %v3259_v54 = vpack.c.bf16 %v3258_v53, %v2583_v52 }
0x1055   :  { %4206 = vmatmul.mubr.msk.bf16.vlgmr.msra.gmra.mrb[44].mxu1 %vm51_vm0, %v3259_v54 }
0x1056   :  { %4225 = vmatprep.mubr.msk.bf16.mxu1 %vm4473_vm1, %v4472_v15  ;;  %4218 = vmatpush3.bf16.msra.mxu1 %v4329_v4 }
0x1057   :  { %4219 = vmatprep.subr.bf16.mxu1 %v4472_v15 }
0x105a   :  { %4220 = vmatpush3.bf16.msra.mxu1 %v4330_v34 }
0x105b   :  { %4221 = vmatprep.subr.bf16.mxu1 %v4472_v15 }
0x105e   :  { %4222 = vmatpush3.bf16.msra.mxu1 %v4331_v7 }
0x105f   :  { %4223 = vmatprep.subr.bf16.mxu1 %v4472_v15 }
0x1062   :  { %4224 = vmatpush3.bf16.msra.mxu1 %v4332_v38  ;;  %v3562_v38 = vrot.slane %v4883_v44, %v1827_v26  ;;  %v4339_v26 = vld [vmem:[%s5192_s10 + $0x30] sm:$0xff]  }
0x1128   :  { %v3318_v55 = vpop.f32.mrb[44].mxu1 }
0x1129   :  { %v3319_v57 = vadd.f32 %v3318_v55, %v3268_v13  ;;  %v4207_v58 = vpop.f32.mrb[45].mxu1 }
0x112a   :  { %v3321_v59 = vpop.f32.mrb[46].mxu1 }
0x112b   :  { %v3322_v31 = vadd.f32 %v3321_v59, %v3268_v13  ;;  %v4208_v32 = vpop.f32.mrb[47].mxu1  ;;  %v3325_v60 = vadd.f32 %v3319_v57, %v4871_v41 }
0x112d   :  { %v3327_v61 = vsel %vm51_vm0, %v3325_v60, 0.0  ;;  %v3326_v63 = vadd.f32 %v3322_v31, %v4873_v42  ;;  %v4327_v42 = vld [vmem:[%s5189_s7 + $0x10] sm:$0xff]  }
0x112e   :  { %3328 = vadd.xlane.f32.xlu0 %v3327_v61  ;;  %4210 = vmatpush3.bf16.msra.mxu0 %v4327_v42 }
0x112f   :  { %v3330_v0 = vsel %vm51_vm0, %v3326_v63, 0.0  ;;  %4211 = vmatprep.subr.bf16.mxu0 %v4472_v15 }
0x1130   :  { %3331 = vadd.xlane.f32.xlu1 %v3330_v0 }
0x1132   :  { %4212 = vmatpush3.bf16.msra.mxu0 %v4328_v11 }
0x1133   :  { %4229 = vmatprep.subr.bf16.mxu0 %v4472_v15 }
0x11bb   :  { %v3329_v1 = vpop.xlane.xlu0 %3328 }
0x11bc   :  { %v3333_v2 = vmul.f32 0.03125, %v3329_v1 }
0x11bd   :  { %v3332_v3 = vpop.xlane.xlu1 %3331 }
0x11be   :  { %v3335_v8 = vsub.f32 %v3325_v60, %v3333_v2  ;;  %v3334_v5 = vmul.f32 0.03125, %v3332_v3  ;;  %v3462_v2 = vrot.slane %v4883_v44, %v1726_v56 }
0x11c0   :  { %v3336_v6 = vsub.f32 %v3326_v63, %v3334_v5  ;;  %v3337_v40 = vmul.f32 %v3335_v8, %v3335_v8 }
0x11c2   :  { %v3339_v10 = vsel %vm51_vm0, %v3337_v40, 0.0  ;;  %v3338_v9 = vmul.f32 %v3336_v6, %v3336_v6 }
0x11c3   :  { %3340 = vadd.xlane.f32.xlu0 %v3339_v10 }
0x11c4   :  { %v3342_v41 = vsel %vm51_vm0, %v3338_v9, 0.0 }
0x11c7   :  { %3343 = vadd.xlane.f32.xlu0 %v3342_v41 }
0x1250   :  { %v3341_v12 = vpop.xlane.xlu0 %3340 }
0x1251   :  { %v3345_v14 = vmul.f32 0.03125, %v3341_v12 }
0x1253   :  { %v3347_v17 = vadd.f32 1e-12, %v3345_v14 }
0x1254   :  { %v3344_v18 = vpop.xlane.xlu0 %3343 }
0x1255   :  { %4421 = vrsqrt.f32 %v3347_v17  ;;  %v3346_v47 = vmul.f32 0.03125, %v3344_v18 }
0x1257   :  { %v3348_v16 = vadd.f32 1e-12, %v3346_v47 }
0x1259   :  { %4423 = vrsqrt.f32 %v3348_v16 }
0x125f   :  { %v4422_v19 = vpop.eup %4421 }
0x1260   :  { %v3351_v21 = vmul.f32 %v4422_v19, %v3335_v8 }
0x1262   :  { %v3357_v24 = vmul.f32 %v3356_v20, %v3351_v21 }
0x1263   :  { %v4424_v22 = vpop.eup %4423 }
0x1264   :  { %v3352_v25 = vmul.f32 %v4424_v22, %v3336_v6  ;;  %v3363_v30 = vadd.f32 %v3362_v27, %v3357_v24  ;;  %v4333_v22 = vld [vmem:[%s5192_s10] sm:$0xff]   ;;  %v4334_v24 = vld [vmem:[%s5192_s10 + $0x8] sm:$0xff]  }
0x1266   :  { %v3358_v29 = vmul.f32 %v3356_v20, %v3352_v25  ;;  %v4335_v25 = vld [vmem:[%s5192_s10 + $0x10] sm:$0xff]  }
0x1268   :  { %v3364_v45 = vadd.f32 %v3362_v27, %v3358_v29  ;;  %v4336_v27 = vld [vmem:[%s5192_s10 + $0x18] sm:$0xff]   ;;  %v4337_v29 = vld [vmem:[%s5192_s10 + $0x20] sm:$0xff]  }
0x126a   :  { %v3365_v33 = vpack.c.bf16 %v3364_v45, %v3363_v30 }
0x126c   :  { %4214 = vmatmul.mubr.msk.bf16.vlgmr.msra.gmra.mrb[44].mxu0 %vm51_vm0, %v3365_v33 }
0x126d   :  { %4245 = vmatprep.mubr.msk.bf16.mxu0 %vm4473_vm1, %v4472_v15  ;;  %4230 = vmatpush3.bf16.msra.mxu0 %v4333_v22 }
0x126e   :  { %4231 = vmatprep.subr.bf16.mxu0 %v4472_v15 }
0x1271   :  { %4232 = vmatpush3.bf16.msra.mxu0 %v4334_v24 }
0x1272   :  { %4233 = vmatprep.subr.bf16.mxu0 %v4472_v15 }
0x1275   :  { %4234 = vmatpush3.bf16.msra.mxu0 %v4335_v25 }
0x1276   :  { %4235 = vmatprep.subr.bf16.mxu0 %v4472_v15 }
0x1279   :  { %4236 = vmatpush3.bf16.msra.mxu0 %v4336_v27 }
0x127a   :  { %4237 = vmatprep.subr.bf16.mxu0 %v4472_v15 }
0x127d   :  { %4238 = vmatpush3.bf16.msra.mxu0 %v4337_v29 }
0x127e   :  { %4239 = vmatprep.subr.bf16.mxu0 %v4472_v15 }
0x1281   :  { %4240 = vmatpush3.bf16.msra.mxu0 %v4338_v35 }
0x1282   :  { %4241 = vmatprep.subr.bf16.mxu0 %v4472_v15 }
0x1285   :  { %4242 = vmatpush3.bf16.msra.mxu0 %v4339_v26 }
0x1286   :  { %4243 = vmatprep.subr.bf16.mxu0 %v4472_v15 }
0x133f   :  { %v3424_v39 = vpop.f32.mrb[44].mxu0 }
0x1340   :  { %v3425_v43 = vadd.f32 %v3424_v39, %v3374_v62  ;;  %v4215_v37 = vpop.f32.mrb[45].mxu0  ;;  %v3568_v39 = vrot.slane %v4883_v44, %v1833_v28  ;;  %v4340_v28 = vld [vmem:[%s5192_s10 + $0x38] sm:$0xff]   ;;  %s3879_s10 = sld [smem:[#allocation4 + $0x80]] }
0x1341   :  { %v3427_v51 = vpop.f32.mrb[46].mxu0  ;;  %4244 = vmatpush3.bf16.msra.mxu0 %v4340_v28 }
0x1342   :  { %v3433_v46 = vmul.f32 0.044715, %v3425_v43  ;;  %v3428_v48 = vadd.f32 %v3427_v51, %v3374_v62  ;;  %v4216_v49 = vpop.f32.mrb[47].mxu0  ;;  %v3431_v32 = vmul.f32 0.5, %v3425_v43 }
0x1344   :  { %v3435_v50 = vmul.f32 %v3433_v46, %v3425_v43  ;;  %v3434_v36 = vmul.f32 0.044715, %v3428_v48  ;;  %v3432_v60 = vmul.f32 0.5, %v3428_v48 }
0x1346   :  { %v3437_v52 = vmul.f32 %v3435_v50, %v3425_v43  ;;  %v3436_v53 = vmul.f32 %v3434_v36, %v3428_v48  ;;  %s3769_s25 = scalar_lea.vmem [#allocation2], %s3879_s10 }
0x1348   :  { %v3439_v54 = vadd.f32 %v3437_v52, %v3425_v43  ;;  %v3438_v13 = vmul.f32 %v3436_v53, %v3428_v48 }
0x134a   :  { %v3441_v55 = vmul.f32 0.7978846, %v3439_v54  ;;  %v3440_v57 = vadd.f32 %v3438_v13, %v3428_v48 }
0x134c   :  { %4425 = vtanh.f32 %v3441_v55  ;;  %v3442_v58 = vmul.f32 0.7978846, %v3440_v57 }
0x134e   :  { %4427 = vtanh.f32 %v3442_v58 }
0x1356   :  { %v4426_v59 = vpop.eup %4425 }
0x1357   :  { %v3445_v23 = vadd.f32 1.0, %v4426_v59 }
0x1358   :  { %v4428_v31 = vpop.eup %4427 }
0x1359   :  { %v3446_v61 = vadd.f32 1.0, %v4428_v31  ;;  %v3447_v63 = vmul.f32 %v3445_v23, %v3431_v32 }
0x135b   :  { %v3448_v0 = vmul.f32 %v3446_v61, %v3432_v60 }
0x135d   :  { %v3449_v1 = vpack.c.bf16 %v3448_v0, %v3447_v63 }
0x135f   :  { %4226 = vmatmul.mubr.msk.bf16.vlgmr.msra.gmra.mrb[48].mxu1 %vm1752_vm5, %v3449_v1 }
0x1432   :  { %v3524_v3 = vpop.f32.mrb[48].mxu1 }
0x1433   :  { %v3525_v8 = vadd.f32 %v3524_v3, %v3462_v2  ;;  %v4227_v5 = vpop.f32.mrb[49].mxu1 }
0x1434   :  { %v3527_v6 = vpop.f32.mrb[50].mxu1 }
0x1435   :  { %v3531_v40 = vadd.f32 %v3525_v8, %v3363_v30  ;;  %v3528_v10 = vadd.f32 %v3527_v6, %v3462_v2  ;;  %v4228_v9 = vpop.f32.mrb[51].mxu1 }
0x1437   :  { %v3532_v41 = vadd.f32 %v3528_v10, %v3364_v45  ;;  %v3533_v42 = vsel %vm51_vm0, %v3531_v40, 0.0 }
0x1438   :  { %3534 = vadd.xlane.f32.xlu0 %v3533_v42 }
0x1439   :  { %v3536_v11 = vsel %vm51_vm0, %v3532_v41, 0.0 }
0x143a   :  { %3537 = vadd.xlane.f32.xlu1 %v3536_v11  ;;  %v3887_v11 = vld [vmem:[%s5193_s11] ss:$0 sm:$0xff] }
0x14c5   :  { %v3535_v12 = vpop.xlane.xlu0 %3534 }
0x14c6   :  { %v3539_v14 = vmul.f32 0.03125, %v3535_v12 }
0x14c7   :  { %v3538_v17 = vpop.xlane.xlu1 %3537 }
0x14c8   :  { %v3541_v18 = vsub.f32 %v3531_v40, %v3539_v14  ;;  %v3540_v47 = vmul.f32 0.03125, %v3538_v17 }
0x14ca   :  { %v3542_v56 = vsub.f32 %v3532_v41, %v3540_v47  ;;  %v3543_v16 = vmul.f32 %v3541_v18, %v3541_v18 }
0x14cc   :  { %v3545_v19 = vsel %vm51_vm0, %v3543_v16, 0.0  ;;  %v3544_v20 = vmul.f32 %v3542_v56, %v3542_v56 }
0x14cd   :  { %3546 = vadd.xlane.f32.xlu0 %v3545_v19 }
0x14ce   :  { %v3548_v21 = vsel %vm51_vm0, %v3544_v20, 0.0 }
0x14cf   :  { %3549 = vadd.xlane.f32.xlu1 %v3548_v21 }
0x155a   :  { %v3547_v30 = vpop.xlane.xlu0 %3546 }
0x155b   :  { %v3551_v45 = vmul.f32 0.03125, %v3547_v30 }
0x155c   :  { %v3550_v33 = vpop.xlane.xlu1 %3549 }
0x155d   :  { %v3553_v4 = vadd.f32 1e-12, %v3551_v45  ;;  %v3552_v34 = vmul.f32 0.03125, %v3550_v33 }
0x155f   :  { %4429 = vrsqrt.f32 %v3553_v4  ;;  %v3554_v7 = vadd.f32 1e-12, %v3552_v34 }
0x1561   :  { %4431 = vrsqrt.f32 %v3554_v7 }
0x1569   :  { %v4430_v62 = vpop.eup %4429 }
0x156a   :  { %v3557_v43 = vmul.f32 %v4430_v62, %v3541_v18 }
0x156b   :  { %v4432_v37 = vpop.eup %4431 }
0x156c   :  { %v3563_v51 = vmul.f32 %v3562_v38, %v3557_v43  ;;  %v3558_v46 = vmul.f32 %v4432_v37, %v3542_v56 }
0x156e   :  { %v3569_v48 = vadd.f32 %v3568_v39, %v3563_v51  ;;  %v3564_v49 = vmul.f32 %v3562_v38, %v3558_v46 }
0x1570   :  { %3571 = vst.msk [vmem:[#allocation2] sm:$0xff] %vm51_vm0, %v3569_v48  ;;  %v3570_v50 = vadd.f32 %v3568_v39, %v3564_v49 }
0x1572   :  { %3572 = vst.msk [vmem:[#allocation2 + $0x8] sm:$0xff] %vm51_vm0, %v3570_v50 }
0x1579   :  { %v3581_v44 = vld [vmem:[%s3580_s14] sm:$0x1]  ;;  %v3884_v36 = vld [vmem:[%s3773_s15 + $0x8] sm:$0x1] }
0x157a   :  { %v3578_v52 = vld [vmem:[%s3577_s16] sm:$0x1]  ;;  %v4303_v53 = vpack.i.bf16 %v3884_v36, %v3581_v44  ;;  %v3882_v54 = vld [vmem:[%s3771_s13 + $0x8] sm:$0x1] }
0x157b   :  { %v4298_v13 = vpack.i.bf16 %v3882_v54, %v3578_v52  ;;  %v3584_v55 = vld [vmem:[%s3583_s8] sm:$0x1]  ;;  %v3886_v57 = vld [vmem:[%s3775_s17 + $0x8] sm:$0x1] }
0x157c   :  { %4304 = vrot.lane.b32.xlu1 %v4303_v53, %s4481_s2  ;;  %v4308_v15 = vpack.i.bf16 %v3886_v57, %v3584_v55  ;;  %v3880_v60 = vld [vmem:[%s3769_s25 + $0x8] sm:$0x1]  ;;  %v3575_v0 = vld [vmem:[%s3574_s26] sm:$0x1] }
0x157d   :  { %4299 = vrot.lane.b32.xlu0 %v4298_v13, %s4488_s3 }
0x1580   :  { %4309 = vrot.lane.b32.xlu1 %v4308_v15, %s4475_s19 }
0x15ee   :  { %v4305_v58 = vpop.permute.xlu1 %4304 }
0x15ef   :  { %v4300_v59 = vpop.permute.xlu0 %4299  ;;  %v4307_v23 = vunpack.i.h.bf16 %v4305_v58  ;;  %v4306_v61 = vunpack.i.l.bf16 %v4305_v58 }
0x15f0   :  { %v4302_v31 = vunpack.i.h.bf16 %v4300_v59  ;;  %v4301_v32 = vunpack.i.l.bf16 %v4300_v59 }
0x15f2   :  { %v3629_v63 = vsel %vm51_vm0, %v3880_v60, %v4302_v31  ;;  %v4310_v1 = vpop.permute.xlu1 %4309  ;;  %v3597_v2 = vsel %vm51_vm0, %v3575_v0, %v4301_v32 }
0x15f3   :  { %v4312_v3 = vunpack.i.h.bf16 %v4310_v1  ;;  %v4311_v8 = vunpack.i.l.bf16 %v4310_v1  ;;  %v3630_v5 = vsel %vm1752_vm5, %v3629_v63, %v4307_v23  ;;  %v3598_v40 = vsel %vm1752_vm5, %v3597_v2, %v4306_v61 }
0x15f5   :  { %v3631_v6 = vsel %vm3599_vm6, %v3630_v5, %v4312_v3  ;;  %v3600_v9 = vsel %vm3599_vm6, %v3598_v40, %v4311_v8 }
0x15f6   :  { %v3633_v10 = vrot.slane %v3631_v6, 7 }
0x15f8   :  { %v3636_v41 = vsel %vm3635_vm7, %v3600_v9, %v3633_v10 }
0x15f9   :  { %v3637_v42 = vpack.c.bf16 %v3636_v41, %v3636_v41 }
0x15fb   :  { %4246 = vmatmul.mubr.bf16.vlgmr.msra.gmra.mrb[48].mxu0 %v3637_v42 }
0x16ce   :  { %v3743_v12 = vpop.f32.mrb[48].mxu0 }
0x16cf   :  { %v3744_v14 = vadd.f32 %v3887_v11, %v3743_v12  ;;  %v4247_v17 = vpop.f32.mrb[49].mxu0 }
0x16d0   :  { %v3746_v18 = vpop.f32.mrb[50].mxu0 }
0x16d1   :  { %v4248_v47 = vpop.f32.mrb[51].mxu0  ;;  %3750 = vst.msk [vmem:[#allocation5] sm:$0x3] %vm3749_vm8, %v3744_v14 }
0x16d2   :  { %4456 = shalt.err (!%p4453_p9)
}
0x16d3   :  { %s4457_s11 = scalar_lea.hbm %s5194_s12, 32 }
0x16d4   :  { %p4458_p10 = scmp.ne.s32.totalorder %s5194_s12, %s4457_s11  ;;  %p4461_p11 = scmp.lt.u32.totalorder %s4457_s11, %s5194_s12 }
0x16d6   :  { %p4463_p12 = pnand %p4461_p11, %p4458_p10 }
0x16d8   :  { %4466 = shalt.err (!%p4463_p12)
}
0x16d9   :  { %3760 = dma.vmem_to_hbm [thread:$0]  %s3758_s29, 32, %s5194_s12, [#allocation6]  }
0x16da   :  { %4469 = dma.done.wait [#allocation6], 32  }
0x16db   :  { %4470 = vsyncadd [#allocation6], 4294967264 }
0x16dc   :  { %3764 = vsyncpa [#allocation6], 1 }

</bundles_post_ra>
